<compile_context>
chip_gen: v7x
topology: tpu7x:2x2x1
jax: 0.10.0
libtpu: 0.0.40
codegen_flags: <defaults>
</compile_context>

<pallas_src>
import numpy as np

import jax
import jax.numpy as jnp
from jax.experimental import pallas as pl
from jax.experimental.pallas import tpu as pltpu


# --------------------------------------------------------------------------
# Static LeNet dimensions (fc1 = 16*5*5 implies a 3x32x32 input).
# --------------------------------------------------------------------------
IN_C, IN_H, IN_W = 3, 32, 32
K = 5
C1_OC, C1_OH, C1_OW = 6, 28, 28           # conv1 output
P1_H, P1_W = 14, 14                       # after pool1
C2_OC, C2_OH, C2_OW = 16, 10, 10          # conv2 output
P2_H, P2_W = 5, 5                         # after pool2
FC1, FC2, FC3 = 120, 84, 10

LANE_B = 4                                 # images packed along lanes per grid step
SLAB1_W = LANE_B * IN_W + (K - 1)          # 132: conv1 input slab width (4 shift-pad lanes)
SLAB2_W = LANE_B * P1_W + (K - 1)          # 60:  conv2 input slab width (4 zero-pad lanes)
CONV1_N = LANE_B * IN_W                    # 128 lanes per conv1 GEMM
CONV2_N = LANE_B * P1_W                    # 56 lanes per conv2 GEMM
Z_W = P2_W * LANE_B                        # 20: pool2 output (pw-major) lanes


# --------------------------------------------------------------------------
# The fused Pallas kernel: one lane-packed group of LANE_B images per step.
# --------------------------------------------------------------------------
def _lenet_kernel(x_ref, a1_ref, b1_ref, s1e_ref, s1o_ref, l10_ref, l11_ref,
                  a2_ref, b2_ref, s2e_ref, s2o_ref, l20_ref, l21_ref,
                  wf1_ref, bf1_ref, wf2_ref, bf2_ref, wf3_ref, bf3_ref,
                  o_ref):
    bf16 = jnp.bfloat16

    def mm(a, b):
        return jnp.dot(a, b, preferred_element_type=jnp.float32)

    def conv_relu(x2d, a_ref, bias, n):
        # x2d: (C*H, n + K-1) bf16 ; a_ref: (K, OC*OH, C*H) bf16 -> (OC*OH, n) bf16
        acc = mm(a_ref[0], x2d[:, 0:n])
        for j in range(1, K):
            acc = acc + mm(a_ref[j], x2d[:, j:j + n])
        return jnp.maximum(acc + bias, 0.0).astype(bf16)

    def pool2x2(y, se, so, l0, l1):
        # 2x2 max-pool via exact 0/1 selection matmuls: columns (lanes), then rows.
        p = jnp.maximum(mm(y, se), mm(y, so)).astype(bf16)
        return jnp.maximum(mm(l0, p), mm(l1, p)).astype(bf16)

    x2d = x_ref[0]                                                     # (96, 132)
    y = conv_relu(x2d, a1_ref, b1_ref[...], CONV1_N)                   # (168, 128)
    y = pool2x2(y, s1e_ref[...], s1o_ref[...],
                l10_ref[...], l11_ref[...])                            # (84, 60)
    z = conv_relu(y, a2_ref, b2_ref[...], CONV2_N)                     # (160, 56)
    z = pool2x2(z, s2e_ref[...], s2o_ref[...],
                l20_ref[...], l21_ref[...])                            # (80, 20)

    # fc1: accumulate per spatial column pw; pool2 emitted pw-major columns so
    # each slice is a contiguous (80, LANE_B) lane block (whole group at once).
    h = mm(wf1_ref[0], z[:, 0:LANE_B])
    for pw in range(1, P2_W):
        h = h + mm(wf1_ref[pw], z[:, pw * LANE_B:(pw + 1) * LANE_B])
    h = jnp.maximum(h + bf1_ref[...], 0.0).astype(bf16)                # (120, LANE_B)
    h = jnp.maximum(mm(wf2_ref[...], h) + bf2_ref[...], 0.0).astype(bf16)  # (84, LANE_B)
    o_ref[0] = mm(wf3_ref[...], h) + bf3_ref[...]                      # (10, LANE_B)


_KP_KEYS = ('a1', 'b1', 's1e', 's1o', 'l10', 'l11',
            'a2', 'b2', 's2e', 's2o', 'l20', 'l21',
            'wf1', 'bf1', 'wf2', 'bf2', 'wf3', 'bf3')


@jax.jit
def lenet_forward(x, kp):
    """x: (B, 3, 32, 32) float32 NCHW.  Returns (B, 10) float32 logits."""
    b = x.shape[0]
    g = (b + LANE_B - 1) // LANE_B
    bp = g * LANE_B
    xf = x.astype(jnp.float32)
    if bp != b:
        xf = jnp.pad(xf, ((0, bp - b), (0, 0), (0, 0), (0, 0)))
    # (G, LANE_B, C, H, W) -> (G, C, H, LANE_B, W) -> (G, C*H, LANE_B*W) + K-1 pad lanes.
    slab = xf.reshape(g, LANE_B, IN_C, IN_H, IN_W).transpose(0, 2, 3, 1, 4)
    slab = slab.reshape(g, IN_C * IN_H, LANE_B * IN_W)
    slab = jnp.pad(slab, ((0, 0), (0, 0), (0, K - 1))).astype(jnp.bfloat16)

    weights = [kp[k] for k in _KP_KEYS]
    in_specs = [pl.BlockSpec((1, IN_C * IN_H, SLAB1_W), lambda i: (i, 0, 0))]
    for w in weights:  # full-array blocks, constant index map -> VMEM-resident
        in_specs.append(pl.BlockSpec(w.shape, lambda i, _n=w.ndim: (0,) * _n))

    out = pl.pallas_call(
        _lenet_kernel,
        out_shape=jax.ShapeDtypeStruct((g, FC3, LANE_B), jnp.float32),
        grid_spec=pltpu.PrefetchScalarGridSpec(
            num_scalar_prefetch=0,
            grid=(g,),
            in_specs=in_specs,
            out_specs=pl.BlockSpec((1, FC3, LANE_B), lambda i: (i, 0, 0)),
        ),
        compiler_params=pltpu.CompilerParams(
            dimension_semantics=("parallel",)),
    )(slab, *weights)
    return out.transpose(0, 2, 1).reshape(bp, FC3)[:b]


# --------------------------------------------------------------------------
# One-time parameter preparation (PyTorch layouts -> kernel layouts).
# --------------------------------------------------------------------------
def _banded_conv_weights(w, in_h):
    """w: (OC, C, K, K) OIHW.  Returns (K, OC*OH, C*in_h) with
    A[j][(oc*OH+oh), (c*in_h+h)] = w[oc, c, h-oh, j] for 0 <= h-oh < K,
    so that sum_j A[j] @ x[:, j:j+N] is the VALID conv with x as (C*H, lanes)."""
    w = np.asarray(w, np.float32)
    oc_n, c_n, k, _ = w.shape
    oh_n = in_h - k + 1
    a = np.zeros((k, oc_n * oh_n, c_n * in_h), np.float32)
    for j in range(k):
        for oc in range(oc_n):
            for oh in range(oh_n):
                for c in range(c_n):
                    a[j, oc * oh_n + oh, c * in_h + oh:c * in_h + oh + k] = w[oc, c, :, j]
    return a


def _col_pool_selectors(in_w, out_w, n_out, out_col):
    """(LANE_B*in_w, out_w) 0/1 matrices pooling even/odd columns per image.
    Input column layout is b*in_w + ow; output column given by out_col(b, m)."""
    se = np.zeros((LANE_B * in_w, out_w), np.float32)
    so = np.zeros((LANE_B * in_w, out_w), np.float32)
    for b in range(LANE_B):
        for m in range(n_out):
            se[b * in_w + 2 * m, out_col(b, m)] = 1.0
            so[b * in_w + 2 * m + 1, out_col(b, m)] = 1.0
    return se, so


def _row_pool_selectors(c_n, h):
    """(c_n*h//2, c_n*h) 0/1 matrices selecting even / odd rows per channel."""
    ph = h // 2
    l0 = np.zeros((c_n * ph, c_n * h), np.float32)
    l1 = np.zeros((c_n * ph, c_n * h), np.float32)
    for c in range(c_n):
        for r in range(ph):
            l0[c * ph + r, c * h + 2 * r] = 1.0
            l1[c * ph + r, c * h + 2 * r + 1] = 1.0
    return l0, l1


def prepare_kernel_params(p):
    a1 = _banded_conv_weights(p['conv1_w'], IN_H)                         # (5, 168, 96)
    a2 = _banded_conv_weights(p['conv2_w'], P1_H)                         # (5, 160, 84)
    b1 = np.repeat(np.asarray(p['conv1_b'], np.float32), C1_OH)[:, None]  # (168, 1)
    b2 = np.repeat(np.asarray(p['conv2_b'], np.float32), C2_OH)[:, None]  # (160, 1)
    # pool1 columns: (128, 60), image-major output + 4 zero pad lanes for conv2 shifts.
    s1e, s1o = _col_pool_selectors(IN_W, SLAB2_W, P1_W, lambda b, m: b * P1_W + m)
    l10, l11 = _row_pool_selectors(C1_OC, C1_OH)                          # (84, 168)
    # pool2 columns: (56, 20), pw-major output so fc1 per-pw slices are contiguous.
    s2e, s2o = _col_pool_selectors(P1_W, Z_W, P2_W, lambda b, m: m * LANE_B + b)
    l20, l21 = _row_pool_selectors(C2_OC, C2_OH)                          # (80, 160)
    # fc1: PyTorch flat index = c*25 + ph*5 + pw ; kernel needs per-pw slabs
    # wf1[pw][n, c*5+ph] so that h = sum_pw wf1[pw] @ z[:, pw*LANE_B:(pw+1)*LANE_B].
    wf1 = np.asarray(p['fc1_w'], np.float32).reshape(FC1, C2_OC, P2_H, P2_W)
    wf1 = wf1.transpose(3, 0, 1, 2).reshape(P2_W, FC1, C2_OC * P2_H)      # (5, 120, 80)

    bf16, f32 = jnp.bfloat16, jnp.float32
    return dict(
        a1=jnp.asarray(a1, bf16), b1=jnp.asarray(b1, f32),
        s1e=jnp.asarray(s1e, bf16), s1o=jnp.asarray(s1o, bf16),
        l10=jnp.asarray(l10, bf16), l11=jnp.asarray(l11, bf16),
        a2=jnp.asarray(a2, bf16), b2=jnp.asarray(b2, f32),
        s2e=jnp.asarray(s2e, bf16), s2o=jnp.asarray(s2o, bf16),
        l20=jnp.asarray(l20, bf16), l21=jnp.asarray(l21, bf16),
        wf1=jnp.asarray(wf1, bf16),
        bf1=jnp.asarray(np.asarray(p['fc1_b'], np.float32)[:, None], f32),
        wf2=jnp.asarray(np.asarray(p['fc2_w'], np.float32), bf16),
        bf2=jnp.asarray(np.asarray(p['fc2_b'], np.float32)[:, None], f32),
        wf3=jnp.asarray(np.asarray(p['fc3_w'], np.float32), bf16),
        bf3=jnp.asarray(np.asarray(p['fc3_b'], np.float32)[:, None], f32),
    )


# --------------------------------------------------------------------------
# Parameter init (PyTorch layouts) and pure-JAX reference for the check.
# --------------------------------------------------------------------------
def init_params(key):
    ks = jax.random.split(key, 10)

    def u(k, shape, fan_in):
        bound = 1.0 / jnp.sqrt(float(fan_in))
        return jax.random.uniform(k, shape, jnp.float32, -bound, bound)

    return {
        'conv1_w': u(ks[0], (6, 3, 5, 5), 3 * 5 * 5),
        'conv1_b': u(ks[1], (6,), 3 * 5 * 5),
        'conv2_w': u(ks[2], (16, 6, 5, 5), 6 * 5 * 5),
        'conv2_b': u(ks[3], (16,), 6 * 5 * 5),
        'fc1_w': u(ks[4], (120, 400), 400),
        'fc1_b': u(ks[5], (120,), 400),
        'fc2_w': u(ks[6], (84, 120), 120),
        'fc2_b': u(ks[7], (84,), 120),
        'fc3_w': u(ks[8], (10, 84), 84),
        'fc3_b': u(ks[9], (10,), 84),
    }


def ref_forward(x, p):
    hi = jax.lax.Precision.HIGHEST

    def conv(x, w, b):
        y = jax.lax.conv_general_dilated(
            x, w, window_strides=(1, 1), padding='VALID',
            dimension_numbers=('NCHW', 'OIHW', 'NCHW'), precision=hi)
        return jax.nn.relu(y + b[None, :, None, None])

    def pool(x):
        bb, c, h, w = x.shape
        return x.reshape(bb, c, h // 2, 2, w // 2, 2).max(axis=(3, 5))

    y = pool(conv(x, p['conv1_w'], p['conv1_b']))
    y = pool(conv(y, p['conv2_w'], p['conv2_b']))
    y = y.reshape(y.shape[0], -1)
    y = jax.nn.relu(jnp.dot(y, p['fc1_w'].T, precision=hi) + p['fc1_b'])
    y = jax.nn.relu(jnp.dot(y, p['fc2_w'].T, precision=hi) + p['fc2_b'])
    return jnp.dot(y, p['fc3_w'].T, precision=hi) + p['fc3_b']


if __name__ == "__main__":
    key = jax.random.PRNGKey(0)
    pkey, xkey = jax.random.split(key)
    params = init_params(pkey)
    kparams = prepare_kernel_params(params)       # one-time layout prep
    x = jax.random.normal(xkey, (2, IN_C, IN_H, IN_W), jnp.float32)

    out = jax.block_until_ready(lenet_forward(x, kparams))
    assert out.shape == (2, 10), out.shape

    ref = ref_forward(x, params)
    max_err = float(jnp.max(jnp.abs(out - ref)))
    # Tolerance accounts for bf16 matmul operands (f32 accumulation) vs the
    # f32 HIGHEST-precision reference (~1e-3-class logit error expected).
    assert max_err < 2e-2, f"max abs error {max_err}"

    print("KERNEL_OK")
</pallas_src>

<mosaic_0001>
module attributes {stable_mosaic.version = 11 : i64} {
  func.func @_lenet_kernel(%arg0: i32, %arg1: memref<1x96x132xbf16, #tpu.memory_space<vmem>>, %arg2: memref<5x168x96xbf16, #tpu.memory_space<vmem>>, %arg3: memref<168x1xf32, #tpu.memory_space<vmem>>, %arg4: memref<128x60xbf16, #tpu.memory_space<vmem>>, %arg5: memref<128x60xbf16, #tpu.memory_space<vmem>>, %arg6: memref<84x168xbf16, #tpu.memory_space<vmem>>, %arg7: memref<84x168xbf16, #tpu.memory_space<vmem>>, %arg8: memref<5x160x84xbf16, #tpu.memory_space<vmem>>, %arg9: memref<160x1xf32, #tpu.memory_space<vmem>>, %arg10: memref<56x20xbf16, #tpu.memory_space<vmem>>, %arg11: memref<56x20xbf16, #tpu.memory_space<vmem>>, %arg12: memref<80x160xbf16, #tpu.memory_space<vmem>>, %arg13: memref<80x160xbf16, #tpu.memory_space<vmem>>, %arg14: memref<5x120x80xbf16, #tpu.memory_space<vmem>>, %arg15: memref<120x1xf32, #tpu.memory_space<vmem>>, %arg16: memref<84x120xbf16, #tpu.memory_space<vmem>>, %arg17: memref<84x1xf32, #tpu.memory_space<vmem>>, %arg18: memref<10x84xbf16, #tpu.memory_space<vmem>>, %arg19: memref<10x1xf32, #tpu.memory_space<vmem>>, %arg20: memref<1x10x4xf32, #tpu.memory_space<vmem>>) attributes {dimension_semantics = [#tpu.dimension_semantics<parallel>], iteration_bounds = array<i64: 1>, scalar_prefetch = 0 : i64, scratch_operands = 0 : i64, tpu.core_type = #tpu.core_type<tc>, window_params = [{transform_indices = @transform_0, window_bounds = array<i64: 1, 96, 132>}, {pipeline_mode = #tpu.pipeline_mode<synchronous>, transform_indices = @transform_1, window_bounds = array<i64: 5, 168, 96>}, {pipeline_mode = #tpu.pipeline_mode<synchronous>, transform_indices = @transform_2, window_bounds = array<i64: 168, 1>}, {pipeline_mode = #tpu.pipeline_mode<synchronous>, transform_indices = @transform_3, window_bounds = array<i64: 128, 60>}, {pipeline_mode = #tpu.pipeline_mode<synchronous>, transform_indices = @transform_4, window_bounds = array<i64: 128, 60>}, {pipeline_mode = #tpu.pipeline_mode<synchronous>, transform_indices = @transform_5, window_bounds = array<i64: 84, 168>}, {pipeline_mode = #tpu.pipeline_mode<synchronous>, transform_indices = @transform_6, window_bounds = array<i64: 84, 168>}, {pipeline_mode = #tpu.pipeline_mode<synchronous>, transform_indices = @transform_7, window_bounds = array<i64: 5, 160, 84>}, {pipeline_mode = #tpu.pipeline_mode<synchronous>, transform_indices = @transform_8, window_bounds = array<i64: 160, 1>}, {pipeline_mode = #tpu.pipeline_mode<synchronous>, transform_indices = @transform_9, window_bounds = array<i64: 56, 20>}, {pipeline_mode = #tpu.pipeline_mode<synchronous>, transform_indices = @transform_10, window_bounds = array<i64: 56, 20>}, {pipeline_mode = #tpu.pipeline_mode<synchronous>, transform_indices = @transform_11, window_bounds = array<i64: 80, 160>}, {pipeline_mode = #tpu.pipeline_mode<synchronous>, transform_indices = @transform_12, window_bounds = array<i64: 80, 160>}, {pipeline_mode = #tpu.pipeline_mode<synchronous>, transform_indices = @transform_13, window_bounds = array<i64: 5, 120, 80>}, {pipeline_mode = #tpu.pipeline_mode<synchronous>, transform_indices = @transform_14, window_bounds = array<i64: 120, 1>}, {pipeline_mode = #tpu.pipeline_mode<synchronous>, transform_indices = @transform_15, window_bounds = array<i64: 84, 120>}, {pipeline_mode = #tpu.pipeline_mode<synchronous>, transform_indices = @transform_16, window_bounds = array<i64: 84, 1>}, {pipeline_mode = #tpu.pipeline_mode<synchronous>, transform_indices = @transform_17, window_bounds = array<i64: 10, 84>}, {pipeline_mode = #tpu.pipeline_mode<synchronous>, transform_indices = @transform_18, window_bounds = array<i64: 10, 1>}, {transform_indices = @transform_19, window_bounds = array<i64: 1, 10, 4>}]} {
    %c0 = arith.constant 0 : index
    %c0_0 = arith.constant 0 : index
    %c0_1 = arith.constant 0 : index
    %0 = vector.load %arg1[%c0, %c0_0, %c0_1] : memref<1x96x132xbf16, #tpu.memory_space<vmem>>, vector<1x96x132xbf16>
    %1 = vector.shape_cast %0 : vector<1x96x132xbf16> to vector<96x132xbf16>
    %c0_2 = arith.constant 0 : index
    %c0_3 = arith.constant 0 : index
    %2 = vector.load %arg3[%c0_2, %c0_3] : memref<168x1xf32, #tpu.memory_space<vmem>>, vector<168x1xf32>
    %c0_4 = arith.constant 0 : index
    %c0_5 = arith.constant 0 : index
    %c0_6 = arith.constant 0 : index
    %3 = vector.load %arg2[%c0_4, %c0_5, %c0_6] : memref<5x168x96xbf16, #tpu.memory_space<vmem>>, vector<1x168x96xbf16>
    %4 = vector.shape_cast %3 : vector<1x168x96xbf16> to vector<168x96xbf16>
    %5 = vector.extract_strided_slice %1 {offsets = [0, 0], sizes = [96, 128], strides = [1, 1]} : vector<96x132xbf16> to vector<96x128xbf16>
    %cst = arith.constant dense<0.000000e+00> : vector<168x128xf32>
    %6 = tpu.matmul %4, %5, %cst {dimension_numbers = #tpu.dot_dimension_numbers<[1], [0], [0], [1], [0, 0, 1, 1], [], []>} : vector<168x96xbf16>, vector<96x128xbf16>, vector<168x128xf32> -> vector<168x128xf32>
    %c1 = arith.constant 1 : index
    %c0_7 = arith.constant 0 : index
    %c0_8 = arith.constant 0 : index
    %7 = vector.load %arg2[%c1, %c0_7, %c0_8] : memref<5x168x96xbf16, #tpu.memory_space<vmem>>, vector<1x168x96xbf16>
    %8 = vector.shape_cast %7 : vector<1x168x96xbf16> to vector<168x96xbf16>
    %9 = vector.extract_strided_slice %1 {offsets = [0, 1], sizes = [96, 128], strides = [1, 1]} : vector<96x132xbf16> to vector<96x128xbf16>
    %cst_9 = arith.constant dense<0.000000e+00> : vector<168x128xf32>
    %10 = tpu.matmul %8, %9, %cst_9 {dimension_numbers = #tpu.dot_dimension_numbers<[1], [0], [0], [1], [0, 0, 1, 1], [], []>} : vector<168x96xbf16>, vector<96x128xbf16>, vector<168x128xf32> -> vector<168x128xf32>
    %11 = arith.addf %6, %10 : vector<168x128xf32>
    %c2 = arith.constant 2 : index
    %c0_10 = arith.constant 0 : index
    %c0_11 = arith.constant 0 : index
    %12 = vector.load %arg2[%c2, %c0_10, %c0_11] : memref<5x168x96xbf16, #tpu.memory_space<vmem>>, vector<1x168x96xbf16>
    %13 = vector.shape_cast %12 : vector<1x168x96xbf16> to vector<168x96xbf16>
    %14 = vector.extract_strided_slice %1 {offsets = [0, 2], sizes = [96, 128], strides = [1, 1]} : vector<96x132xbf16> to vector<96x128xbf16>
    %cst_12 = arith.constant dense<0.000000e+00> : vector<168x128xf32>
    %15 = tpu.matmul %13, %14, %cst_12 {dimension_numbers = #tpu.dot_dimension_numbers<[1], [0], [0], [1], [0, 0, 1, 1], [], []>} : vector<168x96xbf16>, vector<96x128xbf16>, vector<168x128xf32> -> vector<168x128xf32>
    %16 = arith.addf %11, %15 : vector<168x128xf32>
    %c3 = arith.constant 3 : index
    %c0_13 = arith.constant 0 : index
    %c0_14 = arith.constant 0 : index
    %17 = vector.load %arg2[%c3, %c0_13, %c0_14] : memref<5x168x96xbf16, #tpu.memory_space<vmem>>, vector<1x168x96xbf16>
    %18 = vector.shape_cast %17 : vector<1x168x96xbf16> to vector<168x96xbf16>
    %19 = vector.extract_strided_slice %1 {offsets = [0, 3], sizes = [96, 128], strides = [1, 1]} : vector<96x132xbf16> to vector<96x128xbf16>
    %cst_15 = arith.constant dense<0.000000e+00> : vector<168x128xf32>
    %20 = tpu.matmul %18, %19, %cst_15 {dimension_numbers = #tpu.dot_dimension_numbers<[1], [0], [0], [1], [0, 0, 1, 1], [], []>} : vector<168x96xbf16>, vector<96x128xbf16>, vector<168x128xf32> -> vector<168x128xf32>
    %21 = arith.addf %16, %20 : vector<168x128xf32>
    %c4 = arith.constant 4 : index
    %c0_16 = arith.constant 0 : index
    %c0_17 = arith.constant 0 : index
    %22 = vector.load %arg2[%c4, %c0_16, %c0_17] : memref<5x168x96xbf16, #tpu.memory_space<vmem>>, vector<1x168x96xbf16>
    %23 = vector.shape_cast %22 : vector<1x168x96xbf16> to vector<168x96xbf16>
    %24 = vector.extract_strided_slice %1 {offsets = [0, 4], sizes = [96, 128], strides = [1, 1]} : vector<96x132xbf16> to vector<96x128xbf16>
    %cst_18 = arith.constant dense<0.000000e+00> : vector<168x128xf32>
    %25 = tpu.matmul %23, %24, %cst_18 {dimension_numbers = #tpu.dot_dimension_numbers<[1], [0], [0], [1], [0, 0, 1, 1], [], []>} : vector<168x96xbf16>, vector<96x128xbf16>, vector<168x128xf32> -> vector<168x128xf32>
    %26 = arith.addf %21, %25 : vector<168x128xf32>
    %27 = vector.broadcast %2 : vector<168x1xf32> to vector<168x128xf32>
    %28 = arith.addf %26, %27 : vector<168x128xf32>
    %cst_19 = arith.constant 0.000000e+00 : f32
    %29 = vector.broadcast %cst_19 : f32 to vector<168x128xf32>
    %30 = arith.maximumf %28, %29 : vector<168x128xf32>
    %31 = arith.truncf %30 : vector<168x128xf32> to vector<168x128xbf16>
    %c0_20 = arith.constant 0 : index
    %c0_21 = arith.constant 0 : index
    %32 = vector.load %arg4[%c0_20, %c0_21] : memref<128x60xbf16, #tpu.memory_space<vmem>>, vector<128x60xbf16>
    %c0_22 = arith.constant 0 : index
    %c0_23 = arith.constant 0 : index
    %33 = vector.load %arg5[%c0_22, %c0_23] : memref<128x60xbf16, #tpu.memory_space<vmem>>, vector<128x60xbf16>
    %c0_24 = arith.constant 0 : index
    %c0_25 = arith.constant 0 : index
    %34 = vector.load %arg6[%c0_24, %c0_25] : memref<84x168xbf16, #tpu.memory_space<vmem>>, vector<84x168xbf16>
    %c0_26 = arith.constant 0 : index
    %c0_27 = arith.constant 0 : index
    %35 = vector.load %arg7[%c0_26, %c0_27] : memref<84x168xbf16, #tpu.memory_space<vmem>>, vector<84x168xbf16>
    %cst_28 = arith.constant dense<0.000000e+00> : vector<168x60xf32>
    %36 = tpu.matmul %31, %32, %cst_28 {dimension_numbers = #tpu.dot_dimension_numbers<[1], [0], [0], [1], [0, 0, 1, 1], [], []>} : vector<168x128xbf16>, vector<128x60xbf16>, vector<168x60xf32> -> vector<168x60xf32>
    %cst_29 = arith.constant dense<0.000000e+00> : vector<168x60xf32>
    %37 = tpu.matmul %31, %33, %cst_29 {dimension_numbers = #tpu.dot_dimension_numbers<[1], [0], [0], [1], [0, 0, 1, 1], [], []>} : vector<168x128xbf16>, vector<128x60xbf16>, vector<168x60xf32> -> vector<168x60xf32>
    %38 = arith.maximumf %36, %37 : vector<168x60xf32>
    %39 = arith.truncf %38 : vector<168x60xf32> to vector<168x60xbf16>
    %cst_30 = arith.constant dense<0.000000e+00> : vector<84x60xf32>
    %40 = tpu.matmul %34, %39, %cst_30 {dimension_numbers = #tpu.dot_dimension_numbers<[1], [0], [0], [1], [0, 0, 1, 1], [], []>} : vector<84x168xbf16>, vector<168x60xbf16>, vector<84x60xf32> -> vector<84x60xf32>
    %cst_31 = arith.constant dense<0.000000e+00> : vector<84x60xf32>
    %41 = tpu.matmul %35, %39, %cst_31 {dimension_numbers = #tpu.dot_dimension_numbers<[1], [0], [0], [1], [0, 0, 1, 1], [], []>} : vector<84x168xbf16>, vector<168x60xbf16>, vector<84x60xf32> -> vector<84x60xf32>
    %42 = arith.maximumf %40, %41 : vector<84x60xf32>
    %43 = arith.truncf %42 : vector<84x60xf32> to vector<84x60xbf16>
    %c0_32 = arith.constant 0 : index
    %c0_33 = arith.constant 0 : index
    %44 = vector.load %arg9[%c0_32, %c0_33] : memref<160x1xf32, #tpu.memory_space<vmem>>, vector<160x1xf32>
    %c0_34 = arith.constant 0 : index
    %c0_35 = arith.constant 0 : index
    %c0_36 = arith.constant 0 : index
    %45 = vector.load %arg8[%c0_34, %c0_35, %c0_36] : memref<5x160x84xbf16, #tpu.memory_space<vmem>>, vector<1x160x84xbf16>
    %46 = vector.shape_cast %45 : vector<1x160x84xbf16> to vector<160x84xbf16>
    %47 = vector.extract_strided_slice %43 {offsets = [0, 0], sizes = [84, 56], strides = [1, 1]} : vector<84x60xbf16> to vector<84x56xbf16>
    %cst_37 = arith.constant dense<0.000000e+00> : vector<160x56xf32>
    %48 = tpu.matmul %46, %47, %cst_37 {dimension_numbers = #tpu.dot_dimension_numbers<[1], [0], [0], [1], [0, 0, 1, 1], [], []>} : vector<160x84xbf16>, vector<84x56xbf16>, vector<160x56xf32> -> vector<160x56xf32>
    %c1_38 = arith.constant 1 : index
    %c0_39 = arith.constant 0 : index
    %c0_40 = arith.constant 0 : index
    %49 = vector.load %arg8[%c1_38, %c0_39, %c0_40] : memref<5x160x84xbf16, #tpu.memory_space<vmem>>, vector<1x160x84xbf16>
    %50 = vector.shape_cast %49 : vector<1x160x84xbf16> to vector<160x84xbf16>
    %51 = vector.extract_strided_slice %43 {offsets = [0, 1], sizes = [84, 56], strides = [1, 1]} : vector<84x60xbf16> to vector<84x56xbf16>
    %cst_41 = arith.constant dense<0.000000e+00> : vector<160x56xf32>
    %52 = tpu.matmul %50, %51, %cst_41 {dimension_numbers = #tpu.dot_dimension_numbers<[1], [0], [0], [1], [0, 0, 1, 1], [], []>} : vector<160x84xbf16>, vector<84x56xbf16>, vector<160x56xf32> -> vector<160x56xf32>
    %53 = arith.addf %48, %52 : vector<160x56xf32>
    %c2_42 = arith.constant 2 : index
    %c0_43 = arith.constant 0 : index
    %c0_44 = arith.constant 0 : index
    %54 = vector.load %arg8[%c2_42, %c0_43, %c0_44] : memref<5x160x84xbf16, #tpu.memory_space<vmem>>, vector<1x160x84xbf16>
    %55 = vector.shape_cast %54 : vector<1x160x84xbf16> to vector<160x84xbf16>
    %56 = vector.extract_strided_slice %43 {offsets = [0, 2], sizes = [84, 56], strides = [1, 1]} : vector<84x60xbf16> to vector<84x56xbf16>
    %cst_45 = arith.constant dense<0.000000e+00> : vector<160x56xf32>
    %57 = tpu.matmul %55, %56, %cst_45 {dimension_numbers = #tpu.dot_dimension_numbers<[1], [0], [0], [1], [0, 0, 1, 1], [], []>} : vector<160x84xbf16>, vector<84x56xbf16>, vector<160x56xf32> -> vector<160x56xf32>
    %58 = arith.addf %53, %57 : vector<160x56xf32>
    %c3_46 = arith.constant 3 : index
    %c0_47 = arith.constant 0 : index
    %c0_48 = arith.constant 0 : index
    %59 = vector.load %arg8[%c3_46, %c0_47, %c0_48] : memref<5x160x84xbf16, #tpu.memory_space<vmem>>, vector<1x160x84xbf16>
    %60 = vector.shape_cast %59 : vector<1x160x84xbf16> to vector<160x84xbf16>
    %61 = vector.extract_strided_slice %43 {offsets = [0, 3], sizes = [84, 56], strides = [1, 1]} : vector<84x60xbf16> to vector<84x56xbf16>
    %cst_49 = arith.constant dense<0.000000e+00> : vector<160x56xf32>
    %62 = tpu.matmul %60, %61, %cst_49 {dimension_numbers = #tpu.dot_dimension_numbers<[1], [0], [0], [1], [0, 0, 1, 1], [], []>} : vector<160x84xbf16>, vector<84x56xbf16>, vector<160x56xf32> -> vector<160x56xf32>
    %63 = arith.addf %58, %62 : vector<160x56xf32>
    %c4_50 = arith.constant 4 : index
    %c0_51 = arith.constant 0 : index
    %c0_52 = arith.constant 0 : index
    %64 = vector.load %arg8[%c4_50, %c0_51, %c0_52] : memref<5x160x84xbf16, #tpu.memory_space<vmem>>, vector<1x160x84xbf16>
    %65 = vector.shape_cast %64 : vector<1x160x84xbf16> to vector<160x84xbf16>
    %66 = vector.extract_strided_slice %43 {offsets = [0, 4], sizes = [84, 56], strides = [1, 1]} : vector<84x60xbf16> to vector<84x56xbf16>
    %cst_53 = arith.constant dense<0.000000e+00> : vector<160x56xf32>
    %67 = tpu.matmul %65, %66, %cst_53 {dimension_numbers = #tpu.dot_dimension_numbers<[1], [0], [0], [1], [0, 0, 1, 1], [], []>} : vector<160x84xbf16>, vector<84x56xbf16>, vector<160x56xf32> -> vector<160x56xf32>
    %68 = arith.addf %63, %67 : vector<160x56xf32>
    %69 = vector.broadcast %44 : vector<160x1xf32> to vector<160x56xf32>
    %70 = arith.addf %68, %69 : vector<160x56xf32>
    %cst_54 = arith.constant 0.000000e+00 : f32
    %71 = vector.broadcast %cst_54 : f32 to vector<160x56xf32>
    %72 = arith.maximumf %70, %71 : vector<160x56xf32>
    %73 = arith.truncf %72 : vector<160x56xf32> to vector<160x56xbf16>
    %c0_55 = arith.constant 0 : index
    %c0_56 = arith.constant 0 : index
    %74 = vector.load %arg10[%c0_55, %c0_56] : memref<56x20xbf16, #tpu.memory_space<vmem>>, vector<56x20xbf16>
    %c0_57 = arith.constant 0 : index
    %c0_58 = arith.constant 0 : index
    %75 = vector.load %arg11[%c0_57, %c0_58] : memref<56x20xbf16, #tpu.memory_space<vmem>>, vector<56x20xbf16>
    %c0_59 = arith.constant 0 : index
    %c0_60 = arith.constant 0 : index
    %76 = vector.load %arg12[%c0_59, %c0_60] : memref<80x160xbf16, #tpu.memory_space<vmem>>, vector<80x160xbf16>
    %c0_61 = arith.constant 0 : index
    %c0_62 = arith.constant 0 : index
    %77 = vector.load %arg13[%c0_61, %c0_62] : memref<80x160xbf16, #tpu.memory_space<vmem>>, vector<80x160xbf16>
    %cst_63 = arith.constant dense<0.000000e+00> : vector<160x20xf32>
    %78 = tpu.matmul %73, %74, %cst_63 {dimension_numbers = #tpu.dot_dimension_numbers<[1], [0], [0], [1], [0, 0, 1, 1], [], []>} : vector<160x56xbf16>, vector<56x20xbf16>, vector<160x20xf32> -> vector<160x20xf32>
    %cst_64 = arith.constant dense<0.000000e+00> : vector<160x20xf32>
    %79 = tpu.matmul %73, %75, %cst_64 {dimension_numbers = #tpu.dot_dimension_numbers<[1], [0], [0], [1], [0, 0, 1, 1], [], []>} : vector<160x56xbf16>, vector<56x20xbf16>, vector<160x20xf32> -> vector<160x20xf32>
    %80 = arith.maximumf %78, %79 : vector<160x20xf32>
    %81 = arith.truncf %80 : vector<160x20xf32> to vector<160x20xbf16>
    %cst_65 = arith.constant dense<0.000000e+00> : vector<80x20xf32>
    %82 = tpu.matmul %76, %81, %cst_65 {dimension_numbers = #tpu.dot_dimension_numbers<[1], [0], [0], [1], [0, 0, 1, 1], [], []>} : vector<80x160xbf16>, vector<160x20xbf16>, vector<80x20xf32> -> vector<80x20xf32>
    %cst_66 = arith.constant dense<0.000000e+00> : vector<80x20xf32>
    %83 = tpu.matmul %77, %81, %cst_66 {dimension_numbers = #tpu.dot_dimension_numbers<[1], [0], [0], [1], [0, 0, 1, 1], [], []>} : vector<80x160xbf16>, vector<160x20xbf16>, vector<80x20xf32> -> vector<80x20xf32>
    %84 = arith.maximumf %82, %83 : vector<80x20xf32>
    %85 = arith.truncf %84 : vector<80x20xf32> to vector<80x20xbf16>
    %c0_67 = arith.constant 0 : index
    %c0_68 = arith.constant 0 : index
    %c0_69 = arith.constant 0 : index
    %86 = vector.load %arg14[%c0_67, %c0_68, %c0_69] : memref<5x120x80xbf16, #tpu.memory_space<vmem>>, vector<1x120x80xbf16>
    %87 = vector.shape_cast %86 : vector<1x120x80xbf16> to vector<120x80xbf16>
    %88 = vector.extract_strided_slice %85 {offsets = [0, 0], sizes = [80, 4], strides = [1, 1]} : vector<80x20xbf16> to vector<80x4xbf16>
    %cst_70 = arith.constant dense<0.000000e+00> : vector<120x4xf32>
    %89 = tpu.matmul %87, %88, %cst_70 {dimension_numbers = #tpu.dot_dimension_numbers<[1], [0], [0], [1], [0, 0, 1, 1], [], []>} : vector<120x80xbf16>, vector<80x4xbf16>, vector<120x4xf32> -> vector<120x4xf32>
    %c1_71 = arith.constant 1 : index
    %c0_72 = arith.constant 0 : index
    %c0_73 = arith.constant 0 : index
    %90 = vector.load %arg14[%c1_71, %c0_72, %c0_73] : memref<5x120x80xbf16, #tpu.memory_space<vmem>>, vector<1x120x80xbf16>
    %91 = vector.shape_cast %90 : vector<1x120x80xbf16> to vector<120x80xbf16>
    %92 = vector.extract_strided_slice %85 {offsets = [0, 4], sizes = [80, 4], strides = [1, 1]} : vector<80x20xbf16> to vector<80x4xbf16>
    %cst_74 = arith.constant dense<0.000000e+00> : vector<120x4xf32>
    %93 = tpu.matmul %91, %92, %cst_74 {dimension_numbers = #tpu.dot_dimension_numbers<[1], [0], [0], [1], [0, 0, 1, 1], [], []>} : vector<120x80xbf16>, vector<80x4xbf16>, vector<120x4xf32> -> vector<120x4xf32>
    %94 = arith.addf %89, %93 : vector<120x4xf32>
    %c2_75 = arith.constant 2 : index
    %c0_76 = arith.constant 0 : index
    %c0_77 = arith.constant 0 : index
    %95 = vector.load %arg14[%c2_75, %c0_76, %c0_77] : memref<5x120x80xbf16, #tpu.memory_space<vmem>>, vector<1x120x80xbf16>
    %96 = vector.shape_cast %95 : vector<1x120x80xbf16> to vector<120x80xbf16>
    %97 = vector.extract_strided_slice %85 {offsets = [0, 8], sizes = [80, 4], strides = [1, 1]} : vector<80x20xbf16> to vector<80x4xbf16>
    %cst_78 = arith.constant dense<0.000000e+00> : vector<120x4xf32>
    %98 = tpu.matmul %96, %97, %cst_78 {dimension_numbers = #tpu.dot_dimension_numbers<[1], [0], [0], [1], [0, 0, 1, 1], [], []>} : vector<120x80xbf16>, vector<80x4xbf16>, vector<120x4xf32> -> vector<120x4xf32>
    %99 = arith.addf %94, %98 : vector<120x4xf32>
    %c3_79 = arith.constant 3 : index
    %c0_80 = arith.constant 0 : index
    %c0_81 = arith.constant 0 : index
    %100 = vector.load %arg14[%c3_79, %c0_80, %c0_81] : memref<5x120x80xbf16, #tpu.memory_space<vmem>>, vector<1x120x80xbf16>
    %101 = vector.shape_cast %100 : vector<1x120x80xbf16> to vector<120x80xbf16>
    %102 = vector.extract_strided_slice %85 {offsets = [0, 12], sizes = [80, 4], strides = [1, 1]} : vector<80x20xbf16> to vector<80x4xbf16>
    %cst_82 = arith.constant dense<0.000000e+00> : vector<120x4xf32>
    %103 = tpu.matmul %101, %102, %cst_82 {dimension_numbers = #tpu.dot_dimension_numbers<[1], [0], [0], [1], [0, 0, 1, 1], [], []>} : vector<120x80xbf16>, vector<80x4xbf16>, vector<120x4xf32> -> vector<120x4xf32>
    %104 = arith.addf %99, %103 : vector<120x4xf32>
    %c4_83 = arith.constant 4 : index
    %c0_84 = arith.constant 0 : index
    %c0_85 = arith.constant 0 : index
    %105 = vector.load %arg14[%c4_83, %c0_84, %c0_85] : memref<5x120x80xbf16, #tpu.memory_space<vmem>>, vector<1x120x80xbf16>
    %106 = vector.shape_cast %105 : vector<1x120x80xbf16> to vector<120x80xbf16>
    %107 = vector.extract_strided_slice %85 {offsets = [0, 16], sizes = [80, 4], strides = [1, 1]} : vector<80x20xbf16> to vector<80x4xbf16>
    %cst_86 = arith.constant dense<0.000000e+00> : vector<120x4xf32>
    %108 = tpu.matmul %106, %107, %cst_86 {dimension_numbers = #tpu.dot_dimension_numbers<[1], [0], [0], [1], [0, 0, 1, 1], [], []>} : vector<120x80xbf16>, vector<80x4xbf16>, vector<120x4xf32> -> vector<120x4xf32>
    %109 = arith.addf %104, %108 : vector<120x4xf32>
    %c0_87 = arith.constant 0 : index
    %c0_88 = arith.constant 0 : index
    %110 = vector.load %arg15[%c0_87, %c0_88] : memref<120x1xf32, #tpu.memory_space<vmem>>, vector<120x1xf32>
    %111 = vector.broadcast %110 : vector<120x1xf32> to vector<120x4xf32>
    %112 = arith.addf %109, %111 : vector<120x4xf32>
    %cst_89 = arith.constant 0.000000e+00 : f32
    %113 = vector.broadcast %cst_89 : f32 to vector<120x4xf32>
    %114 = arith.maximumf %112, %113 : vector<120x4xf32>
    %115 = arith.truncf %114 : vector<120x4xf32> to vector<120x4xbf16>
    %c0_90 = arith.constant 0 : index
    %c0_91 = arith.constant 0 : index
    %116 = vector.load %arg16[%c0_90, %c0_91] : memref<84x120xbf16, #tpu.memory_space<vmem>>, vector<84x120xbf16>
    %cst_92 = arith.constant dense<0.000000e+00> : vector<84x4xf32>
    %117 = tpu.matmul %116, %115, %cst_92 {dimension_numbers = #tpu.dot_dimension_numbers<[1], [0], [0], [1], [0, 0, 1, 1], [], []>} : vector<84x120xbf16>, vector<120x4xbf16>, vector<84x4xf32> -> vector<84x4xf32>
    %c0_93 = arith.constant 0 : index
    %c0_94 = arith.constant 0 : index
    %118 = vector.load %arg17[%c0_93, %c0_94] : memref<84x1xf32, #tpu.memory_space<vmem>>, vector<84x1xf32>
    %119 = vector.broadcast %118 : vector<84x1xf32> to vector<84x4xf32>
    %120 = arith.addf %117, %119 : vector<84x4xf32>
    %cst_95 = arith.constant 0.000000e+00 : f32
    %121 = vector.broadcast %cst_95 : f32 to vector<84x4xf32>
    %122 = arith.maximumf %120, %121 : vector<84x4xf32>
    %123 = arith.truncf %122 : vector<84x4xf32> to vector<84x4xbf16>
    %c0_96 = arith.constant 0 : index
    %c0_97 = arith.constant 0 : index
    %124 = vector.load %arg18[%c0_96, %c0_97] : memref<10x84xbf16, #tpu.memory_space<vmem>>, vector<10x84xbf16>
    %cst_98 = arith.constant dense<0.000000e+00> : vector<10x4xf32>
    %125 = tpu.matmul %124, %123, %cst_98 {dimension_numbers = #tpu.dot_dimension_numbers<[1], [0], [0], [1], [0, 0, 1, 1], [], []>} : vector<10x84xbf16>, vector<84x4xbf16>, vector<10x4xf32> -> vector<10x4xf32>
    %c0_99 = arith.constant 0 : index
    %c0_100 = arith.constant 0 : index
    %126 = vector.load %arg19[%c0_99, %c0_100] : memref<10x1xf32, #tpu.memory_space<vmem>>, vector<10x1xf32>
    %127 = vector.broadcast %126 : vector<10x1xf32> to vector<10x4xf32>
    %128 = arith.addf %125, %127 : vector<10x4xf32>
    %c0_101 = arith.constant 0 : index
    %c0_102 = arith.constant 0 : index
    %c0_103 = arith.constant 0 : index
    %129 = vector.load %arg20[%c0_101, %c0_102, %c0_103] : memref<1x10x4xf32, #tpu.memory_space<vmem>>, vector<1x10x4xf32>
    %130 = vector.shape_cast %129 : vector<1x10x4xf32> to vector<10x4xf32>
    %131 = vector.shape_cast %128 : vector<10x4xf32> to vector<1x10x4xf32>
    tpu.vector_store %arg20[%c0_101, %c0_102, %c0_103], %131 {strides = array<i32>} : memref<1x10x4xf32, #tpu.memory_space<vmem>>, vector<1x10x4xf32>,
    return
  }
  func.func @transform_0(%arg0: i32) -> (i32, i32, i32) {
    %c0_i32 = arith.constant 0 : i32
    %c0_i32_0 = arith.constant 0 : i32
    %c0_i32_1 = arith.constant 0 : i32
    return %arg0, %c0_i32, %c0_i32_0 : i32, i32, i32
  }
  func.func @transform_1(%arg0: i32) -> (i32, i32, i32) {
    %c0_i32 = arith.constant 0 : i32
    %c0_i32_0 = arith.constant 0 : i32
    %c0_i32_1 = arith.constant 0 : i32
    %c0_i32_2 = arith.constant 0 : i32
    return %c0_i32, %c0_i32_0, %c0_i32_1 : i32, i32, i32
  }
  func.func @transform_2(%arg0: i32) -> (i32, i32) {
    %c0_i32 = arith.constant 0 : i32
    %c0_i32_0 = arith.constant 0 : i32
    %c0_i32_1 = arith.constant 0 : i32
    return %c0_i32, %c0_i32_0 : i32, i32
  }
  func.func @transform_3(%arg0: i32) -> (i32, i32) {
    %c0_i32 = arith.constant 0 : i32
    %c0_i32_0 = arith.constant 0 : i32
    %c0_i32_1 = arith.constant 0 : i32
    return %c0_i32, %c0_i32_0 : i32, i32
  }
  func.func @transform_4(%arg0: i32) -> (i32, i32) {
    %c0_i32 = arith.constant 0 : i32
    %c0_i32_0 = arith.constant 0 : i32
    %c0_i32_1 = arith.constant 0 : i32
    return %c0_i32, %c0_i32_0 : i32, i32
  }
  func.func @transform_5(%arg0: i32) -> (i32, i32) {
    %c0_i32 = arith.constant 0 : i32
    %c0_i32_0 = arith.constant 0 : i32
    %c0_i32_1 = arith.constant 0 : i32
    return %c0_i32, %c0_i32_0 : i32, i32
  }
  func.func @transform_6(%arg0: i32) -> (i32, i32) {
    %c0_i32 = arith.constant 0 : i32
    %c0_i32_0 = arith.constant 0 : i32
    %c0_i32_1 = arith.constant 0 : i32
    return %c0_i32, %c0_i32_0 : i32, i32
  }
  func.func @transform_7(%arg0: i32) -> (i32, i32, i32) {
    %c0_i32 = arith.constant 0 : i32
    %c0_i32_0 = arith.constant 0 : i32
    %c0_i32_1 = arith.constant 0 : i32
    %c0_i32_2 = arith.constant 0 : i32
    return %c0_i32, %c0_i32_0, %c0_i32_1 : i32, i32, i32
  }
  func.func @transform_8(%arg0: i32) -> (i32, i32) {
    %c0_i32 = arith.constant 0 : i32
    %c0_i32_0 = arith.constant 0 : i32
    %c0_i32_1 = arith.constant 0 : i32
    return %c0_i32, %c0_i32_0 : i32, i32
  }
  func.func @transform_9(%arg0: i32) -> (i32, i32) {
    %c0_i32 = arith.constant 0 : i32
    %c0_i32_0 = arith.constant 0 : i32
    %c0_i32_1 = arith.constant 0 : i32
    return %c0_i32, %c0_i32_0 : i32, i32
  }
  func.func @transform_10(%arg0: i32) -> (i32, i32) {
    %c0_i32 = arith.constant 0 : i32
    %c0_i32_0 = arith.constant 0 : i32
    %c0_i32_1 = arith.constant 0 : i32
    return %c0_i32, %c0_i32_0 : i32, i32
  }
  func.func @transform_11(%arg0: i32) -> (i32, i32) {
    %c0_i32 = arith.constant 0 : i32
    %c0_i32_0 = arith.constant 0 : i32
    %c0_i32_1 = arith.constant 0 : i32
    return %c0_i32, %c0_i32_0 : i32, i32
  }
  func.func @transform_12(%arg0: i32) -> (i32, i32) {
    %c0_i32 = arith.constant 0 : i32
    %c0_i32_0 = arith.constant 0 : i32
    %c0_i32_1 = arith.constant 0 : i32
    return %c0_i32, %c0_i32_0 : i32, i32
  }
  func.func @transform_13(%arg0: i32) -> (i32, i32, i32) {
    %c0_i32 = arith.constant 0 : i32
    %c0_i32_0 = arith.constant 0 : i32
    %c0_i32_1 = arith.constant 0 : i32
    %c0_i32_2 = arith.constant 0 : i32
    return %c0_i32, %c0_i32_0, %c0_i32_1 : i32, i32, i32
  }
  func.func @transform_14(%arg0: i32) -> (i32, i32) {
    %c0_i32 = arith.constant 0 : i32
    %c0_i32_0 = arith.constant 0 : i32
    %c0_i32_1 = arith.constant 0 : i32
    return %c0_i32, %c0_i32_0 : i32, i32
  }
  func.func @transform_15(%arg0: i32) -> (i32, i32) {
    %c0_i32 = arith.constant 0 : i32
    %c0_i32_0 = arith.constant 0 : i32
    %c0_i32_1 = arith.constant 0 : i32
    return %c0_i32, %c0_i32_0 : i32, i32
  }
  func.func @transform_16(%arg0: i32) -> (i32, i32) {
    %c0_i32 = arith.constant 0 : i32
    %c0_i32_0 = arith.constant 0 : i32
    %c0_i32_1 = arith.constant 0 : i32
    return %c0_i32, %c0_i32_0 : i32, i32
  }
  func.func @transform_17(%arg0: i32) -> (i32, i32) {
    %c0_i32 = arith.constant 0 : i32
    %c0_i32_0 = arith.constant 0 : i32
    %c0_i32_1 = arith.constant 0 : i32
    return %c0_i32, %c0_i32_0 : i32, i32
  }
  func.func @transform_18(%arg0: i32) -> (i32, i32) {
    %c0_i32 = arith.constant 0 : i32
    %c0_i32_0 = arith.constant 0 : i32
    %c0_i32_1 = arith.constant 0 : i32
    return %c0_i32, %c0_i32_0 : i32, i32
  }
  func.func @transform_19(%arg0: i32) -> (i32, i32, i32) {
    %c0_i32 = arith.constant 0 : i32
    %c0_i32_0 = arith.constant 0 : i32
    %c0_i32_1 = arith.constant 0 : i32
    return %arg0, %c0_i32, %c0_i32_0 : i32, i32, i32
  }
}

</mosaic_0001>

<bundles_post_ra>
// kernel: lenet_forward.1
= control target key start
LH: loop header
LB: loop body
LE: loop exit
PB: predicated region body
PF: predicated region fallthrough
CT: control target
= control target key end

     0   :  { %v8023_v1 = vmov 0.0   ;;  %s8024_s22 = smov 127   ;;  %vm8025_vm0 = vmmov 0   ;;  %s8026_s28 = smov 126   ;;  %vm277_vm1 = vcmask 785408   ;;  %vm264_vm2 = vcmask 1039360   ;;  %s10131_s0 = inlined_call_operand.vmem [shape: bf16[1,96,132], index: 0, kind: input, shape index: {}]   ;;  %s10132_s1 = inlined_call_operand.vmem [shape: bf16[5,168,96], index: 1, kind: input, shape index: {}]   ;;  %s10133_s2 = inlined_call_operand.vmem [shape: f32[168,1], index: 2, kind: input, shape index: {}]   ;;  %s10134_s3 = inlined_call_operand.vmem [shape: bf16[128,60], index: 3, kind: input, shape index: {}]   ;;  %s10135_s4 = inlined_call_operand.vmem [shape: bf16[128,60], index: 4, kind: input, shape index: {}]   ;;  %s10136_s5 = inlined_call_operand.vmem [shape: bf16[84,168], index: 5, kind: input, shape index: {}]   ;;  %s10137_s6 = inlined_call_operand.vmem [shape: bf16[84,168], index: 6, kind: input, shape index: {}]   ;;  %s10138_s7 = inlined_call_operand.vmem [shape: bf16[5,160,84], index: 7, kind: input, shape index: {}]   ;;  %s10139_s8 = inlined_call_operand.vmem [shape: f32[160,1], index: 8, kind: input, shape index: {}]   ;;  %s10140_s9 = inlined_call_operand.vmem [shape: bf16[56,20], index: 9, kind: input, shape index: {}]   ;;  %s10141_s10 = inlined_call_operand.vmem [shape: bf16[56,20], index: 10, kind: input, shape index: {}]   ;;  %s10142_s11 = inlined_call_operand.vmem [shape: bf16[80,160], index: 11, kind: input, shape index: {}]   ;;  %s10143_s12 = inlined_call_operand.vmem [shape: bf16[80,160], index: 12, kind: input, shape index: {}]   ;;  %s10144_s13 = inlined_call_operand.vmem [shape: bf16[5,120,80], index: 13, kind: input, shape index: {}]   ;;  %s10145_s14 = inlined_call_operand.vmem [shape: f32[120,1], index: 14, kind: input, shape index: {}]   ;;  %s10146_s16 = inlined_call_operand.vmem [shape: f32[84,1], index: 16, kind: input, shape index: {}]   ;;  %s10147_s18 = inlined_call_operand.vmem [shape: f32[10,1], index: 18, kind: input, shape index: {}]   ;;  %s10148_s15 = inlined_call_operand.vmem [shape: bf16[84,120], index: 15, kind: input, shape index: {}]   ;;  %s10149_s17 = inlined_call_operand.vmem [shape: bf16[10,84], index: 17, kind: input, shape index: {}]   ;;  %s10150_s19 = inlined_call_operand.vmem [shape: f32[1,10,4], index: 19, kind: output, shape index: {}]  }
   0x1   :  { %10157 = sst [smem:[#allocation2_spill]] %s10131_s0  ;;  %6815 = vmatprep.subr.bf16.mxu0 %v8023_v1  ;;  %7605 = vmatprep.subr.bf16.mxu1 %v8023_v1  ;;  %s10155_s29 = smov 124   ;;  %vm1028_vm3 = vcmask 1022976   ;;  %vm742_vm4 = vcmask 1031168   ;;  %vm1314_vm5 = vcmask 1014784   ;;  %vm2132_vm6 = vcmask 326656  }
   0x2   :  { %10158 = sst [smem:[#allocation3_spill]] %s10132_s1  ;;  %s10161_s20 = sld [smem:[#allocation2_spill]]  ;;  %6827 = vmatprep.mubr.msk.bf16.mxu0 %vm8025_vm0, %v8023_v1  ;;  %6907 = vmatprep.mubr.msk.bf16.mxu1 %vm8025_vm0, %v8023_v1  ;;  %vm2151_vm7 = vcmask 1043456   ;;  %vm2535_vm8 = vcmask 687104   ;;  %vm2566_vm9 = vcmask 1041408   ;;  %vm3846_vm10 = vcmask 457728  }
   0x3   :  { %10159 = sst [smem:[#allocation4_spill]] %s10133_s2  ;;  %s10162_s21 = sld [smem:[#allocation3_spill]]  ;;  %vm4205_vm11 = vcmask 261120   ;;  %vm4531_vm12 = vcmask 654336   ;;  %vm5655_vm13 = vcmask 982016   ;;  %vm5840_vm14 = vcmask 31744  }
   0x4   :  { %10160 = sst [smem:[#allocation5_spill]] %s10134_s3  ;;  %s10163_s1 = sld [smem:[#allocation4_spill]]  ;;  %vm5842_vm15 = vcmask 25600  }
   0x5   :  { %s8030_s30 = smov 120  }
   0x8   :  { %v8136_v0 = vld [vmem:[%s10161_s20 + $0x10] ss:$8 sps:$4 sm:$0xff]   ;;  %v8143_v2 = vld [vmem:[%s10161_s20] ss:$8 sps:$4 sm:$0xff]   ;;  %v7769_v3 = vld [vmem:[%s10161_s20 + $0x14] ss:$8 sps:$4 sm:$0xff]  }
   0x9   :  { %244 = vrot.lane.b32.xlu1 %v8136_v0, %s8024_s22  ;;  %240 = vrot.lane.b32.xlu0 %v8143_v2, %s8024_s22  ;;  %v7770_v4 = vld [vmem:[%s10161_s20 + $0x4] ss:$8 sps:$4 sm:$0xff]   ;;  %v8165_v6 = vld [vmem:[%s10161_s20 + $0x20] ss:$8 sps:$4 sm:$0xff]  }
   0xa   :  { %7611 = vmatpush3.bf16.msra.mxu1 %v8143_v2  ;;  %v7773_v5 = vld [vmem:[%s10161_s20 + $0x24] ss:$8 sps:$4 sm:$0xff]   ;;  %v7776_v7 = vld [vmem:[%s10161_s20 + $0x34] ss:$8 sps:$4 sm:$0xff]   ;;  %v8178_v8 = vld [vmem:[%s10161_s20 + $0x30] ss:$8 sps:$4 sm:$0xff]  }
   0xb   :  { %7606 = vmatprep.subr.bf16.mxu1 %v8023_v1  ;;  %v7779_v9 = vld [vmem:[%s10161_s20 + $0x44] ss:$8 sps:$4 sm:$0xff]   ;;  %v8191_v10 = vld [vmem:[%s10161_s20 + $0x40] ss:$8 sps:$4 sm:$0xff]   ;;  %v8197_v11 = vld [vmem:[%s10161_s20 + $0x54] ss:$8 sps:$4 sm:$0xff]  }
   0xc   :  { %v8210_v12 = vld [vmem:[%s10161_s20 + $0x50] ss:$8 sps:$4 sm:$0xff]   ;;  %s8027_s20 = smov 125   ;;  %v7794_v15 = vld [vmem:[%s10162_s21 + $0x40] sm:$0xff]   ;;  %v7796_v16 = vld [vmem:[%s10162_s21 + $0x48] sm:$0xff]  }
   0xd   :  { %246 = vrot.lane.b32.xlu1 %v7769_v3, %s8024_s22  ;;  %242 = vrot.lane.b32.xlu0 %v7770_v4, %s8024_s22  ;;  %v7790_v13 = vld [vmem:[%s10162_s21 + $0x30] sm:$0xff]   ;;  %v7792_v14 = vld [vmem:[%s10162_s21 + $0x38] sm:$0xff]  }
   0xe   :  { %7612 = vmatpush3.bf16.msra.mxu1 %v8136_v0  ;;  %v7798_v17 = vld [vmem:[%s10162_s21 + $0x50] ss:$0 sps:$4 sm:$0xff]   ;;  %v7783_v38 = vld [vmem:[%s10162_s21 + $0x54] sm:$0xff]   ;;  %v7784_v43 = vld [vmem:[%s10162_s21 + $0x5c] sm:$0xff]  }
   0xf   :  { %7607 = vmatprep.subr.bf16.mxu1 %v8023_v1  ;;  %v7785_v48 = vld [vmem:[%s10162_s21 + $0x64] sm:$0xff]   ;;  %v7786_v53 = vld [vmem:[%s10162_s21 + $0x6c] sm:$0xff]   ;;  %v7787_v59 = vld [vmem:[%s10162_s21 + $0x74] sm:$0xff]  }
  0x11   :  { %250 = vrot.lane.b32.xlu1 %v7773_v5, %s8024_s22  ;;  %248 = vrot.lane.b32.xlu0 %v8165_v6, %s8024_s22 }
  0x12   :  { %7613 = vmatpush3.bf16.msra.mxu1 %v8165_v6 }
  0x13   :  { %7608 = vmatprep.subr.bf16.mxu1 %v8023_v1 }
  0x15   :  { %254 = vrot.lane.b32.xlu1 %v7776_v7, %s8024_s22  ;;  %252 = vrot.lane.b32.xlu0 %v8178_v8, %s8024_s22 }
  0x16   :  { %7614 = vmatpush3.bf16.msra.mxu1 %v8178_v8 }
  0x17   :  { %7609 = vmatprep.subr.bf16.mxu1 %v8023_v1 }
  0x19   :  { %258 = vrot.lane.b32.xlu1 %v7779_v9, %s8024_s22  ;;  %256 = vrot.lane.b32.xlu0 %v8191_v10, %s8024_s22 }
  0x1a   :  { %7615 = vmatpush3.bf16.msra.mxu1 %v8191_v10 }
  0x1b   :  { %7610 = vmatprep.subr.bf16.mxu1 %v8023_v1 }
  0x1d   :  { %262 = vrot.lane.b32.xlu1 %v8197_v11, %s8024_s22  ;;  %260 = vrot.lane.b32.xlu0 %v8210_v12, %s8024_s22 }
  0x1e   :  { %7616 = vmatpush3.bf16.msra.mxu1 %v8210_v12 }
  0x1f   :  { %6983 = vmatprep.subr.bf16.mxu1 %v8023_v1 }
  0x21   :  { %720 = vrot.lane.b32.xlu1 %v7770_v4, %s8026_s28  ;;  %718 = vrot.lane.b32.xlu0 %v8143_v2, %s8026_s28 }
  0x22   :  { %6908 = vmatmul.mubr.msk.bf16.vlgmr.msra.gmra.mrb[0].mxu1 %vm277_vm1, %v7790_v13 }
  0x23   :  { %6911 = vmatprep.mubr.msk.bf16.mxu1 %vm8025_vm0, %v8023_v1 }
  0x25   :  { %724 = vrot.lane.b32.xlu1 %v7769_v3, %s8026_s28  ;;  %722 = vrot.lane.b32.xlu0 %v8136_v0, %s8026_s28 }
  0x29   :  { %728 = vrot.lane.b32.xlu1 %v7773_v5, %s8026_s28  ;;  %726 = vrot.lane.b32.xlu0 %v8165_v6, %s8026_s28 }
  0x2a   :  { %6912 = vmatmul.mubr.msk.bf16.gmra.mrb[4].mxu1 %vm277_vm1, %v7792_v14  ;;  %v7791_v14 = vld [vmem:[%s10162_s21 + $0x8c] sm:$0xff]  }
  0x2b   :  { %6915 = vmatprep.mubr.msk.bf16.mxu1 %vm8025_vm0, %v8023_v1 }
  0x2d   :  { %732 = vrot.lane.b32.xlu1 %v7776_v7, %s8026_s28  ;;  %730 = vrot.lane.b32.xlu0 %v8178_v8, %s8026_s28 }
  0x31   :  { %736 = vrot.lane.b32.xlu1 %v7779_v9, %s8026_s28  ;;  %734 = vrot.lane.b32.xlu0 %v8191_v10, %s8026_s28 }
  0x32   :  { %6916 = vmatmul.mubr.msk.bf16.gmra.mrb[8].mxu1 %vm277_vm1, %v7794_v15 }
  0x33   :  { %6919 = vmatprep.mubr.msk.bf16.mxu1 %vm8025_vm0, %v8023_v1 }
  0x35   :  { %740 = vrot.lane.b32.xlu1 %v8197_v11, %s8026_s28  ;;  %738 = vrot.lane.b32.xlu0 %v8210_v12, %s8026_s28 }
  0x39   :  { %1006 = vrot.lane.b32.xlu1 %v7770_v4, %s8027_s20  ;;  %1004 = vrot.lane.b32.xlu0 %v8143_v2, %s8027_s20 }
  0x3a   :  { %6920 = vmatmul.mubr.msk.bf16.gmra.mrb[12].mxu1 %vm277_vm1, %v7796_v16 }
  0x3b   :  { %6923 = vmatprep.mubr.msk.bf16.mxu1 %vm8025_vm0, %v8023_v1 }
  0x3d   :  { %1292 = vrot.lane.b32.xlu1 %v7770_v4, %s10155_s29  ;;  %1290 = vrot.lane.b32.xlu0 %v8143_v2, %s10155_s29 }
  0x41   :  { %1010 = vrot.lane.b32.xlu1 %v7769_v3, %s8027_s20  ;;  %1008 = vrot.lane.b32.xlu0 %v8136_v0, %s8027_s20 }
  0x42   :  { %6924 = vmatmul.mubr.msk.bf16.gmra.mrb[16].mxu1 %vm277_vm1, %v7798_v17 }
  0x43   :  { %6995 = vmatprep.mubr.msk.bf16.mxu1 %vm8025_vm0, %v8023_v1 }
  0x45   :  { %1296 = vrot.lane.b32.xlu1 %v7769_v3, %s10155_s29  ;;  %1294 = vrot.lane.b32.xlu0 %v8136_v0, %s10155_s29 }
  0x49   :  { %1014 = vrot.lane.b32.xlu1 %v7773_v5, %s8027_s20  ;;  %1012 = vrot.lane.b32.xlu0 %v8165_v6, %s8027_s20 }
  0x4d   :  { %1300 = vrot.lane.b32.xlu1 %v7773_v5, %s10155_s29  ;;  %1298 = vrot.lane.b32.xlu0 %v8165_v6, %s10155_s29 }
  0x51   :  { %1018 = vrot.lane.b32.xlu1 %v7776_v7, %s8027_s20  ;;  %1016 = vrot.lane.b32.xlu0 %v8178_v8, %s8027_s20 }
  0x55   :  { %1304 = vrot.lane.b32.xlu1 %v7776_v7, %s10155_s29  ;;  %1302 = vrot.lane.b32.xlu0 %v8178_v8, %s10155_s29 }
  0x59   :  { %1022 = vrot.lane.b32.xlu1 %v7779_v9, %s8027_s20  ;;  %1020 = vrot.lane.b32.xlu0 %v8191_v10, %s8027_s20 }
  0x5d   :  { %1308 = vrot.lane.b32.xlu1 %v7779_v9, %s10155_s29  ;;  %1306 = vrot.lane.b32.xlu0 %v8191_v10, %s10155_s29 }
  0x61   :  { %1026 = vrot.lane.b32.xlu1 %v8197_v11, %s8027_s20  ;;  %1024 = vrot.lane.b32.xlu0 %v8210_v12, %s8027_s20 }
  0x65   :  { %1312 = vrot.lane.b32.xlu1 %v8197_v11, %s10155_s29  ;;  %1310 = vrot.lane.b32.xlu0 %v8210_v12, %s10155_s29  ;;  %s8031_s29 = smov 116  }
  0x7b   :  { %v245_v18 = vpop.permute.xlu1 %244  ;;  %v241_v19 = vpop.permute.xlu0 %240 }
  0x7f   :  { %v247_v20 = vpop.permute.xlu1 %246  ;;  %v243_v21 = vpop.permute.xlu0 %242 }
  0x80   :  { %v265_v22 = vsel %vm264_vm2, %v241_v19, %v243_v21  ;;  %v266_v25 = vsel %vm264_vm2, %v245_v18, %v247_v20  ;;  %v7793_v20 = vld [vmem:[%s10162_s21 + $0x94] sm:$0xff]  }
  0x81   :  { %6816 = vmatpush3.bf16.msra.mxu0 %v265_v22  ;;  %v7806_v22 = vld [vmem:[%s10162_s21 + $0xfc] sm:$0xff]  }
  0x82   :  { %6817 = vmatprep.subr.bf16.mxu0 %v8023_v1 }
  0x83   :  { %v251_v23 = vpop.permute.xlu1 %250  ;;  %v249_v24 = vpop.permute.xlu0 %248 }
  0x84   :  { %v267_v26 = vsel %vm264_vm2, %v249_v24, %v251_v23  ;;  %v7795_v23 = vld [vmem:[%s10162_s21 + $0x9c] sm:$0xff]   ;;  %v7808_v24 = vld [vmem:[%s10162_s21 + $0x104] sm:$0xff]  }
  0x85   :  { %6818 = vmatpush3.bf16.msra.mxu0 %v266_v25  ;;  %v7797_v25 = vld [vmem:[%s10162_s21 + $0xa4] ss:$0 sps:$4 sm:$0xff]  }
  0x86   :  { %6819 = vmatprep.subr.bf16.mxu0 %v8023_v1 }
  0x87   :  { %v255_v27 = vpop.permute.xlu1 %254  ;;  %v253_v28 = vpop.permute.xlu0 %252 }
  0x88   :  { %v268_v29 = vsel %vm264_vm2, %v253_v28, %v255_v27  ;;  %v7799_v27 = vld [vmem:[%s10162_s21] sm:$0xff]   ;;  %v7812_v28 = vld [vmem:[%s10162_s21 + $0x114] sm:$0xff]  }
  0x89   :  { %6820 = vmatpush3.bf16.msra.mxu0 %v267_v26  ;;  %v7810_v26 = vld [vmem:[%s10162_s21 + $0x10c] sm:$0xff]  }
  0x8a   :  { %6821 = vmatprep.subr.bf16.mxu0 %v8023_v1 }
  0x8b   :  { %v259_v30 = vpop.permute.xlu1 %258  ;;  %v257_v31 = vpop.permute.xlu0 %256 }
  0x8c   :  { %v269_v32 = vsel %vm264_vm2, %v257_v31, %v259_v30  ;;  %v7800_v31 = vld [vmem:[%s10162_s21 + $0x8] sm:$0xff]  }
  0x8d   :  { %6822 = vmatpush3.bf16.msra.mxu0 %v268_v29 }
  0x8e   :  { %6823 = vmatprep.subr.bf16.mxu0 %v8023_v1 }
  0x8f   :  { %v263_v33 = vpop.permute.xlu1 %262  ;;  %v261_v34 = vpop.permute.xlu0 %260 }
  0x90   :  { %v270_v35 = vsel %vm264_vm2, %v261_v34, %v263_v33 }
  0x91   :  { %6824 = vmatpush3.bf16.msra.mxu0 %v269_v32  ;;  %v7814_v32 = vld [vmem:[%s10162_s21 + $0x11c] sm:$0xff]  }
  0x92   :  { %6825 = vmatprep.subr.bf16.mxu0 %v8023_v1 }
  0x93   :  { %v8318_v36 = vpop.permute.xlu1 %720  ;;  %v8320_v37 = vpop.permute.xlu0 %718 }
  0x94   :  { %v743_v29 = vsel %vm742_vm4, %v8320_v37, %v8318_v36  ;;  %v7816_v36 = vld [vmem:[%s10162_s21 + $0x124] sm:$0xff]  }
  0x95   :  { %6826 = vmatpush3.bf16.msra.mxu0 %v270_v35  ;;  %v7801_v35 = vld [vmem:[%s10162_s21 + $0x10] sm:$0xff]  }
  0x96   :  { %6871 = vmatprep.subr.bf16.mxu0 %v8023_v1 }
  0x97   :  { %v8326_v39 = vpop.permute.xlu1 %724  ;;  %v8328_v40 = vpop.permute.xlu0 %722 }
  0x98   :  { %6828 = vmatmul.mubr.msk.bf16.vlgmr.msra.gmra.mrb[0].mxu0 %vm277_vm1, %v7783_v38  ;;  %v744_v30 = vsel %vm742_vm4, %v8328_v40, %v8326_v39  ;;  %v7802_v39 = vld [vmem:[%s10162_s21 + $0x18] sm:$0xff]   ;;  %v7818_v40 = vld [vmem:[%s10162_s21 + $0x12c] sm:$0xff]  }
  0x99   :  { %6831 = vmatprep.mubr.msk.bf16.mxu0 %vm8025_vm0, %v8023_v1  ;;  %6872 = vmatpush3.bf16.msra.mxu0 %v8143_v2  ;;  %v7788_v2 = vld [vmem:[%s10162_s21 + $0x7c] sm:$0xff]  }
  0x9a   :  { %6873 = vmatprep.subr.bf16.mxu0 %v8023_v1 }
  0x9b   :  { %v8335_v41 = vpop.permute.xlu1 %728  ;;  %v8337_v42 = vpop.permute.xlu0 %726 }
  0x9c   :  { %v745_v33 = vsel %vm742_vm4, %v8337_v42, %v8335_v41  ;;  %v7803_v41 = vld [vmem:[%s10162_s21 + $0x20] sm:$0xff]   ;;  %v7820_v42 = vld [vmem:[%s10162_s21 + $0x134] sm:$0xff]  }
  0x9d   :  { %6874 = vmatpush3.bf16.msra.mxu0 %v8136_v0 }
  0x9e   :  { %6875 = vmatprep.subr.bf16.mxu0 %v8023_v1 }
  0x9f   :  { %v8344_v44 = vpop.permute.xlu1 %732  ;;  %v8346_v45 = vpop.permute.xlu0 %730 }
  0xa0   :  { %6832 = vmatmul.mubr.msk.bf16.gmra.mrb[4].mxu0 %vm277_vm1, %v7784_v43  ;;  %v746_v34 = vsel %vm742_vm4, %v8346_v45, %v8344_v44  ;;  %v7804_v43 = vld [vmem:[%s10162_s21 + $0x28] sm:$0xff]   ;;  %v7822_v44 = vld [vmem:[%s10162_s21 + $0x13c] sm:$0xff]  }
  0xa1   :  { %6835 = vmatprep.mubr.msk.bf16.mxu0 %vm8025_vm0, %v8023_v1  ;;  %6876 = vmatpush3.bf16.msra.mxu0 %v8165_v6 }
  0xa2   :  { %6877 = vmatprep.subr.bf16.mxu0 %v8023_v1 }
  0xa3   :  { %v8353_v46 = vpop.permute.xlu1 %736  ;;  %v8355_v47 = vpop.permute.xlu0 %734 }
  0xa4   :  { %v747_v37 = vsel %vm742_vm4, %v8355_v47, %v8353_v46  ;;  %v7805_v46 = vld [vmem:[%s10162_s21 + $0xa8] sm:$0xff]  }
  0xa5   :  { %6878 = vmatpush3.bf16.msra.mxu0 %v8178_v8  ;;  %v7789_v8 = vld [vmem:[%s10162_s21 + $0x84] sm:$0xff]  }
  0xa6   :  { %6879 = vmatprep.subr.bf16.mxu0 %v8023_v1  ;;  %v7824_v47 = vld [vmem:[%s10162_s21 + $0x144] sm:$0xff]  }
  0xa7   :  { %v8362_v49 = vpop.permute.xlu1 %740  ;;  %v8364_v50 = vpop.permute.xlu0 %738 }
  0xa8   :  { %6836 = vmatmul.mubr.msk.bf16.gmra.mrb[8].mxu0 %vm277_vm1, %v7785_v48  ;;  %v748_v38 = vsel %vm742_vm4, %v8364_v50, %v8362_v49 }
  0xa9   :  { %6839 = vmatprep.mubr.msk.bf16.mxu0 %vm8025_vm0, %v8023_v1  ;;  %6880 = vmatpush3.bf16.msra.mxu0 %v8191_v10 }
  0xaa   :  { %6881 = vmatprep.subr.bf16.mxu0 %v8023_v1 }
  0xab   :  { %v1007_v51 = vpop.permute.xlu1 %1006  ;;  %v1005_v52 = vpop.permute.xlu0 %1004 }
  0xac   :  { %v1029_v54 = vsel %vm1028_vm3, %v1005_v52, %v1007_v51 }
  0xad   :  { %6882 = vmatpush3.bf16.msra.mxu0 %v8210_v12  ;;  %6984 = vmatpush3.bf16.msra.mxu1 %v1029_v54  ;;  %v7807_v54 = vld [vmem:[%s10162_s21 + $0xb0] sm:$0xff]  }
  0xae   :  { %6927 = vmatprep.subr.bf16.mxu0 %v8023_v1  ;;  %6985 = vmatprep.subr.bf16.mxu1 %v8023_v1 }
  0xaf   :  { %v8376_v55 = vpop.permute.xlu1 %1292  ;;  %v8380_v56 = vpop.permute.xlu0 %1290 }
  0xb0   :  { %6840 = vmatmul.mubr.msk.bf16.gmra.mrb[12].mxu0 %vm277_vm1, %v7786_v53  ;;  %v1315_v50 = vsel %vm1314_vm5, %v8380_v56, %v8376_v55  ;;  %v7826_v55 = vld [vmem:[%s10162_s21 + $0x14c] ss:$0 sps:$4 sm:$0xff]  }
  0xb1   :  { %6843 = vmatprep.mubr.msk.bf16.mxu0 %vm8025_vm0, %v8023_v1 }
  0xb3   :  { %v1011_v57 = vpop.permute.xlu1 %1010  ;;  %v1009_v58 = vpop.permute.xlu0 %1008 }
  0xb4   :  { %v1030_v60 = vsel %vm1028_vm3, %v1009_v58, %v1011_v57 }
  0xb5   :  { %6986 = vmatpush3.bf16.msra.mxu1 %v1030_v60  ;;  %v8029_v60 = vmov 0  }
  0xb6   :  { %6987 = vmatprep.subr.bf16.mxu1 %v8023_v1  ;;  %7764 = vset.pattern.permute.xlu1 %v8029_v60 }
  0xb7   :  { %v8389_v61 = vpop.permute.xlu1 %1296  ;;  %v8392_v62 = vpop.permute.xlu0 %1294  ;;  %7763 = vset.pattern.permute.xlu0 %v8029_v60 }
  0xb8   :  { %6844 = vmatmul.mubr.msk.bf16.gmra.mrb[16].mxu0 %vm277_vm1, %v7787_v59  ;;  %v1316_v52 = vsel %vm1314_vm5, %v8392_v62, %v8389_v61  ;;  %v76_v61 = vld [vmem:[%s10163_s1 + $0x8] sm:$0xff] }
  0xb9   :  { %6847 = vmatprep.mubr.msk.bf16.mxu0 %vm8025_vm0, %v8023_v1  ;;  %1508 = vperm.xlu1 %7764, %v76_v61   ;;  %v7828_v61 = vld [vmem:[%s10162_s21 + $0x158] sm:$0xff]  }
  0xbb   :  { %v1015_v63 = vpop.permute.xlu1 %1014  ;;  %v1013_v0 = vpop.permute.xlu0 %1012 }
  0xbc   :  { %v1031_v3 = vsel %vm1028_vm3, %v1013_v0, %v1015_v63  ;;  %v77_v0 = vld [vmem:[%s10163_s1 + $0x10] sm:$0xff] }
  0xbd   :  { %6988 = vmatpush3.bf16.msra.mxu1 %v1031_v3  ;;  %v7809_v3 = vld [vmem:[%s10162_s21 + $0xb8] sm:$0xff]   ;;  %1513 = vperm.xlu1 %7764, %v77_v0  }
  0xbe   :  { %6989 = vmatprep.subr.bf16.mxu1 %v8023_v1 }
  0xbf   :  { %v8401_v4 = vpop.permute.xlu1 %1300  ;;  %v8404_v5 = vpop.permute.xlu0 %1298 }
  0xc0   :  { %6848 = vmatmul.mubr.msk.bf16.gmra.mrb[20].mxu0 %vm277_vm1, %v7788_v2  ;;  %v1317_v58 = vsel %vm1314_vm5, %v8404_v5, %v8401_v4  ;;  %v75_v2 = vld [vmem:[%s10163_s1] sm:$0xff] }
  0xc1   :  { %6851 = vmatprep.mubr.msk.bf16.mxu0 %vm8025_vm0, %v8023_v1  ;;  %1503 = vperm.xlu0 %7763, %v75_v2  }
  0xc3   :  { %v1019_v6 = vpop.permute.xlu1 %1018  ;;  %v1017_v7 = vpop.permute.xlu0 %1016 }
  0xc4   :  { %v1032_v9 = vsel %vm1028_vm3, %v1017_v7, %v1019_v6  ;;  %v78_v7 = vld [vmem:[%s10163_s1 + $0x18] sm:$0xff] }
  0xc5   :  { %6990 = vmatpush3.bf16.msra.mxu1 %v1032_v9  ;;  %1518 = vperm.xlu0 %7763, %v78_v7  }
  0xc6   :  { %6991 = vmatprep.subr.bf16.mxu1 %v8023_v1 }
  0xc7   :  { %v8413_v10 = vpop.permute.xlu1 %1304  ;;  %v8416_v11 = vpop.permute.xlu0 %1302 }
  0xc8   :  { %6852 = vmatmul.mubr.msk.bf16.gmra.mrb[24].mxu0 %vm277_vm1, %v7789_v8  ;;  %v1318_v62 = vsel %vm1314_vm5, %v8416_v11, %v8413_v10  ;;  %v79_v11 = vld [vmem:[%s10163_s1 + $0x20] sm:$0xff] }
  0xc9   :  { %6855 = vmatprep.mubr.msk.bf16.mxu0 %vm8025_vm0, %v8023_v1  ;;  %1523 = vperm.xlu1 %7764, %v79_v11  }
  0xcb   :  { %v1023_v12 = vpop.permute.xlu1 %1022  ;;  %v1021_v13 = vpop.permute.xlu0 %1020 }
  0xcc   :  { %v1033_v15 = vsel %vm1028_vm3, %v1021_v13, %v1023_v12 }
  0xcd   :  { %6992 = vmatpush3.bf16.msra.mxu1 %v1033_v15  ;;  %v80_v15 = vld [vmem:[%s10163_s1 + $0x28] sm:$0xff] }
  0xce   :  { %6993 = vmatprep.subr.bf16.mxu1 %v8023_v1  ;;  %1528 = vperm.xlu0 %7763, %v80_v15  }
  0xcf   :  { %v8425_v16 = vpop.permute.xlu1 %1308  ;;  %v8428_v17 = vpop.permute.xlu0 %1306 }
  0xd0   :  { %6856 = vmatmul.mubr.msk.bf16.gmra.mrb[28].mxu0 %vm277_vm1, %v7791_v14  ;;  %v1319_v6 = vsel %vm1314_vm5, %v8428_v17, %v8425_v16  ;;  %v81_v14 = vld [vmem:[%s10163_s1 + $0x30] sm:$0xff]  ;;  %v7811_v16 = vld [vmem:[%s10162_s21 + $0xc0] sm:$0xff]  }
  0xd1   :  { %6859 = vmatprep.mubr.msk.bf16.mxu0 %vm8025_vm0, %v8023_v1  ;;  %1533 = vperm.xlu1 %7764, %v81_v14  }
  0xd3   :  { %v1027_v18 = vpop.permute.xlu1 %1026  ;;  %v1025_v19 = vpop.permute.xlu0 %1024 }
  0xd4   :  { %v1034_v21 = vsel %vm1028_vm3, %v1025_v19, %v1027_v18  ;;  %v82_v19 = vld [vmem:[%s10163_s1 + $0x38] sm:$0xff] }
  0xd5   :  { %6994 = vmatpush3.bf16.msra.mxu1 %v1034_v21  ;;  %v83_v21 = vld [vmem:[%s10163_s1 + $0x40] sm:$0xff]  ;;  %1538 = vperm.xlu0 %7763, %v82_v19  }
  0xd6   :  { %7095 = vmatprep.subr.bf16.mxu1 %v8023_v1  ;;  %1543 = vperm.xlu1 %7764, %v83_v21  }
  0xd7   :  { %v1313_v9 = vpop.permute.xlu1 %1312  ;;  %v1311_v10 = vpop.permute.xlu0 %1310 }
  0xd8   :  { %6860 = vmatmul.mubr.msk.bf16.gmra.mrb[32].mxu0 %vm277_vm1, %v7793_v20  ;;  %6996 = vmatmul.mubr.msk.bf16.vlgmr.msra.gmra.mrb[20].mxu1 %vm277_vm1, %v7806_v22  ;;  %v1320_v12 = vsel %vm1314_vm5, %v1311_v10, %v1313_v9  ;;  %v7830_v10 = vld [vmem:[%s10162_s21 + $0x168] sm:$0xff]  }
  0xd9   :  { %6863 = vmatprep.mubr.msk.bf16.mxu0 %vm8025_vm0, %v8023_v1  ;;  %6999 = vmatprep.mubr.msk.bf16.mxu1 %vm8025_vm0, %v8023_v1 }
  0xe0   :  { %6864 = vmatmul.mubr.msk.bf16.gmra.mrb[36].mxu0 %vm277_vm1, %v7795_v23  ;;  %7000 = vmatmul.mubr.msk.bf16.gmra.mrb[24].mxu1 %vm277_vm1, %v7808_v24  ;;  %v85_v23 = vld [vmem:[%s10163_s1 + $0x50] sm:$0xff]  ;;  %v84_v24 = vld [vmem:[%s10163_s1 + $0x48] sm:$0xff] }
  0xe1   :  { %6867 = vmatprep.mubr.msk.bf16.mxu0 %vm8025_vm0, %v8023_v1  ;;  %7003 = vmatprep.mubr.msk.bf16.mxu1 %vm8025_vm0, %v8023_v1 }
  0xe2   :  { %1548 = vperm.xlu0 %7763, %v84_v24   ;;  %1553 = vperm.xlu1 %7764, %v85_v23   ;;  %v7832_v23 = vld [vmem:[%s10162_s21 + $0x178] sm:$0xff]  }
  0xe8   :  { %6868 = vmatmul.mubr.msk.bf16.gmra.mrb[40].mxu0 %vm277_vm1, %v7797_v25  ;;  %7004 = vmatmul.mubr.msk.bf16.gmra.mrb[28].mxu1 %vm277_vm1, %v7810_v26  ;;  %v7813_v25 = vld [vmem:[%s10162_s21 + $0xc8] sm:$0xff]  }
  0xe9   :  { %6883 = vmatprep.mubr.msk.bf16.mxu0 %vm8025_vm0, %v8023_v1  ;;  %7007 = vmatprep.mubr.msk.bf16.mxu1 %vm8025_vm0, %v8023_v1 }
  0xf0   :  { %6884 = vmatmul.mubr.msk.bf16.vlgmr.msra.gmra.mrb[44].mxu0 %vm277_vm1, %v7799_v27  ;;  %7008 = vmatmul.mubr.msk.bf16.gmra.mrb[32].mxu1 %vm277_vm1, %v7812_v28  ;;  %v86_v28 = vld [vmem:[%s10163_s1 + $0x58] sm:$0xff] }
  0xf1   :  { %6887 = vmatprep.mubr.msk.bf16.mxu0 %vm8025_vm0, %v8023_v1  ;;  %6928 = vmatpush3.bf16.msra.mxu0 %v743_v29 }
  0xf2   :  { %6929 = vmatprep.subr.bf16.mxu0 %v8023_v1  ;;  %7011 = vmatprep.mubr.msk.bf16.mxu1 %vm8025_vm0, %v8023_v1 }
  0xf3   :  { %1558 = vperm.xlu0 %7763, %v86_v28  }
  0xf5   :  { %6930 = vmatpush3.bf16.msra.mxu0 %v744_v30  ;;  %v8567_v45 = vpop.f32.mrb[0].mxu1  ;;  %v87_v30 = vld [vmem:[%s10163_s1 + $0x60] sm:$0xff] }
  0xf6   :  { %6931 = vmatprep.subr.bf16.mxu0 %v8023_v1  ;;  %v6909_v48 = vpop.f32.mrb[1].mxu1  ;;  %1563 = vperm.xlu1 %7764, %v87_v30   ;;  %v7833_v30 = vld [vmem:[%s10162_s21 + $0x180] sm:$0xff]  }
  0xf7   :  { %v8575_v49 = vpop.f32.mrb[2].mxu1 }
  0xf8   :  { %6888 = vmatmul.mubr.msk.bf16.gmra.mrb[48].mxu0 %vm277_vm1, %v7800_v31  ;;  %7012 = vmatmul.mubr.msk.bf16.gmra.mrb[36].mxu1 %vm277_vm1, %v7814_v32  ;;  %v6910_v51 = vpop.f32.mrb[3].mxu1  ;;  %v89_v31 = vld [vmem:[%s10163_s1 + $0x70] sm:$0xff]  ;;  %v88_v32 = vld [vmem:[%s10163_s1 + $0x68] sm:$0xff] }
  0xf9   :  { %6891 = vmatprep.mubr.msk.bf16.mxu0 %vm8025_vm0, %v8023_v1  ;;  %6932 = vmatpush3.bf16.msra.mxu0 %v745_v33  ;;  %v7815_v33 = vld [vmem:[%s10162_s21 + $0xd0] sm:$0xff]  }
  0xfa   :  { %6933 = vmatprep.subr.bf16.mxu0 %v8023_v1  ;;  %7015 = vmatprep.mubr.msk.bf16.mxu1 %vm8025_vm0, %v8023_v1 }
  0xfb   :  { %1568 = vperm.xlu0 %7763, %v88_v32   ;;  %1573 = vperm.xlu1 %7764, %v89_v31  }
  0xfd   :  { %6934 = vmatpush3.bf16.msra.mxu0 %v746_v34  ;;  %v8590_v53 = vpop.f32.mrb[4].mxu1  ;;  %v90_v34 = vld [vmem:[%s10163_s1 + $0x78] sm:$0xff] }
  0xfe   :  { %6935 = vmatprep.subr.bf16.mxu0 %v8023_v1  ;;  %v6913_v56 = vpop.f32.mrb[5].mxu1 }
  0xff   :  { %v8598_v57 = vpop.f32.mrb[6].mxu1  ;;  %1578 = vperm.xlu0 %7763, %v90_v34  }
 0x100   :  { %6892 = vmatmul.mubr.msk.bf16.gmra.mrb[52].mxu0 %vm277_vm1, %v7801_v35  ;;  %7016 = vmatmul.mubr.msk.bf16.gmra.mrb[40].mxu1 %vm277_vm1, %v7816_v36  ;;  %v6914_v59 = vpop.f32.mrb[7].mxu1  ;;  %v91_v35 = vld [vmem:[%s10163_s1 + $0x80] sm:$0xff]  ;;  %v93_v36 = vld [vmem:[%s10163_s1 + $0x90] sm:$0xff] }
 0x101   :  { %6895 = vmatprep.mubr.msk.bf16.mxu0 %vm8025_vm0, %v8023_v1  ;;  %6936 = vmatpush3.bf16.msra.mxu0 %v747_v37  ;;  %v92_v37 = vld [vmem:[%s10163_s1 + $0x88] sm:$0xff] }
 0x102   :  { %6937 = vmatprep.subr.bf16.mxu0 %v8023_v1  ;;  %7019 = vmatprep.mubr.msk.bf16.mxu1 %vm8025_vm0, %v8023_v1 }
 0x103   :  { %1583 = vperm.xlu1 %7764, %v91_v35   ;;  %1588 = vperm.xlu0 %7763, %v92_v37  }
 0x105   :  { %6938 = vmatpush3.bf16.msra.mxu0 %v748_v38  ;;  %v8617_v63 = vpop.f32.mrb[8].mxu1  ;;  %v7817_v38 = vld [vmem:[%s10162_s21 + $0xd8] sm:$0xff]  }
 0x106   :  { %7039 = vmatprep.subr.bf16.mxu0 %v8023_v1  ;;  %v6917_v4 = vpop.f32.mrb[9].mxu1 }
 0x107   :  { %v8630_v5 = vpop.f32.mrb[10].mxu1  ;;  %1593 = vperm.xlu1 %7764, %v93_v36   ;;  %v7829_v4 = vld [vmem:[%s10162_s21 + $0x160] sm:$0xff]   ;;  %v7834_v36 = vld [vmem:[%s10162_s21 + $0x188] sm:$0xff]  }
 0x108   :  { %6896 = vmatmul.mubr.msk.bf16.gmra.mrb[56].mxu0 %vm277_vm1, %v7802_v39  ;;  %7020 = vmatmul.mubr.msk.bf16.gmra.mrb[44].mxu1 %vm277_vm1, %v7818_v40  ;;  %v6918_v8 = vpop.f32.mrb[11].mxu1  ;;  %v94_v39 = vld [vmem:[%s10163_s1 + $0x98] sm:$0xff]  ;;  %v95_v40 = vld [vmem:[%s10163_s1 + $0xa0] sm:$0xff]  ;;  %s10164_s1 = sld [smem:[#allocation5_spill]] }
 0x109   :  { %6899 = vmatprep.mubr.msk.bf16.mxu0 %vm8025_vm0, %v8023_v1  ;;  %7023 = vmatprep.mubr.msk.bf16.mxu1 %vm8025_vm0, %v8023_v1 }
 0x10a   :  { %1598 = vperm.xlu0 %7763, %v94_v39  }
 0x10b   :  { %1603 = vperm.xlu1 %7764, %v95_v40  }
 0x10d   :  { %v8647_v13 = vpop.f32.mrb[12].mxu1 }
 0x10e   :  { %v6921_v17 = vpop.f32.mrb[13].mxu1 }
 0x10f   :  { %v8658_v18 = vpop.f32.mrb[14].mxu1 }
 0x110   :  { %6900 = vmatmul.mubr.msk.bf16.gmra.mrb[60].mxu0 %vm277_vm1, %v7803_v41  ;;  %7024 = vmatmul.mubr.msk.bf16.gmra.mrb[48].mxu1 %vm277_vm1, %v7820_v42  ;;  %v6922_v20 = vpop.f32.mrb[15].mxu1  ;;  %v7819_v41 = vld [vmem:[%s10162_s21 + $0xe0] sm:$0xff]   ;;  %v7821_v42 = vld [vmem:[%s10162_s21 + $0xe8] sm:$0xff]  }
 0x111   :  { %6903 = vmatprep.mubr.msk.bf16.mxu0 %vm8025_vm0, %v8023_v1  ;;  %7027 = vmatprep.mubr.msk.bf16.mxu1 %vm8025_vm0, %v8023_v1 }
 0x115   :  { %v8670_v22 = vpop.f32.mrb[16].mxu1 }
 0x116   :  { %v6925_v26 = vpop.f32.mrb[17].mxu1 }
 0x117   :  { %v640_v27 = vpop.f32.mrb[18].mxu1 }
 0x118   :  { %6904 = vmatmul.mubr.msk.bf16.gmra.mrb[64].mxu0 %vm277_vm1, %v7804_v43  ;;  %7028 = vmatmul.mubr.msk.bf16.gmra.mrb[52].mxu1 %vm277_vm1, %v7822_v44  ;;  %v6926_v29 = vpop.f32.mrb[19].mxu1  ;;  %v7823_v43 = vld [vmem:[%s10162_s21 + $0xf0] sm:$0xff]  }
 0x119   :  { %6939 = vmatprep.mubr.msk.bf16.mxu0 %vm8025_vm0, %v8023_v1  ;;  %7031 = vmatprep.mubr.msk.bf16.mxu1 %vm8025_vm0, %v8023_v1 }
 0x120   :  { %6940 = vmatmul.mubr.msk.bf16.vlgmr.msra.gmra.mrb[68].mxu0 %vm277_vm1, %v7805_v46  ;;  %7032 = vmatmul.mubr.msk.bf16.gmra.mrb[56].mxu1 %vm277_vm1, %v7824_v47  ;;  %v7825_v47 = vld [vmem:[%s10162_s21 + $0xf8] ss:$0 sps:$4 sm:$0xff]  }
 0x121   :  { %6943 = vmatprep.mubr.msk.bf16.mxu0 %vm8025_vm0, %v8023_v1  ;;  %7040 = vmatpush3.bf16.msra.mxu0 %v1315_v50 }
 0x122   :  { %7041 = vmatprep.subr.bf16.mxu0 %v8023_v1  ;;  %7035 = vmatprep.mubr.msk.bf16.mxu1 %vm8025_vm0, %v8023_v1 }
 0x125   :  { %7042 = vmatpush3.bf16.msra.mxu0 %v1316_v52 }
 0x126   :  { %7043 = vmatprep.subr.bf16.mxu0 %v8023_v1 }
 0x128   :  { %6944 = vmatmul.mubr.msk.bf16.gmra.mrb[72].mxu0 %vm277_vm1, %v7807_v54  ;;  %7036 = vmatmul.mubr.msk.bf16.gmra.mrb[60].mxu1 %vm277_vm1, %v7826_v55  ;;  %v7827_v54 = vld [vmem:[%s10162_s21 + $0x150] sm:$0xff]  }
 0x129   :  { %6947 = vmatprep.mubr.msk.bf16.mxu0 %vm8025_vm0, %v8023_v1  ;;  %7044 = vmatpush3.bf16.msra.mxu0 %v1317_v58 }
 0x12a   :  { %7045 = vmatprep.subr.bf16.mxu0 %v8023_v1  ;;  %7111 = vmatprep.mubr.msk.bf16.mxu1 %vm8025_vm0, %v8023_v1 }
 0x12d   :  { %7046 = vmatpush3.bf16.msra.mxu0 %v1318_v62 }
 0x12e   :  { %7047 = vmatprep.subr.bf16.mxu0 %v8023_v1 }
 0x130   :  { %6948 = vmatmul.mubr.msk.bf16.gmra.mrb[76].mxu0 %vm277_vm1, %v7809_v3 }
 0x131   :  { %6951 = vmatprep.mubr.msk.bf16.mxu0 %vm8025_vm0, %v8023_v1  ;;  %7048 = vmatpush3.bf16.msra.mxu0 %v1319_v6 }
 0x132   :  { %7049 = vmatprep.subr.bf16.mxu0 %v8023_v1 }
 0x135   :  { %7050 = vmatpush3.bf16.msra.mxu0 %v1320_v12 }
 0x136   :  { %7155 = vmatprep.subr.bf16.mxu0 %v8023_v1 }
 0x138   :  { %6952 = vmatmul.mubr.msk.bf16.gmra.mrb[80].mxu0 %vm277_vm1, %v7811_v16  ;;  %v7831_v16 = vld [vmem:[%s10162_s21 + $0x170] sm:$0xff]  }
 0x139   :  { %6955 = vmatprep.mubr.msk.bf16.mxu0 %vm8025_vm0, %v8023_v1 }
 0x140   :  { %6956 = vmatmul.mubr.msk.bf16.gmra.mrb[84].mxu0 %vm277_vm1, %v7813_v25 }
 0x141   :  { %6959 = vmatprep.mubr.msk.bf16.mxu0 %vm8025_vm0, %v8023_v1 }
 0x148   :  { %6960 = vmatmul.mubr.msk.bf16.gmra.mrb[88].mxu0 %vm277_vm1, %v7815_v33 }
 0x149   :  { %6963 = vmatprep.mubr.msk.bf16.mxu0 %vm8025_vm0, %v8023_v1 }
 0x150   :  { %6964 = vmatmul.mubr.msk.bf16.gmra.mrb[92].mxu0 %vm277_vm1, %v7817_v38 }
 0x151   :  { %6967 = vmatprep.mubr.msk.bf16.mxu0 %vm8025_vm0, %v8023_v1 }
 0x158   :  { %6968 = vmatmul.mubr.msk.bf16.gmra.mrb[96].mxu0 %vm277_vm1, %v7819_v41 }
 0x159   :  { %6971 = vmatprep.mubr.msk.bf16.mxu0 %vm8025_vm0, %v8023_v1 }
 0x160   :  { %6972 = vmatmul.mubr.msk.bf16.gmra.mrb[100].mxu0 %vm277_vm1, %v7821_v42  ;;  %v7838_v42 = vld [vmem:[%s10164_s1] sm:$0xff]  }
 0x161   :  { %6975 = vmatprep.mubr.msk.bf16.mxu0 %vm8025_vm0, %v8023_v1  ;;  %7096 = vmatpush3.bf16.msra.mxu1 %v7838_v42  ;;  %v7849_v42 = vld [vmem:[%s10164_s1 + $0x28] sm:$0xff]  }
 0x162   :  { %7097 = vmatprep.subr.bf16.mxu1 %v8023_v1 }
 0x168   :  { %6976 = vmatmul.mubr.msk.bf16.gmra.mrb[104].mxu0 %vm277_vm1, %v7823_v43  ;;  %v7839_v43 = vld [vmem:[%s10135_s4] sm:$0xff]  }
 0x169   :  { %6979 = vmatprep.mubr.msk.bf16.mxu0 %vm8025_vm0, %v8023_v1 }
 0x16b   :  { %v8744_v44 = vpop.f32.mrb[0].mxu0 }
 0x16c   :  { %v6829_v46 = vpop.f32.mrb[1].mxu0 }
 0x16d   :  { %v8749_v48 = vpop.f32.mrb[2].mxu0 }
 0x16e   :  { %v6830_v50 = vpop.f32.mrb[3].mxu0 }
 0x170   :  { %6980 = vmatmul.mubr.msk.bf16.gmra.mrb[108].mxu0 %vm277_vm1, %v7825_v47 }
 0x171   :  { %7051 = vmatprep.mubr.msk.bf16.mxu0 %vm8025_vm0, %v8023_v1 }
 0x173   :  { %v8754_v51 = vpop.f32.mrb[4].mxu0 }
 0x174   :  { %v6833_v52 = vpop.f32.mrb[5].mxu0 }
 0x175   :  { %v8759_v55 = vpop.f32.mrb[6].mxu0 }
 0x176   :  { %v6834_v56 = vpop.f32.mrb[7].mxu0 }
 0x178   :  { %7052 = vmatmul.mubr.msk.bf16.vlgmr.msra.gmra.mrb[112].mxu0 %vm277_vm1, %v7827_v54 }
 0x179   :  { %7055 = vmatprep.mubr.msk.bf16.mxu0 %vm8025_vm0, %v8023_v1  ;;  %7156 = vmatpush3.bf16.msra.mxu0 %v7839_v43 }
 0x17a   :  { %7157 = vmatprep.subr.bf16.mxu0 %v8023_v1 }
 0x17b   :  { %v8764_v58 = vpop.f32.mrb[8].mxu0 }
 0x17c   :  { %v6837_v59 = vpop.f32.mrb[9].mxu0 }
 0x17d   :  { %v8769_v62 = vpop.f32.mrb[10].mxu0 }
 0x17e   :  { %v6838_v0 = vpop.f32.mrb[11].mxu0 }
 0x180   :  { %7056 = vmatmul.mubr.msk.bf16.gmra.mrb[116].mxu0 %vm277_vm1, %v7828_v61 }
 0x181   :  { %7059 = vmatprep.mubr.msk.bf16.mxu0 %vm8025_vm0, %v8023_v1 }
 0x183   :  { %v8774_v2 = vpop.f32.mrb[12].mxu0 }
 0x184   :  { %v6841_v3 = vpop.f32.mrb[13].mxu0 }
 0x185   :  { %v8779_v6 = vpop.f32.mrb[14].mxu0  ;;  %v7840_v3 = vld [vmem:[%s10164_s1 + $0x8] sm:$0xff]  }
 0x186   :  { %v6842_v7 = vpop.f32.mrb[15].mxu0  ;;  %7098 = vmatpush3.bf16.msra.mxu1 %v7840_v3 }
 0x187   :  { %7099 = vmatprep.subr.bf16.mxu1 %v8023_v1 }
 0x188   :  { %7060 = vmatmul.mubr.msk.bf16.gmra.mrb[120].mxu0 %vm277_vm1, %v7829_v4 }
 0x189   :  { %7063 = vmatprep.mubr.msk.bf16.mxu0 %vm8025_vm0, %v8023_v1 }
 0x18b   :  { %v8784_v8 = vpop.f32.mrb[16].mxu0 }
 0x18c   :  { %v6845_v9 = vpop.f32.mrb[17].mxu0 }
 0x18d   :  { %v8789_v11 = vpop.f32.mrb[18].mxu0 }
 0x18e   :  { %v6846_v12 = vpop.f32.mrb[19].mxu0 }
 0x190   :  { %7064 = vmatmul.mubr.msk.bf16.gmra.mrb[124].mxu0 %vm277_vm1, %v7830_v10 }
 0x191   :  { %7067 = vmatprep.mubr.msk.bf16.mxu0 %vm8025_vm0, %v8023_v1 }
 0x193   :  { %v8794_v14 = vpop.f32.mrb[20].mxu0 }
 0x194   :  { %v6849_v15 = vpop.f32.mrb[21].mxu0 }
 0x195   :  { %v8799_v17 = vpop.f32.mrb[22].mxu0 }
 0x196   :  { %v6850_v19 = vpop.f32.mrb[23].mxu0 }
 0x197   :  { %v7842_v19 = vld [vmem:[%s10135_s4 + $0x10] sm:$0xff]  }
 0x198   :  { %7068 = vmatmul.mubr.msk.bf16.gmra.mrb[128].mxu0 %vm277_vm1, %v7831_v16 }
 0x199   :  { %7071 = vmatprep.mubr.msk.bf16.mxu0 %vm8025_vm0, %v8023_v1 }
 0x19b   :  { %v393_v20 = vpop.f32.mrb[24].mxu0 }
 0x19c   :  { %v6853_v21 = vpop.f32.mrb[25].mxu0  ;;  %v8808_v24 = vadd.f32 %v8567_v45, %v393_v20  ;;  %v7843_v20 = vld [vmem:[%s10164_s1 + $0x10] sm:$0xff]  }
 0x19d   :  { %v396_v25 = vpop.f32.mrb[26].mxu0  ;;  %7100 = vmatpush3.bf16.msra.mxu1 %v7843_v20 }
 0x19e   :  { %v6854_v26 = vpop.f32.mrb[27].mxu0  ;;  %v8811_v27 = vadd.f32 %v8575_v49, %v396_v25  ;;  %7101 = vmatprep.subr.bf16.mxu1 %v8023_v1  ;;  %v7845_v25 = vld [vmem:[%s10164_s1 + $0x18] sm:$0xff]  }
 0x1a0   :  { %7072 = vmatmul.mubr.msk.bf16.gmra.mrb[132].mxu0 %vm277_vm1, %v7832_v23 }
 0x1a1   :  { %7075 = vmatprep.mubr.msk.bf16.mxu0 %vm8025_vm0, %v8023_v1  ;;  %7102 = vmatpush3.bf16.msra.mxu1 %v7845_v25 }
 0x1a2   :  { %7103 = vmatprep.subr.bf16.mxu1 %v8023_v1 }
 0x1a3   :  { %v401_v28 = vpop.f32.mrb[28].mxu0 }
 0x1a4   :  { %v6857_v29 = vpop.f32.mrb[29].mxu0  ;;  %v8820_v31 = vadd.f32 %v8590_v53, %v401_v28 }
 0x1a5   :  { %v404_v45 = vpop.f32.mrb[30].mxu0 }
 0x1a6   :  { %v6858_v32 = vpop.f32.mrb[31].mxu0  ;;  %v8823_v33 = vadd.f32 %v8598_v57, %v404_v45  ;;  %v7837_v45 = vld [vmem:[%s10162_s21 + $0x1a0] ss:$0 sps:$4 sm:$0xff]  }
 0x1a8   :  { %7076 = vmatmul.mubr.msk.bf16.gmra.mrb[136].mxu0 %vm277_vm1, %v7833_v30 }
 0x1a9   :  { %7079 = vmatprep.mubr.msk.bf16.mxu0 %vm8025_vm0, %v8023_v1 }
 0x1ab   :  { %v409_v49 = vpop.f32.mrb[32].mxu0  ;;  %v8828_v34 = vpop.f32.mrb[20].mxu1 }
 0x1ac   :  { %v6861_v35 = vpop.f32.mrb[33].mxu0  ;;  %v6997_v53 = vpop.f32.mrb[21].mxu1  ;;  %v8834_v37 = vadd.f32 %v8617_v63, %v409_v49  ;;  %v7835_v63 = vld [vmem:[%s10162_s21 + $0x190] sm:$0xff]  }
 0x1ad   :  { %v412_v38 = vpop.f32.mrb[34].mxu0  ;;  %v8836_v57 = vpop.f32.mrb[22].mxu1 }
 0x1ae   :  { %v6862_v39 = vpop.f32.mrb[35].mxu0  ;;  %v6998_v40 = vpop.f32.mrb[23].mxu1  ;;  %v8839_v41 = vadd.f32 %v8630_v5, %v412_v38 }
 0x1af   :  { %v7848_v40 = vld [vmem:[%s10135_s4 + $0x28] sm:$0xff]  }
 0x1b0   :  { %7080 = vmatmul.mubr.msk.bf16.gmra.mrb[140].mxu0 %vm277_vm1, %v7834_v36  ;;  %v7846_v36 = vld [vmem:[%s10135_s4 + $0x20] sm:$0xff]  }
 0x1b1   :  { %7083 = vmatprep.mubr.msk.bf16.mxu0 %vm8025_vm0, %v8023_v1 }
 0x1b3   :  { %v417_v5 = vpop.f32.mrb[36].mxu0  ;;  %v8854_v46 = vpop.f32.mrb[24].mxu1 }
 0x1b4   :  { %v8858_v47 = vadd.f32 %v8647_v13, %v417_v5  ;;  %v6865_v50 = vpop.f32.mrb[37].mxu0  ;;  %v7001_v52 = vpop.f32.mrb[25].mxu1  ;;  %v7841_v13 = vld [vmem:[%s10135_s4 + $0x8] sm:$0xff]  }
 0x1b5   :  { %v420_v54 = vpop.f32.mrb[38].mxu0  ;;  %v8860_v56 = vpop.f32.mrb[26].mxu1  ;;  %7158 = vmatpush3.bf16.msra.mxu0 %v7841_v13 }
 0x1b6   :  { %v8863_v59 = vadd.f32 %v8658_v18, %v420_v54  ;;  %v6866_v61 = vpop.f32.mrb[39].mxu0  ;;  %v7002_v0 = vpop.f32.mrb[27].mxu1  ;;  %v7836_v18 = vld [vmem:[%s10162_s21 + $0x198] sm:$0xff]   ;;  %7159 = vmatprep.subr.bf16.mxu0 %v8023_v1 }
 0x1b7   :  { %v7850_v61 = vld [vmem:[%s10135_s4 + $0x30] sm:$0xff]  }
 0x1b8   :  { %7084 = vmatmul.mubr.msk.bf16.gmra.mrb[144].mxu0 %vm277_vm1, %v7835_v63  ;;  %v7851_v0 = vld [vmem:[%s10164_s1 + $0x30] sm:$0xff]  }
 0x1b9   :  { %7087 = vmatprep.mubr.msk.bf16.mxu0 %vm8025_vm0, %v8023_v1  ;;  %7160 = vmatpush3.bf16.msra.mxu0 %v7842_v19 }
 0x1ba   :  { %7161 = vmatprep.subr.bf16.mxu0 %v8023_v1 }
 0x1bb   :  { %v425_v4 = vpop.f32.mrb[40].mxu0  ;;  %v8877_v7 = vpop.f32.mrb[28].mxu1 }
 0x1bc   :  { %v8882_v9 = vadd.f32 %v8670_v22, %v425_v4  ;;  %v6869_v10 = vpop.f32.mrb[41].mxu0  ;;  %v7005_v12 = vpop.f32.mrb[29].mxu1  ;;  %v7844_v22 = vld [vmem:[%s10135_s4 + $0x18] sm:$0xff]  }
 0x1bd   :  { %v428_v15 = vpop.f32.mrb[42].mxu0  ;;  %v8884_v16 = vpop.f32.mrb[30].mxu1  ;;  %7162 = vmatpush3.bf16.msra.mxu0 %v7844_v22  ;;  %v7853_v4 = vld [vmem:[%s10135_s4 + $0x38] sm:$0xff]  }
 0x1be   :  { %v6870_v21 = vpop.f32.mrb[43].mxu0  ;;  %v7006_v23 = vpop.f32.mrb[31].mxu1  ;;  %7163 = vmatprep.subr.bf16.mxu0 %v8023_v1 }
 0x1c0   :  { %7088 = vmatmul.mubr.msk.bf16.gmra.mrb[148].mxu0 %vm277_vm1, %v7836_v18  ;;  %v7852_v18 = vld [vmem:[%s10164_s1 + $0x38] sm:$0xff]  }
 0x1c1   :  { %7091 = vmatprep.mubr.msk.bf16.mxu0 %vm8025_vm0, %v8023_v1  ;;  %7164 = vmatpush3.bf16.msra.mxu0 %v7846_v36 }
 0x1c2   :  { %7165 = vmatprep.subr.bf16.mxu0 %v8023_v1 }
 0x1c3   :  { %v557_v26 = vpop.f32.mrb[44].mxu0  ;;  %v8903_v28 = vpop.f32.mrb[32].mxu1 }
 0x1c4   :  { %v8906_v29 = vadd.f32 %v557_v26, %v8744_v44  ;;  %v6885_v30 = vpop.f32.mrb[45].mxu0  ;;  %v7009_v32 = vpop.f32.mrb[33].mxu1  ;;  %v7847_v44 = vld [vmem:[%s10164_s1 + $0x20] sm:$0xff]  }
 0x1c5   :  { %v560_v49 = vpop.f32.mrb[46].mxu0  ;;  %v8913_v35 = vpop.f32.mrb[34].mxu1  ;;  %7104 = vmatpush3.bf16.msra.mxu1 %v7847_v44  ;;  %7166 = vmatpush3.bf16.msra.mxu0 %v7848_v40 }
 0x1c6   :  { %v8922_v53 = vadd.f32 %v560_v49, %v8749_v48  ;;  %v6886_v38 = vpop.f32.mrb[47].mxu0  ;;  %v7010_v39 = vpop.f32.mrb[35].mxu1  ;;  %7105 = vmatprep.subr.bf16.mxu1 %v8023_v1  ;;  %7167 = vmatprep.subr.bf16.mxu0 %v8023_v1 }
 0x1c8   :  { %7092 = vmatmul.mubr.msk.bf16.gmra.mrb[152].mxu0 %vm277_vm1, %v7837_v45 }
 0x1c9   :  { %7171 = vmatprep.mubr.msk.bf16.mxu0 %vm8025_vm0, %v8023_v1  ;;  %7106 = vmatpush3.bf16.msra.mxu1 %v7849_v42 }
 0x1ca   :  { %7107 = vmatprep.subr.bf16.mxu1 %v8023_v1  ;;  %7168 = vmatpush3.bf16.msra.mxu0 %v7850_v61 }
 0x1cb   :  { %v565_v48 = vpop.f32.mrb[48].mxu0  ;;  %v8935_v43 = vpop.f32.mrb[36].mxu1  ;;  %7169 = vmatprep.subr.bf16.mxu0 %v8023_v1 }
 0x1cc   :  { %v8938_v63 = vadd.f32 %v565_v48, %v8754_v51  ;;  %v6889_v5 = vpop.f32.mrb[49].mxu0  ;;  %v7013_v50 = vpop.f32.mrb[37].mxu1 }
 0x1cd   :  { %v568_v52 = vpop.f32.mrb[50].mxu0  ;;  %v8942_v54 = vpop.f32.mrb[38].mxu1  ;;  %7108 = vmatpush3.bf16.msra.mxu1 %v7851_v0 }
 0x1ce   :  { %v8951_v51 = vadd.f32 %v568_v52, %v8759_v55  ;;  %v6890_v3 = vpop.f32.mrb[51].mxu0  ;;  %v7014_v13 = vpop.f32.mrb[39].mxu1  ;;  %7109 = vmatprep.subr.bf16.mxu1 %v8023_v1  ;;  %7170 = vmatpush3.bf16.msra.mxu0 %v7853_v4 }
 0x1d1   :  { %7110 = vmatpush3.bf16.msra.mxu1 %v7852_v18 }
 0x1d2   :  { %2155 = vmatprep.subr.bf16.mxu1 %v8029_v60 }
 0x1d3   :  { %v573_v10 = vpop.f32.mrb[52].mxu0  ;;  %v8961_v12 = vpop.f32.mrb[40].mxu1 }
 0x1d4   :  { %v8964_v55 = vadd.f32 %v573_v10, %v8764_v58  ;;  %v6893_v15 = vpop.f32.mrb[53].mxu0  ;;  %v7017_v19 = vpop.f32.mrb[41].mxu1 }
 0x1d5   :  { %v576_v20 = vpop.f32.mrb[54].mxu0  ;;  %v8967_v21 = vpop.f32.mrb[42].mxu1 }
 0x1d6   :  { %v577_v23 = vadd.f32 %v576_v20, %v8769_v62  ;;  %v6894_v22 = vpop.f32.mrb[55].mxu0  ;;  %v7018_v25 = vpop.f32.mrb[43].mxu1 }
 0x1db   :  { %v581_v26 = vpop.f32.mrb[56].mxu0  ;;  %v8970_v30 = vpop.f32.mrb[44].mxu1 }
 0x1dc   :  { %v582_v45 = vadd.f32 %v581_v26, %v8774_v2  ;;  %v6897_v32 = vpop.f32.mrb[57].mxu0  ;;  %v7021_v49 = vpop.f32.mrb[45].mxu1 }
 0x1dd   :  { %v584_v58 = vpop.f32.mrb[58].mxu0  ;;  %v8973_v36 = vpop.f32.mrb[46].mxu1 }
 0x1de   :  { %v585_v44 = vadd.f32 %v584_v58, %v8779_v6  ;;  %v6898_v38 = vpop.f32.mrb[59].mxu0  ;;  %v7022_v39 = vpop.f32.mrb[47].mxu1 }
 0x1e3   :  { %v589_v40 = vpop.f32.mrb[60].mxu0  ;;  %v8976_v42 = vpop.f32.mrb[48].mxu1 }
 0x1e4   :  { %v590_v62 = vadd.f32 %v589_v40, %v8784_v8  ;;  %v6901_v48 = vpop.f32.mrb[61].mxu0  ;;  %v7025_v5 = vpop.f32.mrb[49].mxu1 }
 0x1e5   :  { %v592_v50 = vpop.f32.mrb[62].mxu0  ;;  %v8979_v52 = vpop.f32.mrb[50].mxu1 }
 0x1e6   :  { %v593_v2 = vadd.f32 %v592_v50, %v8789_v11  ;;  %v6902_v61 = vpop.f32.mrb[63].mxu0  ;;  %v7026_v0 = vpop.f32.mrb[51].mxu1 }
 0x1eb   :  { %v597_v3 = vpop.f32.mrb[64].mxu0  ;;  %v8982_v13 = vpop.f32.mrb[52].mxu1 }
 0x1ec   :  { %v598_v6 = vadd.f32 %v597_v3, %v8794_v14  ;;  %v6905_v18 = vpop.f32.mrb[65].mxu0  ;;  %v7029_v4 = vpop.f32.mrb[53].mxu1 }
 0x1ed   :  { %v600_v10 = vpop.f32.mrb[66].mxu0  ;;  %v8985_v15 = vpop.f32.mrb[54].mxu1 }
 0x1ee   :  { %v601_v8 = vadd.f32 %v600_v10, %v8799_v17  ;;  %v6906_v19 = vpop.f32.mrb[67].mxu0  ;;  %v7030_v20 = vpop.f32.mrb[55].mxu1 }
 0x1f3   :  { %v822_v22 = vpop.f32.mrb[68].mxu0  ;;  %v8988_v25 = vpop.f32.mrb[56].mxu1 }
 0x1f4   :  { %v908_v11 = vadd.f32 %v822_v22, %v8906_v29  ;;  %v6941_v26 = vpop.f32.mrb[69].mxu0  ;;  %v7033_v32 = vpop.f32.mrb[57].mxu1 }
 0x1f5   :  { %v825_v49 = vpop.f32.mrb[70].mxu0  ;;  %v8991_v58 = vpop.f32.mrb[58].mxu1 }
 0x1f6   :  { %v909_v14 = vadd.f32 %v825_v49, %v8922_v53  ;;  %v8995_v38 = vadd.f32 %v8828_v34, %v908_v11  ;;  %v6942_v39 = vpop.f32.mrb[71].mxu0  ;;  %v7034_v40 = vpop.f32.mrb[59].mxu1 }
 0x1f8   :  { %v8998_v17 = vadd.f32 %v8836_v57, %v909_v14 }
 0x1fb   :  { %v830_v48 = vpop.f32.mrb[72].mxu0  ;;  %v9000_v5 = vpop.f32.mrb[60].mxu1 }
 0x1fc   :  { %v910_v29 = vadd.f32 %v830_v48, %v8938_v63  ;;  %v6945_v50 = vpop.f32.mrb[73].mxu0  ;;  %v7037_v61 = vpop.f32.mrb[61].mxu1 }
 0x1fd   :  { %v833_v0 = vpop.f32.mrb[74].mxu0  ;;  %v1191_v3 = vpop.f32.mrb[62].mxu1 }
 0x1fe   :  { %v911_v18 = vadd.f32 %v833_v0, %v8951_v51  ;;  %v9005_v53 = vadd.f32 %v8854_v46, %v910_v29  ;;  %v6946_v34 = vpop.f32.mrb[75].mxu0  ;;  %v7038_v4 = vpop.f32.mrb[63].mxu1 }
 0x200   :  { %v9008_v10 = vadd.f32 %v8860_v56, %v911_v18 }
 0x203   :  { %v838_v57 = vpop.f32.mrb[76].mxu0 }
 0x204   :  { %v912_v19 = vadd.f32 %v838_v57, %v8964_v55  ;;  %v6949_v20 = vpop.f32.mrb[77].mxu0 }
 0x205   :  { %v841_v22 = vpop.f32.mrb[78].mxu0 }
 0x206   :  { %v913_v63 = vadd.f32 %v841_v22, %v577_v23  ;;  %v9012_v11 = vadd.f32 %v8877_v7, %v912_v19  ;;  %v6950_v26 = vpop.f32.mrb[79].mxu0 }
 0x208   :  { %v9015_v51 = vadd.f32 %v8884_v16, %v913_v63 }
 0x20b   :  { %v846_v46 = vpop.f32.mrb[80].mxu0 }
 0x20c   :  { %v914_v32 = vadd.f32 %v846_v46, %v582_v45  ;;  %v6953_v49 = vpop.f32.mrb[81].mxu0 }
 0x20d   :  { %v849_v14 = vpop.f32.mrb[82].mxu0 }
 0x20e   :  { %v915_v39 = vadd.f32 %v849_v14, %v585_v44  ;;  %v9018_v56 = vadd.f32 %v8903_v28, %v914_v32  ;;  %v6954_v40 = vpop.f32.mrb[83].mxu0 }
 0x210   :  { %v9021_v55 = vadd.f32 %v8913_v35, %v915_v39 }
 0x213   :  { %v854_v23 = vpop.f32.mrb[84].mxu0 }
 0x214   :  { %v916_v48 = vadd.f32 %v854_v23, %v590_v62  ;;  %v6957_v7 = vpop.f32.mrb[85].mxu0 }
 0x215   :  { %v857_v29 = vpop.f32.mrb[86].mxu0 }
 0x216   :  { %v917_v50 = vadd.f32 %v857_v29, %v593_v2  ;;  %v9024_v16 = vadd.f32 %v8935_v43, %v916_v48  ;;  %v6958_v61 = vpop.f32.mrb[87].mxu0 }
 0x218   :  { %v9027_v45 = vadd.f32 %v8942_v54, %v917_v50 }
 0x21b   :  { %v862_v44 = vpop.f32.mrb[88].mxu0 }
 0x21c   :  { %v918_v0 = vadd.f32 %v862_v44, %v598_v6  ;;  %v6961_v28 = vpop.f32.mrb[89].mxu0 }
 0x21d   :  { %v865_v3 = vpop.f32.mrb[90].mxu0 }
 0x21e   :  { %v919_v18 = vadd.f32 %v865_v3, %v601_v8  ;;  %v9030_v35 = vadd.f32 %v8961_v12, %v918_v0  ;;  %v6962_v34 = vpop.f32.mrb[91].mxu0  ;;  %v1504_v0 = vpop.permute.xlu0 %1503 }
 0x220   :  { %v9033_v62 = vadd.f32 %v8967_v21, %v919_v18  ;;  %v1509_v18 = vpop.permute.xlu1 %1508 }
 0x223   :  { %v870_v2 = vpop.f32.mrb[92].mxu0 }
 0x224   :  { %v920_v43 = vadd.f32 %v870_v2, %v8808_v24  ;;  %v6965_v4 = vpop.f32.mrb[93].mxu0 }
 0x225   :  { %v873_v57 = vpop.f32.mrb[94].mxu0 }
 0x226   :  { %v921_v54 = vadd.f32 %v873_v57, %v8811_v27  ;;  %v9038_v19 = vadd.f32 %v8970_v30, %v920_v43  ;;  %v6966_v6 = vpop.f32.mrb[95].mxu0 }
 0x228   :  { %v9041_v8 = vadd.f32 %v8973_v36, %v921_v54  ;;  %v1514_v54 = vpop.permute.xlu1 %1513 }
 0x22b   :  { %v878_v12 = vpop.f32.mrb[96].mxu0 }
 0x22c   :  { %v922_v20 = vadd.f32 %v878_v12, %v8820_v31  ;;  %v6969_v22 = vpop.f32.mrb[97].mxu0 }
 0x22d   :  { %v881_v21 = vpop.f32.mrb[98].mxu0  ;;  %v1519_v22 = vpop.permute.xlu0 %1518 }
 0x22e   :  { %v923_v63 = vadd.f32 %v881_v21, %v8823_v33  ;;  %v9046_v24 = vadd.f32 %v8976_v42, %v922_v20  ;;  %v6970_v26 = vpop.f32.mrb[99].mxu0 }
 0x230   :  { %v9049_v27 = vadd.f32 %v8979_v52, %v923_v63 }
 0x233   :  { %v886_v30 = vpop.f32.mrb[100].mxu0 }
 0x234   :  { %v924_v46 = vadd.f32 %v886_v30, %v8834_v37  ;;  %v6973_v32 = vpop.f32.mrb[101].mxu0 }
 0x235   :  { %v889_v36 = vpop.f32.mrb[102].mxu0  ;;  %v1524_v32 = vpop.permute.xlu1 %1523 }
 0x236   :  { %v925_v49 = vadd.f32 %v889_v36, %v8839_v41  ;;  %v9054_v31 = vadd.f32 %v8982_v13, %v924_v46  ;;  %v6974_v14 = vpop.f32.mrb[103].mxu0 }
 0x238   :  { %v9057_v33 = vadd.f32 %v8985_v15, %v925_v49 }
 0x23b   :  { %v894_v42 = vpop.f32.mrb[104].mxu0 }
 0x23c   :  { %v926_v39 = vadd.f32 %v894_v42, %v8858_v47  ;;  %v6977_v40 = vpop.f32.mrb[105].mxu0  ;;  %v1529_v42 = vpop.permute.xlu0 %1528 }
 0x23d   :  { %v897_v52 = vpop.f32.mrb[106].mxu0 }
 0x23e   :  { %v927_v23 = vadd.f32 %v897_v52, %v8863_v59  ;;  %v9062_v37 = vadd.f32 %v8988_v25, %v926_v39  ;;  %v6978_v48 = vpop.f32.mrb[107].mxu0 }
 0x240   :  { %v9065_v41 = vadd.f32 %v8991_v58, %v927_v23 }
 0x243   :  { %v902_v13 = vpop.f32.mrb[108].mxu0 }
 0x244   :  { %v928_v7 = vadd.f32 %v902_v13, %v8882_v9  ;;  %v6981_v29 = vpop.f32.mrb[109].mxu0 }
 0x245   :  { %v905_v15 = vpop.f32.mrb[110].mxu0 }
 0x246   :  { %v9069_v50 = vadd.f32 %v9000_v5, %v928_v7  ;;  %v6982_v47 = vpop.f32.mrb[111].mxu0  ;;  %v1534_v7 = vpop.permute.xlu1 %1533 }
 0x24b   :  { %v1394_v61 = vpop.f32.mrb[112].mxu0 }
 0x24c   :  { %v1480_v44 = vadd.f32 %v1394_v61, %v8995_v38  ;;  %v7053_v59 = vpop.f32.mrb[113].mxu0  ;;  %v1539_v61 = vpop.permute.xlu0 %1538 }
 0x24d   :  { %v1397_v25 = vpop.f32.mrb[114].mxu0 }
 0x24e   :  { %v1606_v28 = vadd.f32 %v1504_v0, %v1480_v44  ;;  %v1481_v3 = vadd.f32 %v1397_v25, %v8998_v17  ;;  %v7054_v58 = vpop.f32.mrb[115].mxu0 }
 0x24f   :  { %v1544_v58 = vpop.permute.xlu1 %1543 }
 0x250   :  { %v1607_v34 = vadd.f32 %v1509_v18, %v1481_v3  ;;  %v1627_v2 = vmax.f32 %v1606_v28, 0.0 }
 0x252   :  { %v1628_v9 = vmax.f32 %v1607_v34, 0.0 }
 0x253   :  { %v1402_v43 = vpop.f32.mrb[116].mxu0 }
 0x254   :  { %v1648_v4 = vpack.c.bf16 %v1628_v9, %v1627_v2  ;;  %v1482_v5 = vadd.f32 %v1402_v43, %v9005_v53  ;;  %v7057_v57 = vpop.f32.mrb[117].mxu0  ;;  %v1549_v9 = vpop.permute.xlu0 %1548 }
 0x255   :  { %v1405_v6 = vpop.f32.mrb[118].mxu0 }
 0x256   :  { %v1608_v12 = vadd.f32 %v1514_v54, %v1482_v5  ;;  %v1483_v38 = vadd.f32 %v1405_v6, %v9008_v10  ;;  %v7058_v20 = vpop.f32.mrb[119].mxu0  ;;  %7112 = vmatmul.mubr.bf16.vlgmr.msra.gmra.mrb[64].mxu1 %v1648_v4  ;;  %7172 = vmatmul.mubr.bf16.vlgmr.msra.gmra.mrb[156].mxu0 %v1648_v4 }
 0x257   :  { %7115 = vmatprep.mubr.msk.bf16.mxu1 %vm8025_vm0, %v8023_v1  ;;  %7175 = vmatprep.mubr.msk.bf16.mxu0 %vm8025_vm0, %v8023_v1 }
 0x258   :  { %v1609_v17 = vadd.f32 %v1519_v22, %v1483_v38  ;;  %v1629_v21 = vmax.f32 %v1608_v12, 0.0  ;;  %v1554_v12 = vpop.permute.xlu1 %1553 }
 0x25a   :  { %v1630_v63 = vmax.f32 %v1609_v17, 0.0  ;;  %v1559_v17 = vpop.permute.xlu0 %1558 }
 0x25b   :  { %v1410_v53 = vpop.f32.mrb[120].mxu0 }
 0x25c   :  { %v1484_v26 = vadd.f32 %v1410_v53, %v9012_v11  ;;  %v7061_v30 = vpop.f32.mrb[121].mxu0  ;;  %v1649_v46 = vpack.c.bf16 %v1630_v63, %v1629_v21 }
 0x25d   :  { %v1413_v10 = vpop.f32.mrb[122].mxu0 }
 0x25e   :  { %v1610_v36 = vadd.f32 %v1524_v32, %v1484_v26  ;;  %v1485_v49 = vadd.f32 %v1413_v10, %v9015_v51  ;;  %v7062_v14 = vpop.f32.mrb[123].mxu0  ;;  %7116 = vmatmul.mubr.bf16.gmra.mrb[68].mxu1 %v1649_v46  ;;  %7176 = vmatmul.mubr.bf16.gmra.mrb[160].mxu0 %v1649_v46  ;;  %v1564_v32 = vpop.permute.xlu1 %1563 }
 0x25f   :  { %7119 = vmatprep.mubr.msk.bf16.mxu1 %vm8025_vm0, %v8023_v1  ;;  %7179 = vmatprep.mubr.msk.bf16.mxu0 %vm8025_vm0, %v8023_v1  ;;  %v1569_v14 = vpop.permute.xlu0 %1568 }
 0x260   :  { %v1611_v39 = vadd.f32 %v1529_v42, %v1485_v49  ;;  %v1631_v40 = vmax.f32 %v1610_v36, 0.0 }
 0x262   :  { %v1632_v11 = vmax.f32 %v1611_v39, 0.0 }
 0x263   :  { %v1418_v52 = vpop.f32.mrb[124].mxu0 }
 0x264   :  { %v1486_v23 = vadd.f32 %v1418_v52, %v9018_v56  ;;  %v7065_v48 = vpop.f32.mrb[125].mxu0  ;;  %v1650_v13 = vpack.c.bf16 %v1632_v11, %v1631_v40 }
 0x265   :  { %v1421_v51 = vpop.f32.mrb[126].mxu0  ;;  %v1574_v48 = vpop.permute.xlu1 %1573 }
 0x266   :  { %v1612_v29 = vadd.f32 %v1534_v7, %v1486_v23  ;;  %v1487_v15 = vadd.f32 %v1421_v51, %v9021_v55  ;;  %v7066_v47 = vpop.f32.mrb[127].mxu0  ;;  %7120 = vmatmul.mubr.bf16.gmra.mrb[72].mxu1 %v1650_v13  ;;  %7180 = vmatmul.mubr.bf16.gmra.mrb[164].mxu0 %v1650_v13 }
 0x267   :  { %7123 = vmatprep.mubr.msk.bf16.mxu1 %vm8025_vm0, %v8023_v1  ;;  %7183 = vmatprep.mubr.msk.bf16.mxu0 %vm8025_vm0, %v8023_v1 }
 0x268   :  { %v1613_v44 = vadd.f32 %v1539_v61, %v1487_v15  ;;  %v1633_v59 = vmax.f32 %v1612_v29, 0.0  ;;  %v1579_v29 = vpop.permute.xlu0 %1578 }
 0x26a   :  { %v1634_v56 = vmax.f32 %v1613_v44, 0.0 }
 0x26b   :  { %v1426_v0 = vpop.f32.mrb[128].mxu0 }
 0x26c   :  { %v1488_v25 = vadd.f32 %v1426_v0, %v9024_v16  ;;  %v7069_v28 = vpop.f32.mrb[129].mxu0  ;;  %v1651_v3 = vpack.c.bf16 %v1634_v56, %v1633_v59  ;;  %v1584_v0 = vpop.permute.xlu1 %1583 }
 0x26d   :  { %v1429_v55 = vpop.f32.mrb[130].mxu0 }
 0x26e   :  { %v1614_v18 = vadd.f32 %v1544_v58, %v1488_v25  ;;  %v1489_v34 = vadd.f32 %v1429_v55, %v9027_v45  ;;  %v7070_v2 = vpop.f32.mrb[131].mxu0  ;;  %7124 = vmatmul.mubr.bf16.gmra.mrb[76].mxu1 %v1651_v3  ;;  %7184 = vmatmul.mubr.bf16.gmra.mrb[168].mxu0 %v1651_v3  ;;  %v1589_v58 = vpop.permute.xlu0 %1588 }
 0x26f   :  { %7127 = vmatprep.mubr.msk.bf16.mxu1 %vm8025_vm0, %v8023_v1  ;;  %7187 = vmatprep.mubr.msk.bf16.mxu0 %vm8025_vm0, %v8023_v1 }
 0x270   :  { %v1615_v43 = vadd.f32 %v1549_v9, %v1489_v34  ;;  %v1635_v4 = vmax.f32 %v1614_v18, 0.0 }
 0x272   :  { %v1636_v16 = vmax.f32 %v1615_v43, 0.0 }
 0x273   :  { %v1434_v5 = vpop.f32.mrb[132].mxu0 }
 0x274   :  { %v1490_v57 = vadd.f32 %v1434_v5, %v9030_v35  ;;  %v7073_v54 = vpop.f32.mrb[133].mxu0  ;;  %v1652_v6 = vpack.c.bf16 %v1636_v16, %v1635_v4  ;;  %v1594_v4 = vpop.permute.xlu1 %1593 }
 0x275   :  { %v1437_v45 = vpop.f32.mrb[134].mxu0  ;;  %v1599_v54 = vpop.permute.xlu0 %1598 }
 0x276   :  { %v1616_v38 = vadd.f32 %v1554_v12, %v1490_v57  ;;  %v1491_v20 = vadd.f32 %v1437_v45, %v9033_v62  ;;  %v7074_v22 = vpop.f32.mrb[135].mxu0  ;;  %7128 = vmatmul.mubr.bf16.gmra.mrb[80].mxu1 %v1652_v6  ;;  %7188 = vmatmul.mubr.bf16.gmra.mrb[172].mxu0 %v1652_v6 }
 0x277   :  { %7131 = vmatprep.mubr.msk.bf16.mxu1 %vm8025_vm0, %v8023_v1  ;;  %7191 = vmatprep.mubr.msk.bf16.mxu0 %vm8025_vm0, %v8023_v1 }
 0x278   :  { %v1617_v21 = vadd.f32 %v1559_v17, %v1491_v20  ;;  %v1637_v63 = vmax.f32 %v1616_v38, 0.0  ;;  %v1604_v17 = vpop.permute.xlu1 %1603 }
 0x27a   :  { %v1638_v35 = vmax.f32 %v1617_v21, 0.0 }
 0x27b   :  { %v1442_v53 = vpop.f32.mrb[136].mxu0 }
 0x27c   :  { %v1492_v26 = vadd.f32 %v1442_v53, %v9038_v19  ;;  %v7077_v30 = vpop.f32.mrb[137].mxu0  ;;  %v1653_v46 = vpack.c.bf16 %v1638_v35, %v1637_v63 }
 0x27d   :  { %v1445_v62 = vpop.f32.mrb[138].mxu0 }
 0x27e   :  { %v1618_v10 = vadd.f32 %v1564_v32, %v1492_v26  ;;  %v1493_v36 = vadd.f32 %v1445_v62, %v9041_v8  ;;  %v7078_v49 = vpop.f32.mrb[139].mxu0  ;;  %7132 = vmatmul.mubr.bf16.gmra.mrb[84].mxu1 %v1653_v46  ;;  %7192 = vmatmul.mubr.bf16.gmra.mrb[176].mxu0 %v1653_v46 }
 0x27f   :  { %7135 = vmatprep.mubr.msk.bf16.mxu1 %vm8025_vm0, %v8023_v1  ;;  %7195 = vmatprep.mubr.msk.bf16.mxu0 %vm8025_vm0, %v8023_v1 }
 0x280   :  { %v1619_v42 = vadd.f32 %v1569_v14, %v1493_v36  ;;  %v1639_v39 = vmax.f32 %v1618_v10, 0.0 }
 0x282   :  { %v1640_v19 = vmax.f32 %v1619_v42, 0.0 }
 0x283   :  { %v1450_v40 = vpop.f32.mrb[140].mxu0 }
 0x284   :  { %v1494_v11 = vadd.f32 %v1450_v40, %v9046_v24  ;;  %v7081_v52 = vpop.f32.mrb[141].mxu0  ;;  %v1654_v23 = vpack.c.bf16 %v1640_v19, %v1639_v39 }
 0x285   :  { %v1453_v8 = vpop.f32.mrb[142].mxu0 }
 0x286   :  { %v1620_v13 = vadd.f32 %v1574_v48, %v1494_v11  ;;  %v1495_v7 = vadd.f32 %v1453_v8, %v9049_v27  ;;  %v7082_v51 = vpop.f32.mrb[143].mxu0  ;;  %7136 = vmatmul.mubr.bf16.gmra.mrb[88].mxu1 %v1654_v23  ;;  %7196 = vmatmul.mubr.bf16.gmra.mrb[180].mxu0 %v1654_v23 }
 0x287   :  { %7139 = vmatprep.mubr.msk.bf16.mxu1 %vm8025_vm0, %v8023_v1  ;;  %7199 = vmatprep.mubr.msk.bf16.mxu0 %vm8025_vm0, %v8023_v1 }
 0x288   :  { %v1621_v15 = vadd.f32 %v1579_v29, %v1495_v7  ;;  %v1641_v47 = vmax.f32 %v1620_v13, 0.0 }
 0x28a   :  { %v1642_v24 = vmax.f32 %v1621_v15, 0.0 }
 0x28b   :  { %v1458_v61 = vpop.f32.mrb[144].mxu0 }
 0x28c   :  { %v1496_v44 = vadd.f32 %v1458_v61, %v9054_v31  ;;  %v7085_v59 = vpop.f32.mrb[145].mxu0  ;;  %v1655_v56 = vpack.c.bf16 %v1642_v24, %v1641_v47 }
 0x28d   :  { %v1461_v27 = vpop.f32.mrb[146].mxu0 }
 0x28e   :  { %v1622_v25 = vadd.f32 %v1584_v0, %v1496_v44  ;;  %v1497_v28 = vadd.f32 %v1461_v27, %v9057_v33  ;;  %v7086_v3 = vpop.f32.mrb[147].mxu0  ;;  %7140 = vmatmul.mubr.bf16.gmra.mrb[92].mxu1 %v1655_v56  ;;  %7200 = vmatmul.mubr.bf16.gmra.mrb[184].mxu0 %v1655_v56 }
 0x28f   :  { %7143 = vmatprep.mubr.msk.bf16.mxu1 %vm8025_vm0, %v8023_v1  ;;  %7203 = vmatprep.mubr.msk.bf16.mxu0 %vm8025_vm0, %v8023_v1 }
 0x290   :  { %v1623_v55 = vadd.f32 %v1589_v58, %v1497_v28  ;;  %v1643_v18 = vmax.f32 %v1622_v25, 0.0 }
 0x292   :  { %v1644_v31 = vmax.f32 %v1623_v55, 0.0 }
 0x293   :  { %v1466_v34 = vpop.f32.mrb[148].mxu0 }
 0x294   :  { %v1498_v2 = vadd.f32 %v1466_v34, %v9062_v37  ;;  %v7089_v9 = vpop.f32.mrb[149].mxu0  ;;  %v1656_v43 = vpack.c.bf16 %v1644_v31, %v1643_v18 }
 0x295   :  { %v1469_v33 = vpop.f32.mrb[150].mxu0 }
 0x296   :  { %v1624_v16 = vadd.f32 %v1594_v4, %v1498_v2  ;;  %v1499_v5 = vadd.f32 %v1469_v33, %v9065_v41  ;;  %v7090_v57 = vpop.f32.mrb[151].mxu0  ;;  %7144 = vmatmul.mubr.bf16.gmra.mrb[96].mxu1 %v1656_v43  ;;  %7204 = vmatmul.mubr.bf16.gmra.mrb[188].mxu0 %v1656_v43 }
 0x297   :  { %7147 = vmatprep.mubr.msk.bf16.mxu1 %vm8025_vm0, %v8023_v1  ;;  %7207 = vmatprep.mubr.msk.bf16.mxu0 %vm8025_vm0, %v8023_v1 }
 0x298   :  { %v1625_v6 = vadd.f32 %v1599_v54, %v1499_v5  ;;  %v1645_v12 = vmax.f32 %v1624_v16, 0.0 }
 0x29a   :  { %v1646_v37 = vmax.f32 %v1625_v6, 0.0 }
 0x29b   :  { %v1474_v45 = vpop.f32.mrb[152].mxu0 }
 0x29c   :  { %v1500_v38 = vadd.f32 %v1474_v45, %v9069_v50  ;;  %v7093_v20 = vpop.f32.mrb[153].mxu0  ;;  %v1657_v22 = vpack.c.bf16 %v1646_v37, %v1645_v12  ;;  %v7856_v50 = vld [vmem:[%s10136_s5 + $0x4] ss:$8 sps:$4 sm:$0xff]  }
 0x29d   :  { %v1477_v41 = vpop.f32.mrb[154].mxu0 }
 0x29e   :  { %v1626_v21 = vadd.f32 %v1604_v17, %v1500_v38  ;;  %v7094_v63 = vpop.f32.mrb[155].mxu0  ;;  %7148 = vmatmul.mubr.bf16.gmra.mrb[100].mxu1 %v1657_v22  ;;  %7208 = vmatmul.mubr.bf16.gmra.mrb[192].mxu0 %v1657_v22 }
 0x29f   :  { %7151 = vmatprep.mubr.msk.bf16.mxu1 %vm8025_vm0, %v8023_v1  ;;  %7211 = vmatprep.mubr.msk.bf16.mxu0 %vm8025_vm0, %v8023_v1 }
 0x2a0   :  { %v1647_v35 = vmax.f32 %v1626_v21, 0.0 }
 0x2a2   :  { %v1658_v53 = vpack.c.bf16 %v1647_v35, %v1647_v35 }
 0x2a6   :  { %7152 = vmatmul.mubr.bf16.gmra.mrb[104].mxu1 %v1658_v53  ;;  %7212 = vmatmul.mubr.bf16.gmra.mrb[196].mxu0 %v1658_v53 }
 0x2a7   :  { %6082 = vmatprep.mubr.msk.bf16.mxu1 %vm2132_vm6, %v7856_v50 }
 0x329   :  { %v1795_v26 = vpop.f32.mrb[64].mxu1  ;;  %v1963_v30 = vpop.f32.mrb[156].mxu0 }
 0x32a   :  { %v2049_v46 = vmax.f32 %v1795_v26, %v1963_v30  ;;  %v7113_v32 = vpop.f32.mrb[65].mxu1  ;;  %v7173_v62 = vpop.f32.mrb[157].mxu0 }
 0x32b   :  { %v1798_v10 = vpop.f32.mrb[66].mxu1  ;;  %v1966_v36 = vpop.f32.mrb[158].mxu0 }
 0x32c   :  { %v2050_v49 = vmax.f32 %v1798_v10, %v1966_v36  ;;  %v7114_v14 = vpop.f32.mrb[67].mxu1  ;;  %v7174_v42 = vpop.f32.mrb[159].mxu0 }
 0x32e   :  { %v9136_v39 = vpack.c.bf16 %v2050_v49, %v2049_v46 }
 0x330   :  { %2156 = vmatpush1.bf16.msra.mxu1 %v9136_v39 }
 0x331   :  { %v1803_v19 = vpop.f32.mrb[68].mxu1  ;;  %v1971_v40 = vpop.f32.mrb[160].mxu0  ;;  %2157 = vmatprep.subr.bf16.mxu1 %v8029_v60 }
 0x332   :  { %v2051_v11 = vmax.f32 %v1803_v19, %v1971_v40  ;;  %v7117_v52 = vpop.f32.mrb[69].mxu1  ;;  %v7177_v23 = vpop.f32.mrb[161].mxu0 }
 0x333   :  { %v1806_v48 = vpop.f32.mrb[70].mxu1  ;;  %v1974_v8 = vpop.f32.mrb[162].mxu0 }
 0x334   :  { %v2052_v13 = vmax.f32 %v1806_v48, %v1974_v8  ;;  %v7118_v7 = vpop.f32.mrb[71].mxu1  ;;  %v7178_v51 = vpop.f32.mrb[163].mxu0 }
 0x336   :  { %v9140_v29 = vpack.c.bf16 %v2052_v13, %v2051_v11 }
 0x338   :  { %2158 = vmatpush1.bf16.msra.mxu1 %v9140_v29 }
 0x339   :  { %v1811_v15 = vpop.f32.mrb[72].mxu1  ;;  %v1979_v47 = vpop.f32.mrb[164].mxu0  ;;  %2159 = vmatprep.subr.bf16.mxu1 %v8029_v60 }
 0x33a   :  { %v2053_v24 = vmax.f32 %v1811_v15, %v1979_v47  ;;  %v7121_v61 = vpop.f32.mrb[73].mxu1  ;;  %v7181_v44 = vpop.f32.mrb[165].mxu0 }
 0x33b   :  { %v1814_v59 = vpop.f32.mrb[74].mxu1  ;;  %v1982_v56 = vpop.f32.mrb[166].mxu0 }
 0x33c   :  { %v2054_v0 = vmax.f32 %v1814_v59, %v1982_v56  ;;  %v7122_v27 = vpop.f32.mrb[75].mxu1  ;;  %v7182_v25 = vpop.f32.mrb[167].mxu0 }
 0x33e   :  { %v9144_v28 = vpack.c.bf16 %v2054_v0, %v2053_v24 }
 0x340   :  { %2160 = vmatpush1.bf16.msra.mxu1 %v9144_v28 }
 0x341   :  { %v1819_v3 = vpop.f32.mrb[76].mxu1  ;;  %v1987_v58 = vpop.f32.mrb[168].mxu0  ;;  %2161 = vmatprep.subr.bf16.mxu1 %v8029_v60 }
 0x342   :  { %v2055_v55 = vmax.f32 %v1819_v3, %v1987_v58  ;;  %v7125_v18 = vpop.f32.mrb[77].mxu1  ;;  %v7185_v31 = vpop.f32.mrb[169].mxu0 }
 0x343   :  { %v1822_v34 = vpop.f32.mrb[78].mxu1  ;;  %v1990_v2 = vpop.f32.mrb[170].mxu0 }
 0x344   :  { %v2056_v9 = vmax.f32 %v1822_v34, %v1990_v2  ;;  %v7126_v43 = vpop.f32.mrb[79].mxu1  ;;  %v7186_v4 = vpop.f32.mrb[171].mxu0 }
 0x346   :  { %v9148_v33 = vpack.c.bf16 %v2056_v9, %v2055_v55 }
 0x348   :  { %2162 = vmatpush1.bf16.msra.mxu1 %v9148_v33 }
 0x349   :  { %v1827_v16 = vpop.f32.mrb[80].mxu1  ;;  %v1995_v5 = vpop.f32.mrb[172].mxu0  ;;  %2163 = vmatprep.subr.bf16.mxu1 %v8029_v60 }
 0x34a   :  { %v2057_v57 = vmax.f32 %v1827_v16, %v1995_v5  ;;  %v7129_v54 = vpop.f32.mrb[81].mxu1  ;;  %v7189_v6 = vpop.f32.mrb[173].mxu0 }
 0x34b   :  { %v1830_v12 = vpop.f32.mrb[82].mxu1  ;;  %v1998_v37 = vpop.f32.mrb[174].mxu0 }
 0x34c   :  { %v2058_v45 = vmax.f32 %v1830_v12, %v1998_v37  ;;  %v7130_v38 = vpop.f32.mrb[83].mxu1  ;;  %v7190_v20 = vpop.f32.mrb[175].mxu0 }
 0x34e   :  { %v9152_v22 = vpack.c.bf16 %v2058_v45, %v2057_v57 }
 0x350   :  { %2164 = vmatpush1.bf16.msra.mxu1 %v9152_v22 }
 0x351   :  { %v1835_v17 = vpop.f32.mrb[84].mxu1  ;;  %v2003_v41 = vpop.f32.mrb[176].mxu0  ;;  %2165 = vmatprep.subr.bf16.mxu1 %v8029_v60 }
 0x352   :  { %v2059_v21 = vmax.f32 %v1835_v17, %v2003_v41  ;;  %v7133_v63 = vpop.f32.mrb[85].mxu1  ;;  %v7193_v35 = vpop.f32.mrb[177].mxu0 }
 0x353   :  { %v1838_v53 = vpop.f32.mrb[86].mxu1  ;;  %v2006_v50 = vpop.f32.mrb[178].mxu0 }
 0x354   :  { %v2060_v26 = vmax.f32 %v1838_v53, %v2006_v50  ;;  %v7134_v30 = vpop.f32.mrb[87].mxu1  ;;  %v7194_v46 = vpop.f32.mrb[179].mxu0 }
 0x355   :  { %v7854_v46 = vld [vmem:[%s10136_s5] ss:$8 sps:$4 sm:$0xff]  }
 0x356   :  { %v9156_v32 = vpack.c.bf16 %v2060_v26, %v2059_v21 }
 0x358   :  { %2166 = vmatpush1.bf16.msra.mxu1 %v9156_v32 }
 0x359   :  { %v1843_v62 = vpop.f32.mrb[88].mxu1  ;;  %v2011_v10 = vpop.f32.mrb[180].mxu0  ;;  %2167 = vmatprep.subr.bf16.mxu1 %v8029_v60 }
 0x35a   :  { %v2061_v36 = vmax.f32 %v1843_v62, %v2011_v10  ;;  %v7137_v49 = vpop.f32.mrb[89].mxu1  ;;  %v7197_v14 = vpop.f32.mrb[181].mxu0  ;;  %v7857_v62 = vld [vmem:[%s10136_s5 + $0x14] ss:$8 sps:$4 sm:$0xff]   ;;  %v7859_v10 = vld [vmem:[%s10136_s5 + $0x10] ss:$8 sps:$4 sm:$0xff]  }
 0x35b   :  { %v1846_v42 = vpop.f32.mrb[90].mxu1  ;;  %v2014_v19 = vpop.f32.mrb[182].mxu0 }
 0x35c   :  { %v2062_v40 = vmax.f32 %v1846_v42, %v2014_v19  ;;  %v7138_v11 = vpop.f32.mrb[91].mxu1  ;;  %v7198_v52 = vpop.f32.mrb[183].mxu0  ;;  %v7873_v42 = vld [vmem:[%s10137_s6 + $0x4] ss:$8 sps:$4 sm:$0xff]   ;;  %v7871_v19 = vld [vmem:[%s10137_s6] ss:$8 sps:$4 sm:$0xff]  }
 0x35d   :  { %v7876_v11 = vld [vmem:[%s10137_s6 + $0x10] ss:$8 sps:$4 sm:$0xff]   ;;  %v7877_v52 = vld [vmem:[%s10137_s6 + $0x24] ss:$8 sps:$4 sm:$0xff]  }
 0x35e   :  { %v9160_v23 = vpack.c.bf16 %v2062_v40, %v2061_v36  ;;  %v7860_v36 = vld [vmem:[%s10136_s5 + $0x24] ss:$8 sps:$4 sm:$0xff]   ;;  %v7874_v40 = vld [vmem:[%s10137_s6 + $0x14] ss:$8 sps:$4 sm:$0xff]  }
 0x360   :  { %2168 = vmatpush1.bf16.msra.mxu1 %v9160_v23 }
 0x361   :  { %v1851_v48 = vpop.f32.mrb[92].mxu1  ;;  %v2019_v8 = vpop.f32.mrb[184].mxu0  ;;  %2169 = vmatprep.subr.bf16.mxu1 %v8029_v60 }
 0x362   :  { %v2063_v13 = vmax.f32 %v1851_v48, %v2019_v8  ;;  %v7141_v7 = vpop.f32.mrb[93].mxu1  ;;  %v7201_v51 = vpop.f32.mrb[185].mxu0  ;;  %v7880_v48 = vld [vmem:[%s10137_s6 + $0x34] ss:$8 sps:$4 sm:$0xff]   ;;  %v7882_v8 = vld [vmem:[%s10137_s6 + $0x30] ss:$8 sps:$4 sm:$0xff]  }
 0x363   :  { %v1854_v15 = vpop.f32.mrb[94].mxu1  ;;  %v2022_v47 = vpop.f32.mrb[186].mxu0  ;;  %v1712_v7 = vld [vmem:[%s10137_s6 + $0x50] sm:$0x33]  ;;  %v7885_v51 = vld [vmem:[%s10137_s6 + $0x40] ss:$8 sps:$4 sm:$0xff]  }
 0x364   :  { %v2064_v24 = vmax.f32 %v1854_v15, %v2022_v47  ;;  %v7142_v61 = vpop.f32.mrb[95].mxu1  ;;  %v7202_v44 = vpop.f32.mrb[187].mxu0  ;;  %v6099_v15 = vcombine.high %v1712_v7, %v1712_v7  ;;  %v6098_v47 = vcombine.low %v1712_v7, %v1712_v7 }
 0x366   :  { %v9164_v59 = vpack.c.bf16 %v2064_v24, %v2063_v13  ;;  %v7883_v13 = vld [vmem:[%s10137_s6 + $0x44] ss:$8 sps:$4 sm:$0xff]  }
 0x368   :  { %2170 = vmatpush1.bf16.msra.mxu1 %v9164_v59 }
 0x369   :  { %v1859_v56 = vpop.f32.mrb[96].mxu1  ;;  %v2027_v0 = vpop.f32.mrb[188].mxu0  ;;  %2171 = vmatprep.subr.bf16.mxu1 %v8029_v60 }
 0x36a   :  { %v2065_v27 = vmax.f32 %v1859_v56, %v2027_v0  ;;  %v7145_v25 = vpop.f32.mrb[97].mxu1  ;;  %v7205_v3 = vpop.f32.mrb[189].mxu0 }
 0x36b   :  { %v1862_v58 = vpop.f32.mrb[98].mxu1  ;;  %v2030_v55 = vpop.f32.mrb[190].mxu0 }
 0x36c   :  { %v2066_v18 = vmax.f32 %v1862_v58, %v2030_v55  ;;  %v7146_v31 = vpop.f32.mrb[99].mxu1  ;;  %v7206_v34 = vpop.f32.mrb[191].mxu0 }
 0x36e   :  { %v9168_v2 = vpack.c.bf16 %v2066_v18, %v2065_v27 }
 0x370   :  { %2172 = vmatpush1.bf16.msra.mxu1 %v9168_v2 }
 0x371   :  { %v1867_v9 = vpop.f32.mrb[100].mxu1  ;;  %v2035_v43 = vpop.f32.mrb[192].mxu0  ;;  %2173 = vmatprep.subr.bf16.mxu1 %v8029_v60 }
 0x372   :  { %v2067_v4 = vmax.f32 %v1867_v9, %v2035_v43  ;;  %v7149_v16 = vpop.f32.mrb[101].mxu1  ;;  %v7209_v5 = vpop.f32.mrb[193].mxu0 }
 0x373   :  { %v1870_v57 = vpop.f32.mrb[102].mxu1  ;;  %v2038_v54 = vpop.f32.mrb[194].mxu0 }
 0x374   :  { %v2068_v6 = vmax.f32 %v1870_v57, %v2038_v54  ;;  %v7150_v12 = vpop.f32.mrb[103].mxu1  ;;  %v7210_v37 = vpop.f32.mrb[195].mxu0 }
 0x376   :  { %v2079_v45 = vpack.c.bf16 %v2068_v6, %v2067_v4 }
 0x378   :  { %2174 = vmatpush1.bf16.msra.mxu1 %v2079_v45 }
 0x379   :  { %v1875_v38 = vpop.f32.mrb[104].mxu1  ;;  %v2043_v20 = vpop.f32.mrb[196].mxu0  ;;  %2175 = vmatprep.subr.bf16.mxu1 %v8029_v60 }
 0x37a   :  { %v2069_v17 = vmax.f32 %v1875_v38, %v2043_v20  ;;  %v7153_v41 = vpop.f32.mrb[105].mxu1  ;;  %v7213_v21 = vpop.f32.mrb[197].mxu0 }
 0x37b   :  { %v1878_v63 = vpop.f32.mrb[106].mxu1  ;;  %v2046_v35 = vpop.f32.mrb[198].mxu0 }
 0x37c   :  { %v2080_v53 = vpack.c.bf16 %v2069_v17, %v2069_v17  ;;  %v7154_v50 = vpop.f32.mrb[107].mxu1  ;;  %v7214_v26 = vpop.f32.mrb[199].mxu0 }
 0x37e   :  { %v2153_v30 = vsel %vm2151_vm7, %v2080_v53, 0 }
 0x37f   :  { %2176 = vmatpush1.bf16.msra.mxu1 %v2153_v30 }
 0x380   :  { %2304 = vmatprep.subr.bf16.mxu1 %v8029_v60 }
 0x382   :  { %2188 = vmatmul.mubr.bf16.vlgmr.msra.gmra.mrb[108].mxu1 %v7854_v46 }
 0x383   :  { %2305 = vmatpush1.bf16.msra.mxu1 %v9136_v39  ;;  %6083 = vmatprep.mubr.msk.bf16.mxu1 %vm2132_vm6, %v7857_v62  ;;  %v7862_v39 = vld [vmem:[%s10136_s5 + $0x20] ss:$8 sps:$4 sm:$0xff]  }
 0x384   :  { %2306 = vmatprep.subr.bf16.mxu1 %v8029_v60 }
 0x387   :  { %2307 = vmatpush1.bf16.msra.mxu1 %v9140_v29  ;;  %v7863_v29 = vld [vmem:[%s10136_s5 + $0x34] ss:$8 sps:$4 sm:$0xff]  }
 0x388   :  { %2308 = vmatprep.subr.bf16.mxu1 %v8029_v60 }
 0x38a   :  { %2196 = vmatmul.mubr.bf16.gmra.mrb[112].mxu1 %v7859_v10 }
 0x38b   :  { %2309 = vmatpush1.bf16.msra.mxu1 %v9144_v28  ;;  %6084 = vmatprep.mubr.msk.bf16.mxu1 %vm2132_vm6, %v7860_v36  ;;  %v7865_v28 = vld [vmem:[%s10136_s5 + $0x30] ss:$8 sps:$4 sm:$0xff]  }
 0x38c   :  { %2310 = vmatprep.subr.bf16.mxu1 %v8029_v60 }
 0x38f   :  { %2311 = vmatpush1.bf16.msra.mxu1 %v9148_v33  ;;  %v7866_v33 = vld [vmem:[%s10136_s5 + $0x44] ss:$8 sps:$4 sm:$0xff]  }
 0x390   :  { %2312 = vmatprep.subr.bf16.mxu1 %v8029_v60 }
 0x392   :  { %2204 = vmatmul.mubr.bf16.gmra.mrb[116].mxu1 %v7862_v39 }
 0x393   :  { %2313 = vmatpush1.bf16.msra.mxu1 %v9152_v22  ;;  %6085 = vmatprep.mubr.msk.bf16.mxu1 %vm2132_vm6, %v7863_v29  ;;  %v1701_v22 = vld [vmem:[%s10136_s5 + $0x50] sm:$0x33] }
 0x394   :  { %2314 = vmatprep.subr.bf16.mxu1 %v8029_v60  ;;  %v6081_v49 = vcombine.high %v1701_v22, %v1701_v22  ;;  %v6080_v14 = vcombine.low %v1701_v22, %v1701_v22 }
 0x397   :  { %2315 = vmatpush1.bf16.msra.mxu1 %v9156_v32  ;;  %v7868_v32 = vld [vmem:[%s10136_s5 + $0x40] ss:$8 sps:$4 sm:$0xff]  }
 0x398   :  { %2316 = vmatprep.subr.bf16.mxu1 %v8029_v60 }
 0x39a   :  { %2212 = vmatmul.mubr.bf16.gmra.mrb[120].mxu1 %v7865_v28 }
 0x39b   :  { %2317 = vmatpush1.bf16.msra.mxu1 %v9160_v23  ;;  %6086 = vmatprep.mubr.msk.bf16.mxu1 %vm2132_vm6, %v7866_v33  ;;  %v7879_v23 = vld [vmem:[%s10137_s6 + $0x20] ss:$8 sps:$4 sm:$0xff]  }
 0x39c   :  { %2318 = vmatprep.subr.bf16.mxu1 %v8029_v60 }
 0x39f   :  { %2319 = vmatpush1.bf16.msra.mxu1 %v9164_v59 }
 0x3a0   :  { %2320 = vmatprep.subr.bf16.mxu1 %v8029_v60 }
 0x3a2   :  { %2220 = vmatmul.mubr.bf16.gmra.mrb[124].mxu1 %v7868_v32 }
 0x3a3   :  { %2321 = vmatpush1.bf16.msra.mxu1 %v9168_v2  ;;  %6087 = vmatprep.mubr.msk.bf16.mxu1 %vm2132_vm6, %v6081_v49 }
 0x3a4   :  { %2322 = vmatprep.subr.bf16.mxu1 %v8029_v60 }
 0x3a7   :  { %2323 = vmatpush1.bf16.msra.mxu1 %v2079_v45 }
 0x3a8   :  { %2324 = vmatprep.subr.bf16.mxu1 %v8029_v60 }
 0x3aa   :  { %2228 = vmatmul.mubr.bf16.gmra.mrb[128].mxu1 %v6080_v14 }
 0x3ab   :  { %2325 = vmatpush1.bf16.msra.mxu1 %v2153_v30  ;;  %6100 = vmatprep.mubr.msk.bf16.mxu1 %vm2132_vm6, %v7873_v42 }
 0x3b2   :  { %2337 = vmatmul.mubr.bf16.vlgmr.msra.gmra.mrb[132].mxu1 %v7871_v19 }
 0x3b3   :  { %6101 = vmatprep.mubr.msk.bf16.mxu1 %vm2132_vm6, %v7874_v40 }
 0x3ba   :  { %2345 = vmatmul.mubr.bf16.gmra.mrb[136].mxu1 %v7876_v11 }
 0x3bb   :  { %6102 = vmatprep.mubr.msk.bf16.mxu1 %vm2132_vm6, %v7877_v52 }
 0x3c2   :  { %2353 = vmatmul.mubr.bf16.gmra.mrb[140].mxu1 %v7879_v23 }
 0x3c3   :  { %6103 = vmatprep.mubr.msk.bf16.mxu1 %vm2132_vm6, %v7880_v48  ;;  %v7888_v48 = vld [vmem:[%s10138_s7 + $0x50] sm:$0xff]  }
 0x3c4   :  { %7227 = vmatprep.mubr.msk.bf16.mxu0 %vm2535_vm8, %v7888_v48  ;;  %v7905_v48 = vld [vmem:[%s10138_s7 + $0x38] sm:$0xff]  }
 0x3ca   :  { %2361 = vmatmul.mubr.bf16.gmra.mrb[144].mxu1 %v7882_v8 }
 0x3cb   :  { %6104 = vmatprep.mubr.msk.bf16.mxu1 %vm2132_vm6, %v7883_v13 }
 0x3d2   :  { %2369 = vmatmul.mubr.bf16.gmra.mrb[148].mxu1 %v7885_v51 }
 0x3d3   :  { %6105 = vmatprep.mubr.msk.bf16.mxu1 %vm2132_vm6, %v6099_v15 }
 0x3da   :  { %2377 = vmatmul.mubr.bf16.gmra.mrb[152].mxu1 %v6098_v47 }
 0x455   :  { %v2189_v24 = vpop.f32.mrb[108].mxu1 }
 0x456   :  { %v2191_v61 = vpop.f32.mrb[109].mxu1 }
 0x457   :  { %v2192_v44 = vpop.f32.mrb[110].mxu1 }
 0x458   :  { %v2194_v59 = vpop.f32.mrb[111].mxu1 }
 0x45d   :  { %v2197_v56 = vpop.f32.mrb[112].mxu1 }
 0x45e   :  { %v2199_v0 = vpop.f32.mrb[113].mxu1 }
 0x45f   :  { %v2200_v27 = vpop.f32.mrb[114].mxu1  ;;  %v2403_v0 = vld [vmem:[%s10139_s8 + $0x10] sm:$0xff] }
 0x460   :  { %v2202_v25 = vpop.f32.mrb[115].mxu1 }
 0x461   :  { %v2405_v25 = vld [vmem:[%s10139_s8 + $0x20] sm:$0xff] }
 0x465   :  { %v2205_v3 = vpop.f32.mrb[116].mxu1 }
 0x466   :  { %v2207_v58 = vpop.f32.mrb[117].mxu1 }
 0x467   :  { %v2208_v55 = vpop.f32.mrb[118].mxu1  ;;  %v2407_v58 = vld [vmem:[%s10139_s8 + $0x30] sm:$0xff] }
 0x468   :  { %v2210_v18 = vpop.f32.mrb[119].mxu1 }
 0x469   :  { %v2409_v18 = vld [vmem:[%s10139_s8 + $0x40] sm:$0xff] }
 0x46d   :  { %v2213_v31 = vpop.f32.mrb[120].mxu1 }
 0x46e   :  { %v2215_v34 = vpop.f32.mrb[121].mxu1 }
 0x46f   :  { %v2216_v2 = vpop.f32.mrb[122].mxu1  ;;  %v2411_v34 = vld [vmem:[%s10139_s8 + $0x50] sm:$0xff] }
 0x470   :  { %v2218_v9 = vpop.f32.mrb[123].mxu1 }
 0x471   :  { %v2413_v9 = vld [vmem:[%s10139_s8 + $0x60] sm:$0xff] }
 0x475   :  { %v2221_v43 = vpop.f32.mrb[124].mxu1 }
 0x476   :  { %v2223_v4 = vpop.f32.mrb[125].mxu1 }
 0x477   :  { %v2224_v16 = vpop.f32.mrb[126].mxu1  ;;  %v2415_v4 = vld [vmem:[%s10139_s8 + $0x70] sm:$0xff] }
 0x478   :  { %v2226_v5 = vpop.f32.mrb[127].mxu1 }
 0x479   :  { %v2417_v5 = vld [vmem:[%s10139_s8 + $0x80] sm:$0xff] }
 0x47d   :  { %v2229_v57 = vpop.f32.mrb[128].mxu1 }
 0x47e   :  { %v2231_v54 = vpop.f32.mrb[129].mxu1 }
 0x47f   :  { %v2232_v6 = vpop.f32.mrb[130].mxu1  ;;  %v2419_v54 = vld [vmem:[%s10139_s8 + $0x90] sm:$0xff] }
 0x480   :  { %v2233_v12 = vpop.f32.mrb[131].mxu1  ;;  %v2418_v6 = vld [vmem:[%s10139_s8 + $0x88] sm:$0xff] }
 0x481   :  { %v2420_v12 = vld [vmem:[%s10139_s8 + $0x98] sm:$0xff] }
 0x485   :  { %v2338_v37 = vpop.f32.mrb[132].mxu1 }
 0x486   :  { %v2384_v45 = vmax.f32 %v2189_v24, %v2338_v37  ;;  %v2340_v38 = vpop.f32.mrb[133].mxu1 }
 0x487   :  { %v2341_v20 = vpop.f32.mrb[134].mxu1 }
 0x488   :  { %v2385_v17 = vmax.f32 %v2192_v44, %v2341_v20  ;;  %v2343_v41 = vpop.f32.mrb[135].mxu1 }
 0x48a   :  { %v9268_v21 = vpack.c.bf16 %v2385_v17, %v2384_v45 }
 0x48c   :  { %2518 = vrot.lane.b32.xlu0 %v9268_v21, %s8024_s22 }
 0x48d   :  { %v2346_v63 = vpop.f32.mrb[136].mxu1 }
 0x48e   :  { %v2386_v35 = vmax.f32 %v2197_v56, %v2346_v63  ;;  %v2348_v53 = vpop.f32.mrb[137].mxu1  ;;  %v2401_v56 = vld [vmem:[%s10139_s8] sm:$0xff] }
 0x48f   :  { %v2349_v50 = vpop.f32.mrb[138].mxu1  ;;  %v7890_v53 = vld [vmem:[%s10138_s7 + $0x60] sm:$0xff]  }
 0x490   :  { %v2387_v26 = vmax.f32 %v2200_v27, %v2349_v50  ;;  %v2351_v30 = vpop.f32.mrb[139].mxu1  ;;  %v2402_v27 = vld [vmem:[%s10139_s8 + $0x8] sm:$0xff] }
 0x491   :  { %v7891_v50 = vld [vmem:[%s10138_s7 + $0x68] sm:$0xff]   ;;  %v7894_v30 = vld [vmem:[%s10138_s7 + $0x80] sm:$0xff]  }
 0x492   :  { %v9272_v46 = vpack.c.bf16 %v2387_v26, %v2386_v35  ;;  %v7889_v35 = vld [vmem:[%s10138_s7 + $0x58] sm:$0xff]   ;;  %v7892_v26 = vld [vmem:[%s10138_s7 + $0x70] sm:$0xff]  }
 0x494   :  { %2520 = vrot.lane.b32.xlu1 %v9272_v46, %s8024_s22 }
 0x495   :  { %v2354_v62 = vpop.f32.mrb[140].mxu1 }
 0x496   :  { %v2388_v10 = vmax.f32 %v2205_v3, %v2354_v62  ;;  %v2356_v36 = vpop.f32.mrb[141].mxu1  ;;  %v2404_v3 = vld [vmem:[%s10139_s8 + $0x18] sm:$0xff]  ;;  %v7895_v62 = vld [vmem:[%s10138_s7 + $0x88] sm:$0xff]  }
 0x497   :  { %v2357_v39 = vpop.f32.mrb[142].mxu1  ;;  %v7896_v36 = vld [vmem:[%s10138_s7 + $0x90] sm:$0xff]  }
 0x498   :  { %v2389_v29 = vmax.f32 %v2208_v55, %v2357_v39  ;;  %v2359_v28 = vpop.f32.mrb[143].mxu1  ;;  %v2406_v55 = vld [vmem:[%s10139_s8 + $0x28] sm:$0xff]  ;;  %v7897_v39 = vld [vmem:[%s10138_s7 + $0x98] sm:$0xff]  }
 0x499   :  { %v7899_v28 = vld [vmem:[%s10138_s7 + $0x8] sm:$0xff]  }
 0x49a   :  { %v9276_v33 = vpack.c.bf16 %v2389_v29, %v2388_v10  ;;  %v7898_v29 = vld [vmem:[%s10138_s7] sm:$0xff]  }
 0x49c   :  { %2522 = vrot.lane.b32.xlu0 %v9276_v33, %s8024_s22 }
 0x49d   :  { %v2362_v22 = vpop.f32.mrb[144].mxu1 }
 0x49e   :  { %v2390_v32 = vmax.f32 %v2213_v31, %v2362_v22  ;;  %v2364_v49 = vpop.f32.mrb[145].mxu1  ;;  %v2408_v31 = vld [vmem:[%s10139_s8 + $0x38] sm:$0xff] }
 0x49f   :  { %v2365_v14 = vpop.f32.mrb[146].mxu1 }
 0x4a0   :  { %v2391_v42 = vmax.f32 %v2216_v2, %v2365_v14  ;;  %v2367_v19 = vpop.f32.mrb[147].mxu1  ;;  %v2410_v2 = vld [vmem:[%s10139_s8 + $0x48] sm:$0xff]  ;;  %v7902_v14 = vld [vmem:[%s10138_s7 + $0x20] sm:$0xff]  }
 0x4a1   :  { %v7903_v19 = vld [vmem:[%s10138_s7 + $0x28] sm:$0xff]  }
 0x4a2   :  { %v9280_v40 = vpack.c.bf16 %v2391_v42, %v2390_v32  ;;  %v7901_v32 = vld [vmem:[%s10138_s7 + $0x18] sm:$0xff]  }
 0x4a4   :  { %2524 = vrot.lane.b32.xlu1 %v9280_v40, %s8024_s22 }
 0x4a5   :  { %v2370_v11 = vpop.f32.mrb[148].mxu1 }
 0x4a6   :  { %v2392_v52 = vmax.f32 %v2221_v43, %v2370_v11  ;;  %v2372_v23 = vpop.f32.mrb[149].mxu1  ;;  %v2412_v43 = vld [vmem:[%s10139_s8 + $0x58] sm:$0xff]  ;;  %v7904_v11 = vld [vmem:[%s10138_s7 + $0x30] sm:$0xff]  }
 0x4a7   :  { %v2373_v8 = vpop.f32.mrb[150].mxu1 }
 0x4a8   :  { %v2393_v13 = vmax.f32 %v2224_v16, %v2373_v8  ;;  %v2375_v7 = vpop.f32.mrb[151].mxu1  ;;  %v2414_v16 = vld [vmem:[%s10139_s8 + $0x68] sm:$0xff] }
 0x4a9   :  { %v7938_v7 = vld [vmem:[%s10140_s9] sm:$0xff]  }
 0x4aa   :  { %v9288_v51 = vpack.c.bf16 %v2393_v13, %v2392_v52  ;;  %v7906_v13 = vld [vmem:[%s10138_s7 + $0x40] sm:$0xff]   ;;  %7375 = vmatprep.subr.bf16.mxu1 %v7938_v7 }
 0x4ab   :  { %7376 = vmatpush3.bf16.msra.mxu1 %v7938_v7 }
 0x4ac   :  { %2526 = vrot.lane.b32.xlu0 %v9288_v51, %s8024_s22 }
 0x4ad   :  { %v2378_v15 = vpop.f32.mrb[152].mxu1 }
 0x4ae   :  { %v2394_v47 = vmax.f32 %v2229_v57, %v2378_v15  ;;  %v2380_v24 = vpop.f32.mrb[153].mxu1  ;;  %v2416_v57 = vld [vmem:[%s10139_s8 + $0x78] sm:$0xff]  ;;  %v7907_v15 = vld [vmem:[%s10138_s7 + $0x48] sm:$0xff]  }
 0x4af   :  { %v2381_v61 = vpop.f32.mrb[154].mxu1  ;;  %v7909_v24 = vld [vmem:[%s10138_s7 + $0xa8] sm:$0xff]  }
 0x4b0   :  { %v9292_v44 = vpack.c.bf16 %v2394_v47, %v2394_v47  ;;  %2950 = vrot.lane.b32.xlu0 %v9268_v21, %s8026_s28  ;;  %v2382_v59 = vpop.f32.mrb[155].mxu1  ;;  %v7908_v47 = vld [vmem:[%s10138_s7 + $0xa0] sm:$0xff]   ;;  %v7910_v61 = vld [vmem:[%s10138_s7 + $0xb0] sm:$0xff]  }
 0x4b1   :  { %v7911_v59 = vld [vmem:[%s10138_s7 + $0xb8] sm:$0xff]  }
 0x4b2   :  { %2528 = vrot.lane.b32.xlu1 %v9292_v44, %s8024_s22  ;;  %s10165_s22 = smov 124  }
 0x4b4   :  { %2954 = vrot.lane.b32.xlu0 %v9276_v33, %s8026_s28 }
 0x4b6   :  { %2952 = vrot.lane.b32.xlu1 %v9272_v46, %s8026_s28 }
 0x4b8   :  { %2958 = vrot.lane.b32.xlu0 %v9288_v51, %s8026_s28 }
 0x4ba   :  { %2956 = vrot.lane.b32.xlu1 %v9280_v40, %s8026_s28 }
 0x4bc   :  { %3204 = vrot.lane.b32.xlu0 %v9268_v21, %s8027_s20 }
 0x4be   :  { %2960 = vrot.lane.b32.xlu1 %v9292_v44, %s8026_s28 }
 0x4c0   :  { %3208 = vrot.lane.b32.xlu0 %v9276_v33, %s8027_s20 }
 0x4c2   :  { %3206 = vrot.lane.b32.xlu1 %v9272_v46, %s8027_s20 }
 0x4c4   :  { %3212 = vrot.lane.b32.xlu0 %v9288_v51, %s8027_s20 }
 0x4c6   :  { %3210 = vrot.lane.b32.xlu1 %v9280_v40, %s8027_s20 }
 0x4c8   :  { %3458 = vrot.lane.b32.xlu0 %v9268_v21, %s10165_s22 }
 0x4ca   :  { %3214 = vrot.lane.b32.xlu1 %v9292_v44, %s8027_s20 }
 0x4cc   :  { %3462 = vrot.lane.b32.xlu0 %v9276_v33, %s10165_s22 }
 0x4ce   :  { %3460 = vrot.lane.b32.xlu1 %v9272_v46, %s10165_s22 }
 0x4d0   :  { %3466 = vrot.lane.b32.xlu0 %v9288_v51, %s10165_s22 }
 0x4d2   :  { %3464 = vrot.lane.b32.xlu1 %v9280_v40, %s10165_s22 }
 0x4d4   :  { %3643 = vperm.xlu0 %7763, %v2401_v56  }
 0x4d6   :  { %3468 = vrot.lane.b32.xlu1 %v9292_v44, %s10165_s22 }
 0x4d8   :  { %3653 = vperm.xlu0 %7763, %v2403_v0   ;;  %v7912_v0 = vld [vmem:[%s10138_s7 + $0xc0] sm:$0xff]  }
 0x4da   :  { %3648 = vperm.xlu1 %7764, %v2402_v27  }
 0x4dc   :  { %3663 = vperm.xlu0 %7763, %v2405_v25   ;;  %v7913_v25 = vld [vmem:[%s10138_s7 + $0xc8] sm:$0xff]  }
 0x4de   :  { %3658 = vperm.xlu1 %7764, %v2404_v3  }
 0x4e0   :  { %3673 = vperm.xlu0 %7763, %v2407_v58   ;;  %v7914_v58 = vld [vmem:[%s10138_s7 + $0xd0] sm:$0xff]  }
 0x4e2   :  { %3668 = vperm.xlu1 %7764, %v2406_v55  }
 0x4e4   :  { %3683 = vperm.xlu0 %7763, %v2409_v18  }
 0x4e6   :  { %3678 = vperm.xlu1 %7764, %v2408_v31   ;;  %v7915_v31 = vld [vmem:[%s10138_s7 + $0xd8] sm:$0xff]  }
 0x4e8   :  { %3693 = vperm.xlu0 %7763, %v2411_v34  }
 0x4ea   :  { %3688 = vperm.xlu1 %7764, %v2410_v2   ;;  %v7916_v2 = vld [vmem:[%s10138_s7 + $0xe0] sm:$0xff]  }
 0x4ec   :  { %3703 = vperm.xlu0 %7763, %v2413_v9   ;;  %v7917_v9 = vld [vmem:[%s10138_s7 + $0xe8] sm:$0xff]  }
 0x4ee   :  { %3698 = vperm.xlu1 %7764, %v2412_v43   ;;  %v7918_v43 = vld [vmem:[%s10138_s7 + $0xf0] sm:$0xff]  }
 0x4f0   :  { %3713 = vperm.xlu0 %7763, %v2415_v4   ;;  %v7919_v4 = vld [vmem:[%s10138_s7 + $0xf8] sm:$0xff]  }
 0x4f2   :  { %3708 = vperm.xlu1 %7764, %v2414_v16   ;;  %v7920_v16 = vld [vmem:[%s10138_s7 + $0x100] sm:$0xff]  }
 0x4f4   :  { %3723 = vperm.xlu0 %7763, %v2417_v5  }
 0x4f6   :  { %3718 = vperm.xlu1 %7764, %v2416_v57   ;;  %v7921_v57 = vld [vmem:[%s10138_s7 + $0x108] sm:$0xff]  }
 0x4f8   :  { %3733 = vperm.xlu0 %7763, %v2419_v54  }
 0x4fa   :  { %3728 = vperm.xlu1 %7764, %v2418_v6   ;;  %v7922_v6 = vld [vmem:[%s10138_s7 + $0x110] sm:$0xff]  }
 0x4fe   :  { %v2519_v37 = vpop.permute.xlu0 %2518  ;;  %3738 = vperm.xlu1 %7764, %v2420_v12  }
 0x4ff   :  { %7215 = vmatprep.subr.bf16.mxu0 %v2519_v37 }
 0x500   :  { %7216 = vmatpush3.bf16.msra.mxu0 %v2519_v37  ;;  %v7923_v37 = vld [vmem:[%s10138_s7 + $0x118] sm:$0xff]  }
 0x506   :  { %v2521_v45 = vpop.permute.xlu1 %2520 }
 0x507   :  { %7217 = vmatprep.subr.bf16.mxu0 %v2521_v45 }
 0x508   :  { %7218 = vmatpush3.bf16.msra.mxu0 %v2521_v45 }
 0x50e   :  { %v2523_v38 = vpop.permute.xlu0 %2522 }
 0x50f   :  { %7219 = vmatprep.subr.bf16.mxu0 %v2523_v38 }
 0x510   :  { %7220 = vmatpush3.bf16.msra.mxu0 %v2523_v38  ;;  %v7924_v38 = vld [vmem:[%s10138_s7 + $0x120] sm:$0xff]  }
 0x516   :  { %v2525_v20 = vpop.permute.xlu1 %2524 }
 0x517   :  { %7221 = vmatprep.subr.bf16.mxu0 %v2525_v20 }
 0x518   :  { %7222 = vmatpush3.bf16.msra.mxu0 %v2525_v20 }
 0x51e   :  { %v2527_v17 = vpop.permute.xlu0 %2526 }
 0x51f   :  { %7223 = vmatprep.subr.bf16.mxu0 %v2527_v17 }
 0x520   :  { %7224 = vmatpush3.bf16.msra.mxu0 %v2527_v17 }
 0x522   :  { %v2951_v10 = vpop.permute.xlu0 %2950 }
 0x524   :  { %v2529_v41 = vpop.permute.xlu1 %2528 }
 0x525   :  { %v2568_v63 = vsel %vm2566_vm9, %v2529_v41, 0  ;;  %7745 = vmatprep.subr.msk.bf16.mxu0 %vm2566_vm9, %v2529_v41  ;;  %v7925_v41 = vld [vmem:[%s10138_s7 + $0x128] sm:$0xff]  }
 0x526   :  { %7226 = vmatpush3.bf16.msra.mxu0 %v2568_v63  ;;  %v2955_v49 = vpop.permute.xlu0 %2954  ;;  %v7926_v63 = vld [vmem:[%s10138_s7 + $0x130] sm:$0xff]  }
 0x527   :  { %7247 = vmatprep.subr.bf16.mxu0 %v9268_v21 }
 0x528   :  { %v2953_v22 = vpop.permute.xlu1 %2952 }
 0x529   :  { %7228 = vmatmul.mubr.msk.bf16.vlgmr.msra.gmra.mrb[200].mxu0 %vm2535_vm8, %v7889_v35  ;;  %v7927_v35 = vld [vmem:[%s10138_s7 + $0x138] sm:$0xff]  }
 0x52a   :  { %7248 = vmatpush3.bf16.msra.mxu0 %v9268_v21  ;;  %7231 = vmatprep.mubr.msk.bf16.mxu0 %vm2535_vm8, %v7890_v53  ;;  %v7893_v21 = vld [vmem:[%s10138_s7 + $0x78] sm:$0xff]   ;;  %v7928_v53 = vld [vmem:[%s10138_s7 + $0x140] sm:$0xff]  }
 0x52b   :  { %7249 = vmatprep.subr.bf16.mxu0 %v9272_v46 }
 0x52c   :  { %v2957_v42 = vpop.permute.xlu1 %2956 }
 0x52e   :  { %7250 = vmatpush3.bf16.msra.mxu0 %v9272_v46  ;;  %v2764_v46 = vsel %vm2566_vm9, %v9292_v44, 0 }
 0x52f   :  { %7251 = vmatprep.subr.bf16.mxu0 %v9276_v33 }
 0x530   :  { %v2961_v52 = vpop.permute.xlu1 %2960 }
 0x531   :  { %7232 = vmatmul.mubr.msk.bf16.gmra.mrb[204].mxu0 %vm2535_vm8, %v7891_v50  ;;  %v2998_v23 = vsel %vm2566_vm9, %v2961_v52, 0  ;;  %v7929_v50 = vld [vmem:[%s10138_s7 + $0x148] sm:$0xff]  }
 0x532   :  { %7252 = vmatpush3.bf16.msra.mxu0 %v9276_v33  ;;  %7235 = vmatprep.mubr.msk.bf16.mxu0 %vm2535_vm8, %v7892_v26  ;;  %v7900_v33 = vld [vmem:[%s10138_s7 + $0x10] sm:$0xff]  }
 0x533   :  { %7253 = vmatprep.subr.bf16.mxu0 %v9280_v40  ;;  %v7930_v26 = vld [vmem:[%s10138_s7 + $0x150] sm:$0xff]  }
 0x536   :  { %7254 = vmatpush3.bf16.msra.mxu0 %v9280_v40  ;;  %v2959_v40 = vpop.permute.xlu0 %2958 }
 0x537   :  { %7255 = vmatprep.subr.bf16.mxu0 %v9288_v51 }
 0x539   :  { %7236 = vmatmul.mubr.msk.bf16.gmra.mrb[208].mxu0 %vm2535_vm8, %v7893_v21  ;;  %v7931_v21 = vld [vmem:[%s10138_s7 + $0x158] sm:$0xff]  }
 0x53a   :  { %7256 = vmatpush3.bf16.msra.mxu0 %v9288_v51  ;;  %7239 = vmatprep.mubr.msk.bf16.mxu0 %vm2535_vm8, %v7894_v30  ;;  %v3205_v8 = vpop.permute.xlu0 %3204  ;;  %v7939_v51 = vld [vmem:[%s10140_s9 + $0x8] sm:$0xff]   ;;  %v7932_v30 = vld [vmem:[%s10138_s7 + $0x160] sm:$0xff]  }
 0x53b   :  { %7746 = vmatprep.subr.msk.bf16.mxu0 %vm2566_vm9, %v9292_v44  ;;  %7377 = vmatprep.subr.bf16.mxu1 %v7939_v51  ;;  %v3207_v44 = vpop.permute.xlu1 %3206 }
 0x53c   :  { %7378 = vmatpush3.bf16.msra.mxu1 %v7939_v51 }
 0x53e   :  { %7258 = vmatpush3.bf16.msra.mxu0 %v2764_v46  ;;  %v3209_v56 = vpop.permute.xlu0 %3208  ;;  %v7933_v46 = vld [vmem:[%s10138_s7 + $0x168] sm:$0xff]  }
 0x53f   :  { %7279 = vmatprep.subr.bf16.mxu0 %v2951_v10  ;;  %v3211_v27 = vpop.permute.xlu1 %3210 }
 0x541   :  { %7240 = vmatmul.mubr.msk.bf16.gmra.mrb[212].mxu0 %vm2535_vm8, %v7895_v62  ;;  %v7934_v62 = vld [vmem:[%s10138_s7 + $0x170] sm:$0xff]  }
 0x542   :  { %7243 = vmatprep.mubr.msk.bf16.mxu0 %vm2535_vm8, %v7896_v36  ;;  %v3213_v3 = vpop.permute.xlu0 %3212  ;;  %v7936_v36 = vld [vmem:[%s10138_s7 + $0x180] sm:$0xff]  }
 0x543   :  { %v3215_v55 = vpop.permute.xlu1 %3214 }
 0x544   :  { %v3252_v18 = vsel %vm2566_vm9, %v3215_v55, 0 }
 0x546   :  { %v3459_v34 = vpop.permute.xlu0 %3458 }
 0x547   :  { %v3461_v5 = vpop.permute.xlu1 %3460 }
 0x549   :  { %7244 = vmatmul.mubr.msk.bf16.gmra.mrb[216].mxu0 %vm2535_vm8, %v7897_v39  ;;  %v7937_v39 = vld [vmem:[%s10138_s7 + $0x188] sm:$0xff]  }
 0x54a   :  { %7259 = vmatprep.mubr.msk.bf16.mxu0 %vm2535_vm8, %v7898_v29  ;;  %v3463_v54 = vpop.permute.xlu0 %3462  ;;  %v7940_v29 = vld [vmem:[%s10140_s9 + $0x10] sm:$0xff]  }
 0x54b   :  { %v3465_v12 = vpop.permute.xlu1 %3464  ;;  %7379 = vmatprep.subr.bf16.mxu1 %v7940_v29 }
 0x54c   :  { %7380 = vmatpush3.bf16.msra.mxu1 %v7940_v29 }
 0x54e   :  { %v3467_v45 = vpop.permute.xlu0 %3466 }
 0x54f   :  { %v3469_v20 = vpop.permute.xlu1 %3468 }
 0x550   :  { %v3506_v17 = vsel %vm2566_vm9, %v3469_v20, 0 }
 0x551   :  { %7260 = vmatmul.mubr.msk.bf16.vlgmr.msra.gmra.mrb[200].mxu0 %vm2535_vm8, %v7899_v28  ;;  %v7941_v28 = vld [vmem:[%s10140_s9 + $0x18] ss:$0 sps:$4 sm:$0xff]  }
 0x552   :  { %7280 = vmatpush3.bf16.msra.mxu0 %v2951_v10  ;;  %7263 = vmatprep.mubr.msk.bf16.mxu0 %vm2535_vm8, %v7900_v33  ;;  %v7935_v10 = vld [vmem:[%s10138_s7 + $0x178] sm:$0xff]   ;;  %v3878_v33 = vsel %vm2151_vm7, %v7941_v28, 0 }
 0x553   :  { %7281 = vmatprep.subr.bf16.mxu0 %v2953_v22  ;;  %7750 = vmatprep.subr.msk.bf16.mxu1 %vm2151_vm7, %v7941_v28 }
 0x554   :  { %7382 = vmatpush3.bf16.msra.mxu1 %v3878_v33 }
 0x556   :  { %7282 = vmatpush3.bf16.msra.mxu0 %v2953_v22  ;;  %v7942_v22 = vld [vmem:[%s10141_s10] sm:$0xff]  }
 0x557   :  { %7283 = vmatprep.subr.bf16.mxu0 %v2955_v49  ;;  %7403 = vmatprep.subr.bf16.mxu1 %v7942_v22 }
 0x559   :  { %7264 = vmatmul.mubr.msk.bf16.gmra.mrb[204].mxu0 %vm2535_vm8, %v7901_v32  ;;  %v3644_v32 = vpop.permute.xlu0 %3643 }
 0x55a   :  { %7284 = vmatpush3.bf16.msra.mxu0 %v2955_v49  ;;  %7267 = vmatprep.mubr.msk.bf16.mxu0 %vm2535_vm8, %v7902_v14  ;;  %v3649_v49 = vpop.permute.xlu1 %3648 }
 0x55b   :  { %7285 = vmatprep.subr.bf16.mxu0 %v2957_v42 }
 0x55d   :  { %v3654_v14 = vpop.permute.xlu0 %3653 }
 0x55e   :  { %7286 = vmatpush3.bf16.msra.mxu0 %v2957_v42  ;;  %v3659_v42 = vpop.permute.xlu1 %3658 }
 0x55f   :  { %7287 = vmatprep.subr.bf16.mxu0 %v2959_v40 }
 0x561   :  { %7268 = vmatmul.mubr.msk.bf16.gmra.mrb[208].mxu0 %vm2535_vm8, %v7903_v19  ;;  %v3664_v19 = vpop.permute.xlu0 %3663 }
 0x562   :  { %7288 = vmatpush3.bf16.msra.mxu0 %v2959_v40  ;;  %7271 = vmatprep.mubr.msk.bf16.mxu0 %vm2535_vm8, %v7904_v11  ;;  %v3669_v40 = vpop.permute.xlu1 %3668 }
 0x563   :  { %7747 = vmatprep.subr.msk.bf16.mxu0 %vm2566_vm9, %v2961_v52 }
 0x565   :  { %v3674_v11 = vpop.permute.xlu0 %3673 }
 0x566   :  { %7290 = vmatpush3.bf16.msra.mxu0 %v2998_v23  ;;  %v3679_v52 = vpop.permute.xlu1 %3678 }
 0x567   :  { %7311 = vmatprep.subr.bf16.mxu0 %v3205_v8 }
 0x569   :  { %7272 = vmatmul.mubr.msk.bf16.gmra.mrb[212].mxu0 %vm2535_vm8, %v7905_v48 }
 0x56a   :  { %7275 = vmatprep.mubr.msk.bf16.mxu0 %vm2535_vm8, %v7906_v13  ;;  %v3684_v13 = vpop.permute.xlu0 %3683 }
 0x571   :  { %7276 = vmatmul.mubr.msk.bf16.gmra.mrb[216].mxu0 %vm2535_vm8, %v7907_v15 }
 0x572   :  { %7291 = vmatprep.mubr.msk.bf16.mxu0 %vm2535_vm8, %v7908_v47 }
 0x579   :  { %7292 = vmatmul.mubr.msk.bf16.vlgmr.msra.gmra.mrb[200].mxu0 %vm2535_vm8, %v7909_v24  ;;  %v3689_v24 = vpop.permute.xlu1 %3688 }
 0x57a   :  { %7312 = vmatpush3.bf16.msra.mxu0 %v3205_v8  ;;  %7295 = vmatprep.mubr.msk.bf16.mxu0 %vm2535_vm8, %v7910_v61 }
 0x57b   :  { %7313 = vmatprep.subr.bf16.mxu0 %v3207_v44 }
 0x57e   :  { %7314 = vmatpush3.bf16.msra.mxu0 %v3207_v44 }
 0x57f   :  { %7315 = vmatprep.subr.bf16.mxu0 %v3209_v56 }
 0x581   :  { %7296 = vmatmul.mubr.msk.bf16.gmra.mrb[204].mxu0 %vm2535_vm8, %v7911_v59 }
 0x582   :  { %7316 = vmatpush3.bf16.msra.mxu0 %v3209_v56  ;;  %7299 = vmatprep.mubr.msk.bf16.mxu0 %vm2535_vm8, %v7912_v0 }
 0x583   :  { %7317 = vmatprep.subr.bf16.mxu0 %v3211_v27 }
 0x586   :  { %7318 = vmatpush3.bf16.msra.mxu0 %v3211_v27 }
 0x587   :  { %7319 = vmatprep.subr.bf16.mxu0 %v3213_v3 }
 0x589   :  { %7300 = vmatmul.mubr.msk.bf16.gmra.mrb[208].mxu0 %vm2535_vm8, %v7913_v25  ;;  %v3694_v25 = vpop.permute.xlu0 %3693 }
 0x58a   :  { %7320 = vmatpush3.bf16.msra.mxu0 %v3213_v3  ;;  %7303 = vmatprep.mubr.msk.bf16.mxu0 %vm2535_vm8, %v7914_v58 }
 0x58b   :  { %7748 = vmatprep.subr.msk.bf16.mxu0 %vm2566_vm9, %v3215_v55 }
 0x58e   :  { %7322 = vmatpush3.bf16.msra.mxu0 %v3252_v18 }
 0x58f   :  { %7343 = vmatprep.subr.bf16.mxu0 %v3459_v34 }
 0x591   :  { %7304 = vmatmul.mubr.msk.bf16.gmra.mrb[212].mxu0 %vm2535_vm8, %v7915_v31  ;;  %v7943_v31 = vld [vmem:[%s10141_s10 + $0x8] sm:$0xff]  }
 0x592   :  { %7307 = vmatprep.mubr.msk.bf16.mxu0 %vm2535_vm8, %v7916_v2 }
 0x599   :  { %7308 = vmatmul.mubr.msk.bf16.gmra.mrb[216].mxu0 %vm2535_vm8, %v7917_v9 }
 0x59a   :  { %7323 = vmatprep.mubr.msk.bf16.mxu0 %vm2535_vm8, %v7918_v43 }
 0x5a1   :  { %7324 = vmatmul.mubr.msk.bf16.vlgmr.msra.gmra.mrb[200].mxu0 %vm2535_vm8, %v7919_v4 }
 0x5a2   :  { %7344 = vmatpush3.bf16.msra.mxu0 %v3459_v34  ;;  %7327 = vmatprep.mubr.msk.bf16.mxu0 %vm2535_vm8, %v7920_v16  ;;  %v3699_v34 = vpop.permute.xlu1 %3698 }
 0x5a3   :  { %7345 = vmatprep.subr.bf16.mxu0 %v3461_v5 }
 0x5a6   :  { %7346 = vmatpush3.bf16.msra.mxu0 %v3461_v5 }
 0x5a7   :  { %7347 = vmatprep.subr.bf16.mxu0 %v3463_v54 }
 0x5a9   :  { %7328 = vmatmul.mubr.msk.bf16.gmra.mrb[204].mxu0 %vm2535_vm8, %v7921_v57 }
 0x5aa   :  { %7348 = vmatpush3.bf16.msra.mxu0 %v3463_v54  ;;  %7331 = vmatprep.mubr.msk.bf16.mxu0 %vm2535_vm8, %v7922_v6  ;;  %v7944_v54 = vld [vmem:[%s10141_s10 + $0x10] sm:$0xff]   ;;  %v3704_v6 = vpop.permute.xlu0 %3703 }
 0x5ab   :  { %7349 = vmatprep.subr.bf16.mxu0 %v3465_v12 }
 0x5ae   :  { %7350 = vmatpush3.bf16.msra.mxu0 %v3465_v12 }
 0x5af   :  { %7351 = vmatprep.subr.bf16.mxu0 %v3467_v45 }
 0x5b1   :  { %7332 = vmatmul.mubr.msk.bf16.gmra.mrb[208].mxu0 %vm2535_vm8, %v7923_v37 }
 0x5b2   :  { %7352 = vmatpush3.bf16.msra.mxu0 %v3467_v45  ;;  %7335 = vmatprep.mubr.msk.bf16.mxu0 %vm2535_vm8, %v7924_v38  ;;  %v3709_v38 = vpop.permute.xlu1 %3708 }
 0x5b3   :  { %7749 = vmatprep.subr.msk.bf16.mxu0 %vm2566_vm9, %v3469_v20 }
 0x5b6   :  { %7354 = vmatpush3.bf16.msra.mxu0 %v3506_v17 }
 0x5b9   :  { %7336 = vmatmul.mubr.msk.bf16.gmra.mrb[212].mxu0 %vm2535_vm8, %v7925_v41 }
 0x5ba   :  { %7339 = vmatprep.mubr.msk.bf16.mxu0 %vm2535_vm8, %v7926_v63 }
 0x5c1   :  { %7340 = vmatmul.mubr.msk.bf16.gmra.mrb[216].mxu0 %vm2535_vm8, %v7927_v35  ;;  %v7945_v35 = vld [vmem:[%s10141_s10 + $0x18] ss:$0 sps:$4 sm:$0xff]   ;;  %s8032_s10 = smov 112  }
 0x5c2   :  { %7355 = vmatprep.mubr.msk.bf16.mxu0 %vm2535_vm8, %v7928_v53 }
 0x5c9   :  { %7356 = vmatmul.mubr.msk.bf16.vlgmr.msra.gmra.mrb[200].mxu0 %vm2535_vm8, %v7929_v50 }
 0x5ca   :  { %7359 = vmatprep.mubr.msk.bf16.mxu0 %vm2535_vm8, %v7930_v26 }
 0x5d1   :  { %7360 = vmatmul.mubr.msk.bf16.gmra.mrb[204].mxu0 %vm2535_vm8, %v7931_v21 }
 0x5d2   :  { %7363 = vmatprep.mubr.msk.bf16.mxu0 %vm2535_vm8, %v7932_v30  ;;  %v3714_v30 = vpop.permute.xlu0 %3713 }
 0x5d9   :  { %7364 = vmatmul.mubr.msk.bf16.gmra.mrb[208].mxu0 %vm2535_vm8, %v7933_v46 }
 0x5da   :  { %7367 = vmatprep.mubr.msk.bf16.mxu0 %vm2535_vm8, %v7934_v62 }
 0x5e1   :  { %7368 = vmatmul.mubr.msk.bf16.gmra.mrb[212].mxu0 %vm2535_vm8, %v7935_v10 }
 0x5e2   :  { %7371 = vmatprep.mubr.msk.bf16.mxu0 %vm2535_vm8, %v7936_v36  ;;  %v4015_v36 = vsel %vm2151_vm7, %v7945_v35, 0 }
 0x5e9   :  { %7372 = vmatmul.mubr.msk.bf16.gmra.mrb[216].mxu0 %vm2535_vm8, %v7937_v39  ;;  %v3719_v39 = vpop.permute.xlu1 %3718 }
 0x69c   :  { %v7357_v23 = vpop.f32.mrb[200].mxu0 }
 0x69d   :  { %v3743_v48 = vadd.f32 %v7357_v23, %v3654_v14  ;;  %v3542_v8 = vpop.f32.mrb[201].mxu0  ;;  %v3729_v23 = vpop.permute.xlu1 %3728 }
 0x69e   :  { %v3741_v7 = vadd.f32 %v3644_v32, %v3542_v8  ;;  %v7358_v51 = vpop.f32.mrb[202].mxu0 }
 0x69f   :  { %v3744_v15 = vadd.f32 %v7358_v51, %v3659_v42  ;;  %v3545_v47 = vpop.f32.mrb[203].mxu0  ;;  %v3763_v44 = vmax.f32 %v3743_v48, 0.0  ;;  %v3724_v42 = vpop.permute.xlu0 %3723 }
 0x6a0   :  { %v3742_v61 = vadd.f32 %v3649_v49, %v3545_v47  ;;  %v3761_v56 = vmax.f32 %v3741_v7, 0.0 }
 0x6a1   :  { %v3764_v59 = vmax.f32 %v3744_v15, 0.0 }
 0x6a2   :  { %v3762_v0 = vmax.f32 %v3742_v61, 0.0 }
 0x6a3   :  { %v9627_v27 = vpack.c.bf16 %v3764_v59, %v3763_v44  ;;  %v3734_v47 = vpop.permute.xlu0 %3733 }
 0x6a4   :  { %v9629_v3 = vpack.c.bf16 %v3762_v0, %v3761_v56  ;;  %v7361_v58 = vpop.f32.mrb[204].mxu0  ;;  %v3739_v56 = vpop.permute.xlu1 %3738 }
 0x6a5   :  { %v3747_v55 = vadd.f32 %v7361_v58, %v3674_v11  ;;  %v3558_v18 = vpop.f32.mrb[205].mxu0 }
 0x6a6   :  { %v3745_v2 = vadd.f32 %v3664_v19, %v3558_v18  ;;  %v7362_v9 = vpop.f32.mrb[206].mxu0  ;;  %7383 = vmatprep.mubr.msk.bf16.mxu1 %vm3846_vm10, %v9629_v3 }
 0x6a7   :  { %v3748_v43 = vadd.f32 %v7362_v9, %v3679_v52  ;;  %v3561_v4 = vpop.f32.mrb[207].mxu0  ;;  %7384 = vmatmul.mubr.msk.bf16.vlgmr.msra.gmra.mrb[156].mxu1 %vm3846_vm10, %v9627_v27  ;;  %v3767_v5 = vmax.f32 %v3747_v55, 0.0 }
 0x6a8   :  { %v3746_v16 = vadd.f32 %v3669_v40, %v3561_v4  ;;  %7404 = vmatpush3.bf16.msra.mxu1 %v7942_v22  ;;  %v3765_v12 = vmax.f32 %v3745_v2, 0.0 }
 0x6a9   :  { %v3768_v57 = vmax.f32 %v3748_v43, 0.0  ;;  %7405 = vmatprep.subr.bf16.mxu1 %v7943_v31 }
 0x6aa   :  { %v3766_v37 = vmax.f32 %v3746_v16, 0.0 }
 0x6ab   :  { %v9641_v45 = vpack.c.bf16 %v3768_v57, %v3767_v5 }
 0x6ac   :  { %v9643_v20 = vpack.c.bf16 %v3766_v37, %v3765_v12  ;;  %v7365_v17 = vpop.f32.mrb[208].mxu0  ;;  %7406 = vmatpush3.bf16.msra.mxu1 %v7943_v31 }
 0x6ad   :  { %v3751_v41 = vadd.f32 %v7365_v17, %v3694_v25  ;;  %v3574_v63 = vpop.f32.mrb[209].mxu0  ;;  %7407 = vmatprep.subr.bf16.mxu1 %v7944_v54 }
 0x6ae   :  { %v3749_v53 = vadd.f32 %v3684_v13, %v3574_v63  ;;  %v7366_v50 = vpop.f32.mrb[210].mxu0  ;;  %7387 = vmatprep.mubr.msk.bf16.mxu1 %vm3846_vm10, %v9643_v20 }
 0x6af   :  { %v3752_v26 = vadd.f32 %v7366_v50, %v3699_v34  ;;  %v3577_v21 = vpop.f32.mrb[211].mxu0  ;;  %7388 = vmatmul.mubr.msk.bf16.gmra.mrb[160].mxu1 %vm3846_vm10, %v9641_v45  ;;  %v3771_v62 = vmax.f32 %v3751_v41, 0.0 }
 0x6b0   :  { %v3750_v46 = vadd.f32 %v3689_v24, %v3577_v21  ;;  %7408 = vmatpush3.bf16.msra.mxu1 %v7944_v54  ;;  %v3769_v29 = vmax.f32 %v3749_v53, 0.0 }
 0x6b1   :  { %v3772_v10 = vmax.f32 %v3752_v26, 0.0  ;;  %7751 = vmatprep.subr.msk.bf16.mxu1 %vm2151_vm7, %v7945_v35 }
 0x6b2   :  { %v3770_v28 = vmax.f32 %v3750_v46, 0.0 }
 0x6b3   :  { %v3786_v33 = vpack.c.bf16 %v3772_v10, %v3771_v62 }
 0x6b4   :  { %v3785_v22 = vpack.c.bf16 %v3770_v28, %v3769_v29  ;;  %v7369_v32 = vpop.f32.mrb[212].mxu0  ;;  %7410 = vmatpush3.bf16.msra.mxu1 %v4015_v36 }
 0x6b5   :  { %v3755_v49 = vadd.f32 %v7369_v32, %v3714_v30  ;;  %v3590_v14 = vpop.f32.mrb[213].mxu0  ;;  %4221 = vmatprep.subr.bf16.mxu1 %v8029_v60 }
 0x6b6   :  { %v3753_v19 = vadd.f32 %v3704_v6, %v3590_v14  ;;  %v7370_v40 = vpop.f32.mrb[214].mxu0  ;;  %7391 = vmatprep.mubr.msk.bf16.mxu1 %vm3846_vm10, %v3785_v22 }
 0x6b7   :  { %v3756_v11 = vadd.f32 %v7370_v40, %v3719_v39  ;;  %v3593_v52 = vpop.f32.mrb[215].mxu0  ;;  %7392 = vmatmul.mubr.msk.bf16.gmra.mrb[164].mxu1 %vm3846_vm10, %v3786_v33  ;;  %v3775_v8 = vmax.f32 %v3755_v49, 0.0 }
 0x6b8   :  { %v3754_v48 = vadd.f32 %v3709_v38, %v3593_v52  ;;  %v3773_v7 = vmax.f32 %v3753_v19, 0.0 }
 0x6b9   :  { %v3776_v13 = vmax.f32 %v3756_v11, 0.0 }
 0x6ba   :  { %v3774_v51 = vmax.f32 %v3754_v48, 0.0 }
 0x6bb   :  { %v3788_v15 = vpack.c.bf16 %v3776_v13, %v3775_v8 }
 0x6bc   :  { %v3787_v24 = vpack.c.bf16 %v3774_v51, %v3773_v7  ;;  %v7373_v61 = vpop.f32.mrb[216].mxu0 }
 0x6bd   :  { %v3759_v44 = vadd.f32 %v7373_v61, %v3734_v47  ;;  %v3606_v59 = vpop.f32.mrb[217].mxu0 }
 0x6be   :  { %v3757_v0 = vadd.f32 %v3724_v42, %v3606_v59  ;;  %v7374_v25 = vpop.f32.mrb[218].mxu0  ;;  %7395 = vmatprep.mubr.msk.bf16.mxu1 %vm3846_vm10, %v3787_v24 }
 0x6bf   :  { %v3760_v58 = vadd.f32 %v7374_v25, %v3739_v56  ;;  %v3609_v55 = vpop.f32.mrb[219].mxu0  ;;  %7396 = vmatmul.mubr.msk.bf16.gmra.mrb[168].mxu1 %vm3846_vm10, %v3788_v15  ;;  %v3779_v31 = vmax.f32 %v3759_v44, 0.0 }
 0x6c0   :  { %v3758_v18 = vadd.f32 %v3729_v23, %v3609_v55  ;;  %v3777_v2 = vmax.f32 %v3757_v0, 0.0 }
 0x6c1   :  { %v3780_v34 = vmax.f32 %v3760_v58, 0.0 }
 0x6c2   :  { %v3778_v9 = vmax.f32 %v3758_v18, 0.0 }
 0x6c3   :  { %v3790_v43 = vpack.c.bf16 %v3780_v34, %v3779_v31 }
 0x6c4   :  { %v3789_v4 = vpack.c.bf16 %v3778_v9, %v3777_v2 }
 0x6c6   :  { %7399 = vmatprep.mubr.msk.bf16.mxu1 %vm3846_vm10, %v3789_v4 }
 0x6c7   :  { %7400 = vmatmul.mubr.msk.bf16.gmra.mrb[172].mxu1 %vm3846_vm10, %v3790_v43 }
 0x6c8   :  { %7411 = vmatprep.mubr.msk.bf16.mxu1 %vm3846_vm10, %v9629_v3 }
 0x6cf   :  { %7412 = vmatmul.mubr.msk.bf16.vlgmr.msra.gmra.mrb[176].mxu1 %vm3846_vm10, %v9627_v27  ;;  %v7948_v27 = vld [vmem:[%s10142_s11 + $0x4] ss:$8 sps:$4 sm:$0xff]  }
 0x6d0   :  { %7415 = vmatprep.mubr.msk.bf16.mxu1 %vm3846_vm10, %v9643_v20 }
 0x6d7   :  { %7416 = vmatmul.mubr.msk.bf16.gmra.mrb[180].mxu1 %vm3846_vm10, %v9641_v45 }
 0x6d8   :  { %7419 = vmatprep.mubr.msk.bf16.mxu1 %vm3846_vm10, %v3785_v22 }
 0x6df   :  { %7420 = vmatmul.mubr.msk.bf16.gmra.mrb[184].mxu1 %vm3846_vm10, %v3786_v33 }
 0x6e0   :  { %7423 = vmatprep.mubr.msk.bf16.mxu1 %vm3846_vm10, %v3787_v24 }
 0x6e7   :  { %7424 = vmatmul.mubr.msk.bf16.gmra.mrb[188].mxu1 %vm3846_vm10, %v3788_v15 }
 0x6e8   :  { %7427 = vmatprep.mubr.msk.bf16.mxu1 %vm3846_vm10, %v3789_v4 }
 0x6ef   :  { %7428 = vmatmul.mubr.msk.bf16.gmra.mrb[192].mxu1 %vm3846_vm10, %v3790_v43 }
 0x6f0   :  { %6324 = vmatprep.mubr.msk.bf16.mxu1 %vm4205_vm11, %v7948_v27 }
 0x77a   :  { %v7385_v3 = vpop.f32.mrb[156].mxu1 }
 0x77b   :  { %v3914_v16 = vpop.f32.mrb[157].mxu1 }
 0x77c   :  { %v7386_v5 = vpop.f32.mrb[158].mxu1 }
 0x77d   :  { %v3917_v57 = vpop.f32.mrb[159].mxu1 }
 0x782   :  { %v7389_v54 = vpop.f32.mrb[160].mxu1 }
 0x783   :  { %v3930_v6 = vpop.f32.mrb[161].mxu1 }
 0x784   :  { %v7390_v12 = vpop.f32.mrb[162].mxu1 }
 0x785   :  { %v3933_v37 = vpop.f32.mrb[163].mxu1 }
 0x78a   :  { %v7393_v45 = vpop.f32.mrb[164].mxu1 }
 0x78b   :  { %v3946_v38 = vpop.f32.mrb[165].mxu1 }
 0x78c   :  { %v7394_v20 = vpop.f32.mrb[166].mxu1 }
 0x78d   :  { %v3949_v17 = vpop.f32.mrb[167].mxu1 }
 0x792   :  { %v7397_v41 = vpop.f32.mrb[168].mxu1 }
 0x793   :  { %v3962_v63 = vpop.f32.mrb[169].mxu1 }
 0x794   :  { %v7398_v35 = vpop.f32.mrb[170].mxu1 }
 0x795   :  { %v3965_v53 = vpop.f32.mrb[171].mxu1 }
 0x79a   :  { %v9679_v50 = vpop.f32.mrb[172].mxu1 }
 0x79b   :  { %v9681_v26 = vpop.f32.mrb[173].mxu1 }
 0x79c   :  { %v9683_v21 = vpop.f32.mrb[174].mxu1 }
 0x79d   :  { %v9685_v30 = vpop.f32.mrb[175].mxu1 }
 0x7a2   :  { %v7413_v46 = vpop.f32.mrb[176].mxu1 }
 0x7a3   :  { %v4132_v62 = vmax.f32 %v7385_v3, %v7413_v46  ;;  %v4051_v10 = vpop.f32.mrb[177].mxu1  ;;  %v7966_v46 = vld [vmem:[%s10143_s12 + $0x10] ss:$8 sps:$4 sm:$0xff]  }
 0x7a4   :  { %v4130_v36 = vmax.f32 %v3914_v16, %v4051_v10  ;;  %v7414_v39 = vpop.f32.mrb[178].mxu1  ;;  %v7970_v10 = vld [vmem:[%s10143_s12 + $0x34] ss:$8 sps:$4 sm:$0xff]  }
 0x7a5   :  { %v4133_v29 = vmax.f32 %v7386_v5, %v7414_v39  ;;  %v4054_v28 = vpop.f32.mrb[179].mxu1  ;;  %v7973_v39 = vld [vmem:[%s10143_s12 + $0x44] ss:$8 sps:$4 sm:$0xff]  }
 0x7a6   :  { %v4131_v33 = vmax.f32 %v3917_v57, %v4054_v28 }
 0x7a7   :  { %v9687_v22 = vpack.c.bf16 %v4133_v29, %v4132_v62  ;;  %v7969_v62 = vld [vmem:[%s10143_s12 + $0x20] ss:$8 sps:$4 sm:$0xff]  }
 0x7a8   :  { %v9689_v32 = vpack.c.bf16 %v4131_v33, %v4130_v36  ;;  %v7972_v36 = vld [vmem:[%s10143_s12 + $0x30] ss:$8 sps:$4 sm:$0xff]   ;;  %v7975_v29 = vld [vmem:[%s10143_s12 + $0x40] ss:$8 sps:$4 sm:$0xff]  }
 0x7aa   :  { %v7417_v49 = vpop.f32.mrb[180].mxu1  ;;  %4222 = vmatpush1.bf16.msra.mxu1 %v9689_v32 }
 0x7ab   :  { %v4136_v14 = vmax.f32 %v7389_v54, %v7417_v49  ;;  %v4067_v42 = vpop.f32.mrb[181].mxu1  ;;  %4223 = vmatprep.subr.bf16.mxu1 %v8029_v60 }
 0x7ac   :  { %v4134_v19 = vmax.f32 %v3930_v6, %v4067_v42  ;;  %v7418_v40 = vpop.f32.mrb[182].mxu1 }
 0x7ad   :  { %v4137_v11 = vmax.f32 %v7390_v12, %v7418_v40  ;;  %v4070_v52 = vpop.f32.mrb[183].mxu1 }
 0x7ae   :  { %v4135_v23 = vmax.f32 %v3933_v37, %v4070_v52  ;;  %4224 = vmatpush1.bf16.msra.mxu1 %v9687_v22 }
 0x7af   :  { %v9694_v48 = vpack.c.bf16 %v4137_v11, %v4136_v14  ;;  %4225 = vmatprep.subr.bf16.mxu1 %v8029_v60 }
 0x7b0   :  { %v4152_v8 = vpack.c.bf16 %v4135_v23, %v4134_v19 }
 0x7b2   :  { %v7421_v13 = vpop.f32.mrb[184].mxu1  ;;  %4226 = vmatpush1.bf16.msra.mxu1 %v4152_v8 }
 0x7b3   :  { %v4140_v7 = vmax.f32 %v7393_v45, %v7421_v13  ;;  %v4083_v51 = vpop.f32.mrb[185].mxu1  ;;  %4227 = vmatprep.subr.bf16.mxu1 %v8029_v60  ;;  %v7946_v45 = vld [vmem:[%s10142_s11] ss:$8 sps:$4 sm:$0xff]  }
 0x7b4   :  { %v4138_v15 = vmax.f32 %v3946_v38, %v4083_v51  ;;  %v7422_v47 = vpop.f32.mrb[186].mxu1  ;;  %v7949_v38 = vld [vmem:[%s10142_s11 + $0x14] ss:$8 sps:$4 sm:$0xff]  }
 0x7b5   :  { %v4141_v24 = vmax.f32 %v7394_v20, %v7422_v47  ;;  %v4086_v61 = vpop.f32.mrb[187].mxu1  ;;  %v7951_v20 = vld [vmem:[%s10142_s11 + $0x10] ss:$8 sps:$4 sm:$0xff]  }
 0x7b6   :  { %v4139_v44 = vmax.f32 %v3949_v17, %v4086_v61  ;;  %4228 = vmatpush1.bf16.msra.mxu1 %v9694_v48  ;;  %v7952_v17 = vld [vmem:[%s10142_s11 + $0x24] ss:$8 sps:$4 sm:$0xff]  }
 0x7b7   :  { %v4155_v59 = vpack.c.bf16 %v4141_v24, %v4140_v7  ;;  %4229 = vmatprep.subr.bf16.mxu1 %v8029_v60 }
 0x7b8   :  { %v4154_v56 = vpack.c.bf16 %v4139_v44, %v4138_v15 }
 0x7ba   :  { %v7425_v0 = vpop.f32.mrb[188].mxu1  ;;  %4230 = vmatpush1.bf16.msra.mxu1 %v4154_v56 }
 0x7bb   :  { %v4144_v25 = vmax.f32 %v7397_v41, %v7425_v0  ;;  %v4099_v58 = vpop.f32.mrb[189].mxu1  ;;  %4231 = vmatprep.subr.bf16.mxu1 %v8029_v60  ;;  %v7954_v41 = vld [vmem:[%s10142_s11 + $0x20] ss:$8 sps:$4 sm:$0xff]  }
 0x7bc   :  { %v4142_v55 = vmax.f32 %v3962_v63, %v4099_v58  ;;  %v7426_v18 = vpop.f32.mrb[190].mxu1  ;;  %v7955_v63 = vld [vmem:[%s10142_s11 + $0x34] ss:$8 sps:$4 sm:$0xff]  }
 0x7bd   :  { %v4145_v31 = vmax.f32 %v7398_v35, %v7426_v18  ;;  %v4102_v34 = vpop.f32.mrb[191].mxu1  ;;  %v7957_v35 = vld [vmem:[%s10142_s11 + $0x30] ss:$8 sps:$4 sm:$0xff]  }
 0x7be   :  { %v4143_v2 = vmax.f32 %v3965_v53, %v4102_v34  ;;  %4232 = vmatpush1.bf16.msra.mxu1 %v4155_v59  ;;  %v7958_v53 = vld [vmem:[%s10142_s11 + $0x44] ss:$8 sps:$4 sm:$0xff]  }
 0x7bf   :  { %v4157_v9 = vpack.c.bf16 %v4145_v31, %v4144_v25  ;;  %4233 = vmatprep.subr.bf16.mxu1 %v8029_v60 }
 0x7c0   :  { %v4156_v43 = vpack.c.bf16 %v4143_v2, %v4142_v55 }
 0x7c2   :  { %v7429_v4 = vpop.f32.mrb[192].mxu1  ;;  %4234 = vmatpush1.bf16.msra.mxu1 %v4156_v43 }
 0x7c3   :  { %v4148_v27 = vmax.f32 %v9679_v50, %v7429_v4  ;;  %v4115_v3 = vpop.f32.mrb[193].mxu1  ;;  %4235 = vmatprep.subr.bf16.mxu1 %v8029_v60  ;;  %v7960_v50 = vld [vmem:[%s10142_s11 + $0x40] ss:$8 sps:$4 sm:$0xff]  }
 0x7c4   :  { %v4146_v16 = vmax.f32 %v9681_v26, %v4115_v3  ;;  %v7430_v5 = vpop.f32.mrb[194].mxu1  ;;  %v7963_v26 = vld [vmem:[%s10143_s12 + $0x4] ss:$8 sps:$4 sm:$0xff]  }
 0x7c5   :  { %v4149_v57 = vmax.f32 %v9683_v21, %v7430_v5  ;;  %v4118_v54 = vpop.f32.mrb[195].mxu1  ;;  %v7961_v21 = vld [vmem:[%s10143_s12] ss:$8 sps:$4 sm:$0xff]  }
 0x7c6   :  { %v4147_v6 = vmax.f32 %v9685_v30, %v4118_v54  ;;  %4236 = vmatpush1.bf16.msra.mxu1 %v4157_v9  ;;  %v7964_v30 = vld [vmem:[%s10143_s12 + $0x14] ss:$8 sps:$4 sm:$0xff]  }
 0x7c7   :  { %v4159_v12 = vpack.c.bf16 %v4149_v57, %v4148_v27  ;;  %4237 = vmatprep.subr.bf16.mxu1 %v8029_v60 }
 0x7c8   :  { %v4158_v37 = vpack.c.bf16 %v4147_v6, %v4146_v16 }
 0x7ca   :  { %4238 = vmatpush1.bf16.msra.mxu1 %v4158_v37 }
 0x7cb   :  { %4239 = vmatprep.subr.bf16.mxu1 %v8029_v60 }
 0x7ce   :  { %4240 = vmatpush1.bf16.msra.mxu1 %v4159_v12 }
 0x7cf   :  { %4354 = vmatprep.subr.bf16.mxu1 %v8029_v60 }
 0x7d1   :  { %4254 = vmatmul.mubr.bf16.vlgmr.msra.gmra.mrb[196].mxu1 %v7946_v45 }
 0x7d2   :  { %4355 = vmatpush1.bf16.msra.mxu1 %v9689_v32  ;;  %6325 = vmatprep.mubr.msk.bf16.mxu1 %vm4205_vm11, %v7949_v38 }
 0x7d3   :  { %4356 = vmatprep.subr.bf16.mxu1 %v8029_v60 }
 0x7d6   :  { %4357 = vmatpush1.bf16.msra.mxu1 %v9687_v22 }
 0x7d7   :  { %4358 = vmatprep.subr.bf16.mxu1 %v8029_v60 }
 0x7d9   :  { %4262 = vmatmul.mubr.bf16.gmra.mrb[200].mxu1 %v7951_v20 }
 0x7da   :  { %4359 = vmatpush1.bf16.msra.mxu1 %v4152_v8  ;;  %6326 = vmatprep.mubr.msk.bf16.mxu1 %vm4205_vm11, %v7952_v17  ;;  %v7976_v17 = vld [vmem:[%s10144_s13 + $0x3c] sm:$0xff]  }
 0x7db   :  { %4360 = vmatprep.subr.bf16.mxu1 %v8029_v60 }
 0x7de   :  { %4361 = vmatpush1.bf16.msra.mxu1 %v9694_v48 }
 0x7df   :  { %4362 = vmatprep.subr.bf16.mxu1 %v8029_v60 }
 0x7e1   :  { %4270 = vmatmul.mubr.bf16.gmra.mrb[204].mxu1 %v7954_v41 }
 0x7e2   :  { %4363 = vmatpush1.bf16.msra.mxu1 %v4154_v56  ;;  %6327 = vmatprep.mubr.msk.bf16.mxu1 %vm4205_vm11, %v7955_v63 }
 0x7e3   :  { %4364 = vmatprep.subr.bf16.mxu1 %v8029_v60 }
 0x7e6   :  { %4365 = vmatpush1.bf16.msra.mxu1 %v4155_v59 }
 0x7e7   :  { %4366 = vmatprep.subr.bf16.mxu1 %v8029_v60 }
 0x7e9   :  { %4278 = vmatmul.mubr.bf16.gmra.mrb[208].mxu1 %v7957_v35 }
 0x7ea   :  { %4367 = vmatpush1.bf16.msra.mxu1 %v4156_v43  ;;  %6328 = vmatprep.mubr.msk.bf16.mxu1 %vm4205_vm11, %v7958_v53 }
 0x7eb   :  { %4368 = vmatprep.subr.bf16.mxu1 %v8029_v60 }
 0x7ee   :  { %4369 = vmatpush1.bf16.msra.mxu1 %v4157_v9 }
 0x7ef   :  { %4370 = vmatprep.subr.bf16.mxu1 %v8029_v60 }
 0x7f1   :  { %4286 = vmatmul.mubr.bf16.gmra.mrb[212].mxu1 %v7960_v50 }
 0x7f2   :  { %4371 = vmatpush1.bf16.msra.mxu1 %v4158_v37  ;;  %6339 = vmatprep.mubr.msk.bf16.mxu1 %vm4205_vm11, %v7963_v26 }
 0x7f3   :  { %4372 = vmatprep.subr.bf16.mxu1 %v8029_v60  ;;  %v7967_v60 = vld [vmem:[%s10143_s12 + $0x24] ss:$8 sps:$4 sm:$0xff]  }
 0x7f6   :  { %4373 = vmatpush1.bf16.msra.mxu1 %v4159_v12 }
 0x7f9   :  { %4387 = vmatmul.mubr.bf16.vlgmr.msra.gmra.mrb[216].mxu1 %v7961_v21 }
 0x7fa   :  { %6340 = vmatprep.mubr.msk.bf16.mxu1 %vm4205_vm11, %v7964_v30 }
 0x801   :  { %4395 = vmatmul.mubr.bf16.gmra.mrb[220].mxu1 %v7966_v46  ;;  %v5423_v46 = vld [vmem:[%s10145_s14 + $0x8] sm:$0xff] }
 0x802   :  { %6341 = vmatprep.mubr.msk.bf16.mxu1 %vm4205_vm11, %v7967_v60  ;;  %v5425_v60 = vld [vmem:[%s10145_s14 + $0x18] sm:$0xff] }
 0x809   :  { %4403 = vmatmul.mubr.bf16.gmra.mrb[224].mxu1 %v7969_v62  ;;  %v5422_v62 = vld [vmem:[%s10145_s14] sm:$0xff] }
 0x80a   :  { %6342 = vmatprep.mubr.msk.bf16.mxu1 %vm4205_vm11, %v7970_v10  ;;  %v5427_v10 = vld [vmem:[%s10145_s14 + $0x28] sm:$0xff] }
 0x811   :  { %4411 = vmatmul.mubr.bf16.gmra.mrb[228].mxu1 %v7972_v36  ;;  %v5424_v36 = vld [vmem:[%s10145_s14 + $0x10] sm:$0xff] }
 0x812   :  { %6343 = vmatprep.mubr.msk.bf16.mxu1 %vm4205_vm11, %v7973_v39  ;;  %v5429_v39 = vld [vmem:[%s10145_s14 + $0x38] sm:$0xff] }
 0x819   :  { %4419 = vmatmul.mubr.bf16.gmra.mrb[232].mxu1 %v7975_v29  ;;  %v5426_v29 = vld [vmem:[%s10145_s14 + $0x20] sm:$0xff] }
 0x81a   :  { %7441 = vmatprep.mubr.msk.bf16.mxu1 %vm4531_vm12, %v7976_v17  ;;  %v7992_v17 = vld [vmem:[%s10144_s13 + $0x78] sm:$0xff]  }
 0x8a4   :  { %v4255_v28 = vpop.f32.mrb[196].mxu1 }
 0x8a5   :  { %v4257_v33 = vpop.f32.mrb[197].mxu1 }
 0x8a6   :  { %v4258_v22 = vpop.f32.mrb[198].mxu1  ;;  %v5428_v33 = vld [vmem:[%s10145_s14 + $0x30] sm:$0xff] }
 0x8a7   :  { %v4260_v32 = vpop.f32.mrb[199].mxu1 }
 0x8a8   :  { %v5430_v32 = vld [vmem:[%s10145_s14 + $0x40] sm:$0xff] }
 0x8ac   :  { %v4263_v49 = vpop.f32.mrb[200].mxu1 }
 0x8ad   :  { %v4265_v14 = vpop.f32.mrb[201].mxu1 }
 0x8ae   :  { %v4266_v42 = vpop.f32.mrb[202].mxu1  ;;  %v5432_v14 = vld [vmem:[%s10145_s14 + $0x50] sm:$0xff] }
 0x8af   :  { %v4268_v19 = vpop.f32.mrb[203].mxu1 }
 0x8b0   :  { %v5434_v19 = vld [vmem:[%s10145_s14 + $0x60] sm:$0xff] }
 0x8b4   :  { %v4271_v40 = vpop.f32.mrb[204].mxu1 }
 0x8b5   :  { %v4273_v11 = vpop.f32.mrb[205].mxu1 }
 0x8b6   :  { %v4274_v52 = vpop.f32.mrb[206].mxu1  ;;  %v5436_v11 = vld [vmem:[%s10145_s14 + $0x70] sm:$0xff] }
 0x8b7   :  { %v4276_v23 = vpop.f32.mrb[207].mxu1 }
 0x8b8   :  { %v5562_v23 = vld [vmem:[%s10146_s16 + $0x8] sm:$0xff] }
 0x8bc   :  { %v4279_v48 = vpop.f32.mrb[208].mxu1 }
 0x8bd   :  { %v4281_v8 = vpop.f32.mrb[209].mxu1 }
 0x8be   :  { %v4282_v13 = vpop.f32.mrb[210].mxu1  ;;  %v5564_v8 = vld [vmem:[%s10146_s16 + $0x18] sm:$0xff] }
 0x8bf   :  { %v4284_v7 = vpop.f32.mrb[211].mxu1 }
 0x8c0   :  { %v5566_v7 = vld [vmem:[%s10146_s16 + $0x28] sm:$0xff] }
 0x8c4   :  { %v4287_v51 = vpop.f32.mrb[212].mxu1 }
 0x8c5   :  { %v4289_v15 = vpop.f32.mrb[213].mxu1 }
 0x8c6   :  { %v4290_v47 = vpop.f32.mrb[214].mxu1  ;;  %v5568_v15 = vld [vmem:[%s10146_s16 + $0x38] sm:$0xff] }
 0x8c7   :  { %v4292_v24 = vpop.f32.mrb[215].mxu1 }
 0x8c8   :  { %v5570_v24 = vld [vmem:[%s10146_s16 + $0x48] sm:$0xff] }
 0x8cc   :  { %v4388_v61 = vpop.f32.mrb[216].mxu1 }
 0x8cd   :  { %v4427_v44 = vmax.f32 %v4255_v28, %v4388_v61  ;;  %v4390_v59 = vpop.f32.mrb[217].mxu1  ;;  %v5431_v28 = vld [vmem:[%s10145_s14 + $0x48] sm:$0xff]  ;;  %v5776_v61 = vld [vmem:[%s10147_s18] sm:$0xff] }
 0x8ce   :  { %v4391_v56 = vpop.f32.mrb[218].mxu1 }
 0x8cf   :  { %v4428_v0 = vmax.f32 %v4258_v22, %v4391_v56  ;;  %v4393_v25 = vpop.f32.mrb[219].mxu1  ;;  %v5433_v22 = vld [vmem:[%s10145_s14 + $0x58] sm:$0xff] }
 0x8d1   :  { %v9788_v58 = vpack.c.bf16 %v4428_v0, %v4427_v44 }
 0x8d3   :  { %4516 = vrot.lane.b32.xlu0 %v9788_v58, %s10165_s22 }
 0x8d4   :  { %v4396_v55 = vpop.f32.mrb[220].mxu1 }
 0x8d5   :  { %v4429_v18 = vmax.f32 %v4263_v49, %v4396_v55  ;;  %v4398_v31 = vpop.f32.mrb[221].mxu1  ;;  %v5435_v49 = vld [vmem:[%s10145_s14 + $0x68] sm:$0xff] }
 0x8d6   :  { %v4399_v34 = vpop.f32.mrb[222].mxu1  ;;  %v7977_v55 = vld [vmem:[%s10144_s13 + $0x44] sm:$0xff]   ;;  %v7979_v31 = vld [vmem:[%s10144_s13 + $0x54] sm:$0xff]  }
 0x8d7   :  { %v4430_v2 = vmax.f32 %v4266_v42, %v4399_v34  ;;  %v4401_v9 = vpop.f32.mrb[223].mxu1  ;;  %v5561_v42 = vld [vmem:[%s10146_s16] sm:$0xff] }
 0x8d8   :  { %v7980_v34 = vld [vmem:[%s10144_s13 + $0x5c] sm:$0xff]  }
 0x8d9   :  { %v9792_v43 = vpack.c.bf16 %v4430_v2, %v4429_v18  ;;  %v7978_v18 = vld [vmem:[%s10144_s13 + $0x4c] sm:$0xff]  }
 0x8da   :  { %v7982_v2 = vld [vmem:[%s10144_s13 + $0x6c] sm:$0xff]  }
 0x8db   :  { %4518 = vrot.lane.b32.xlu1 %v9792_v43, %s10165_s22 }
 0x8dc   :  { %v4404_v4 = vpop.f32.mrb[224].mxu1 }
 0x8dd   :  { %v4431_v27 = vmax.f32 %v4271_v40, %v4404_v4  ;;  %v4406_v3 = vpop.f32.mrb[225].mxu1  ;;  %v5563_v40 = vld [vmem:[%s10146_s16 + $0x10] sm:$0xff]  ;;  %v7984_v4 = vld [vmem:[%s10144_s13] sm:$0xff]  }
 0x8de   :  { %v4407_v16 = vpop.f32.mrb[226].mxu1  ;;  %v7986_v3 = vld [vmem:[%s10144_s13 + $0x10] sm:$0xff]  }
 0x8df   :  { %v4432_v5 = vmax.f32 %v4274_v52, %v4407_v16  ;;  %v4409_v57 = vpop.f32.mrb[227].mxu1  ;;  %v5565_v52 = vld [vmem:[%s10146_s16 + $0x20] sm:$0xff] }
 0x8e1   :  { %v9796_v54 = vpack.c.bf16 %v4432_v5, %v4431_v27  ;;  %v7985_v27 = vld [vmem:[%s10144_s13 + $0x8] sm:$0xff]   ;;  %v7987_v5 = vld [vmem:[%s10144_s13 + $0x18] sm:$0xff]  }
 0x8e3   :  { %4520 = vrot.lane.b32.xlu0 %v9796_v54, %s10165_s22 }
 0x8e4   :  { %v4412_v6 = vpop.f32.mrb[228].mxu1 }
 0x8e5   :  { %v4433_v12 = vmax.f32 %v4279_v48, %v4412_v6  ;;  %v4414_v37 = vpop.f32.mrb[229].mxu1  ;;  %v5567_v48 = vld [vmem:[%s10146_s16 + $0x30] sm:$0xff] }
 0x8e6   :  { %v4415_v45 = vpop.f32.mrb[230].mxu1 }
 0x8e7   :  { %v4434_v38 = vmax.f32 %v4282_v13, %v4415_v45  ;;  %v4417_v20 = vpop.f32.mrb[231].mxu1  ;;  %v5569_v13 = vld [vmem:[%s10146_s16 + $0x40] sm:$0xff]  ;;  %v7990_v45 = vld [vmem:[%s10144_s13 + $0x30] sm:$0xff]  }
 0x8e8   :  { %v7991_v20 = vld [vmem:[%s10144_s13 + $0x38] ss:$0 sps:$4 sm:$0xff]  }
 0x8e9   :  { %v9803_v41 = vpack.c.bf16 %v4434_v38, %v4433_v12  ;;  %v7989_v12 = vld [vmem:[%s10144_s13 + $0x28] sm:$0xff]  }
 0x8eb   :  { %4522 = vrot.lane.b32.xlu1 %v9803_v41, %s10165_s22 }
 0x8ec   :  { %v4420_v63 = vpop.f32.mrb[232].mxu1 }
 0x8ed   :  { %v4435_v35 = vmax.f32 %v4287_v51, %v4420_v63  ;;  %v4422_v53 = vpop.f32.mrb[233].mxu1  ;;  %v5571_v51 = vld [vmem:[%s10146_s16 + $0x50] sm:$0xf]  ;;  %v7994_v63 = vld [vmem:[%s10144_s13 + $0x88] sm:$0xff]  }
 0x8ee   :  { %v4423_v50 = vpop.f32.mrb[234].mxu1  ;;  %v7995_v53 = vld [vmem:[%s10144_s13 + $0x90] sm:$0xff]  }
 0x8ef   :  { %v4436_v26 = vmax.f32 %v4290_v47, %v4423_v50  ;;  %4864 = vrot.lane.b32.xlu1 %v9788_v58, %s8030_s30  ;;  %v4425_v21 = vpop.f32.mrb[235].mxu1  ;;  %v5777_v47 = vld [vmem:[%s10147_s18 + $0x8] sm:$0x3] }
 0x8f1   :  { %v9809_v30 = vpack.c.bf16 %v4436_v26, %v4435_v35  ;;  %v7996_v26 = vld [vmem:[%s10144_s13 + $0x98] sm:$0xff]  }
 0x8f3   :  { %4868 = vrot.lane.b32.xlu1 %v9796_v54, %s8030_s30  ;;  %4524 = vrot.lane.b32.xlu0 %v9809_v30, %s10165_s22 }
 0x8f7   :  { %4872 = vrot.lane.b32.xlu1 %v9809_v30, %s8030_s30  ;;  %4866 = vrot.lane.b32.xlu0 %v9792_v43, %s8030_s30 }
 0x8fb   :  { %5070 = vrot.lane.b32.xlu1 %v9792_v43, %s8031_s29  ;;  %4870 = vrot.lane.b32.xlu0 %v9803_v41, %s8030_s30 }
 0x8ff   :  { %5074 = vrot.lane.b32.xlu1 %v9803_v41, %s8031_s29  ;;  %5068 = vrot.lane.b32.xlu0 %v9788_v58, %s8031_s29 }
 0x903   :  { %5272 = vrot.lane.b32.xlu1 %v9788_v58, %s8032_s10  ;;  %5072 = vrot.lane.b32.xlu0 %v9796_v54, %s8031_s29 }
 0x907   :  { %5276 = vrot.lane.b32.xlu1 %v9796_v54, %s8032_s10  ;;  %5076 = vrot.lane.b32.xlu0 %v9809_v30, %s8031_s29 }
 0x90b   :  { %5280 = vrot.lane.b32.xlu1 %v9809_v30, %s8032_s10  ;;  %5274 = vrot.lane.b32.xlu0 %v9792_v43, %s8032_s10 }
 0x90f   :  { %5444 = vperm.xlu1 %7764, %v5423_v46   ;;  %5278 = vrot.lane.b32.xlu0 %v9803_v41, %s8032_s10 }
 0x913   :  { %5454 = vperm.xlu1 %7764, %v5425_v60   ;;  %5439 = vperm.xlu0 %7763, %v5422_v62   ;;  %v7998_v60 = vld [vmem:[%s10144_s13 + $0xa8] sm:$0xff]  }
 0x917   :  { %5464 = vperm.xlu1 %7764, %v5427_v10   ;;  %5449 = vperm.xlu0 %7763, %v5424_v36   ;;  %v7999_v10 = vld [vmem:[%s10144_s13 + $0xb0] ss:$0 sps:$4 sm:$0xff]   ;;  %v8000_v36 = vld [vmem:[%s10144_s13 + $0xb4] sm:$0xff]  }
 0x91b   :  { %5474 = vperm.xlu1 %7764, %v5429_v39   ;;  %5459 = vperm.xlu0 %7763, %v5426_v29   ;;  %v8001_v39 = vld [vmem:[%s10144_s13 + $0xbc] sm:$0xff]   ;;  %v8002_v29 = vld [vmem:[%s10144_s13 + $0xc4] sm:$0xff]  }
 0x91f   :  { %5484 = vperm.xlu1 %7764, %v5431_v28   ;;  %5469 = vperm.xlu0 %7763, %v5428_v33   ;;  %v8003_v33 = vld [vmem:[%s10144_s13 + $0xcc] sm:$0xff]  }
 0x923   :  { %5494 = vperm.xlu1 %7764, %v5433_v22   ;;  %5479 = vperm.xlu0 %7763, %v5430_v32   ;;  %v8004_v32 = vld [vmem:[%s10144_s13 + $0xd4] sm:$0xff]  }
 0x927   :  { %5504 = vperm.xlu1 %7764, %v5435_v49   ;;  %5489 = vperm.xlu0 %7763, %v5432_v14   ;;  %v8005_v14 = vld [vmem:[%s10144_s13 + $0xdc] sm:$0xff]  }
 0x92b   :  { %5574 = vperm.xlu1 %7764, %v5561_v42   ;;  %5499 = vperm.xlu0 %7763, %v5434_v19   ;;  %v8006_v19 = vld [vmem:[%s10144_s13 + $0xe4] sm:$0xff]  }
 0x92f   :  { %5584 = vperm.xlu1 %7764, %v5563_v40   ;;  %5509 = vperm.xlu0 %7763, %v5436_v11   ;;  %v8007_v40 = vld [vmem:[%s10144_s13 + $0xec] ss:$0 sps:$4 sm:$0xff]   ;;  %v8008_v11 = vld [vmem:[%s10144_s13 + $0xf0] sm:$0xff]  }
 0x933   :  { %5594 = vperm.xlu1 %7764, %v5565_v52   ;;  %5579 = vperm.xlu0 %7763, %v5562_v23   ;;  %v8009_v52 = vld [vmem:[%s10144_s13 + $0xf8] sm:$0xff]   ;;  %v8010_v23 = vld [vmem:[%s10144_s13 + $0x100] sm:$0xff]  }
 0x937   :  { %5604 = vperm.xlu1 %7764, %v5567_v48   ;;  %5589 = vperm.xlu0 %7763, %v5564_v8   ;;  %v8011_v48 = vld [vmem:[%s10144_s13 + $0x108] sm:$0xff]   ;;  %v8012_v8 = vld [vmem:[%s10144_s13 + $0x110] sm:$0xff]  }
 0x93b   :  { %5614 = vperm.xlu1 %7764, %v5569_v13   ;;  %5599 = vperm.xlu0 %7763, %v5566_v7   ;;  %v8013_v13 = vld [vmem:[%s10144_s13 + $0x118] sm:$0xff]   ;;  %v8014_v7 = vld [vmem:[%s10144_s13 + $0x120] sm:$0xff]  }
 0x93f   :  { %5624 = vperm.xlu1 %7764, %v5571_v51   ;;  %5609 = vperm.xlu0 %7763, %v5568_v15   ;;  %v8015_v51 = vld [vmem:[%s10144_s13 + $0x128] ss:$0 sps:$4 sm:$0xff]  }
 0x943   :  { %5785 = vperm.xlu1 %7764, %v5777_v47   ;;  %5619 = vperm.xlu0 %7763, %v5570_v24  }
 0x945   :  { %v4517_v44 = vpop.permute.xlu0 %4516 }
 0x946   :  { %7431 = vmatprep.subr.bf16.mxu1 %v4517_v44 }
 0x947   :  { %7432 = vmatpush3.bf16.msra.mxu1 %v4517_v44  ;;  %5780 = vperm.xlu0 %7763, %v5776_v61   ;;  %v8016_v44 = vld [vmem:[%s10148_s15] sm:$0xff]  }
 0x948   :  { %7577 = vmatprep.mubr.msk.bf16.mxu0 %vm5655_vm13, %v8016_v44 }
 0x94d   :  { %v4519_v59 = vpop.permute.xlu1 %4518 }
 0x94e   :  { %7433 = vmatprep.subr.bf16.mxu1 %v4519_v59 }
 0x94f   :  { %7434 = vmatpush3.bf16.msra.mxu1 %v4519_v59 }
 0x955   :  { %v4521_v56 = vpop.permute.xlu0 %4520 }
 0x956   :  { %7435 = vmatprep.subr.bf16.mxu1 %v4521_v56 }
 0x957   :  { %7436 = vmatpush3.bf16.msra.mxu1 %v4521_v56 }
 0x95d   :  { %v4523_v0 = vpop.permute.xlu1 %4522 }
 0x95e   :  { %7437 = vmatprep.subr.bf16.mxu1 %v4523_v0 }
 0x95f   :  { %7438 = vmatpush3.bf16.msra.mxu1 %v4523_v0 }
 0x961   :  { %v4865_v9 = vpop.permute.xlu1 %4864 }
 0x965   :  { %v4525_v25 = vpop.permute.xlu0 %4524  ;;  %v4869_v57 = vpop.permute.xlu1 %4868 }
 0x966   :  { %7439 = vmatprep.subr.bf16.mxu1 %v4525_v25 }
 0x967   :  { %7440 = vmatpush3.bf16.msra.mxu1 %v4525_v25 }
 0x968   :  { %7457 = vmatprep.subr.bf16.mxu1 %v9788_v58 }
 0x969   :  { %v4867_v16 = vpop.permute.xlu0 %4866  ;;  %v4873_v37 = vpop.permute.xlu1 %4872 }
 0x96a   :  { %7442 = vmatmul.mubr.msk.bf16.vlgmr.msra.gmra.mrb[236].mxu1 %vm4531_vm12, %v7977_v55 }
 0x96b   :  { %7458 = vmatpush3.bf16.msra.mxu1 %v9788_v58  ;;  %7445 = vmatprep.mubr.msk.bf16.mxu1 %vm4531_vm12, %v7978_v18  ;;  %v7981_v58 = vld [vmem:[%s10144_s13 + $0x64] sm:$0xff]  }
 0x96c   :  { %7459 = vmatprep.subr.bf16.mxu1 %v9792_v43 }
 0x96d   :  { %v4871_v6 = vpop.permute.xlu0 %4870  ;;  %v5071_v35 = vpop.permute.xlu1 %5070 }
 0x96f   :  { %7460 = vmatpush3.bf16.msra.mxu1 %v9792_v43  ;;  %v7983_v43 = vld [vmem:[%s10144_s13 + $0x74] ss:$0 sps:$4 sm:$0xff]  }
 0x970   :  { %7461 = vmatprep.subr.bf16.mxu1 %v9796_v54 }
 0x971   :  { %v5069_v38 = vpop.permute.xlu0 %5068  ;;  %v5075_v21 = vpop.permute.xlu1 %5074 }
 0x972   :  { %7446 = vmatmul.mubr.msk.bf16.gmra.mrb[240].mxu1 %vm4531_vm12, %v7979_v31 }
 0x973   :  { %7462 = vmatpush3.bf16.msra.mxu1 %v9796_v54  ;;  %7449 = vmatprep.mubr.msk.bf16.mxu1 %vm4531_vm12, %v7980_v34  ;;  %v7988_v54 = vld [vmem:[%s10144_s13 + $0x20] sm:$0xff]  }
 0x974   :  { %7463 = vmatprep.subr.bf16.mxu1 %v9803_v41 }
 0x975   :  { %v5073_v50 = vpop.permute.xlu0 %5072  ;;  %v5273_v62 = vpop.permute.xlu1 %5272 }
 0x977   :  { %7464 = vmatpush3.bf16.msra.mxu1 %v9803_v41  ;;  %v7993_v41 = vld [vmem:[%s10144_s13 + $0x80] sm:$0xff]  }
 0x978   :  { %7465 = vmatprep.subr.bf16.mxu1 %v9809_v30 }
 0x979   :  { %v5077_v46 = vpop.permute.xlu0 %5076  ;;  %v5277_v22 = vpop.permute.xlu1 %5276 }
 0x97a   :  { %7450 = vmatmul.mubr.msk.bf16.gmra.mrb[244].mxu1 %vm4531_vm12, %v7981_v58 }
 0x97b   :  { %7466 = vmatpush3.bf16.msra.mxu1 %v9809_v30  ;;  %7453 = vmatprep.mubr.msk.bf16.mxu1 %vm4531_vm12, %v7982_v2  ;;  %v7997_v30 = vld [vmem:[%s10144_s13 + $0xa0] sm:$0xff]  }
 0x97c   :  { %7483 = vmatprep.subr.bf16.mxu1 %v4865_v9 }
 0x97d   :  { %v5275_v28 = vpop.permute.xlu0 %5274  ;;  %v5281_v42 = vpop.permute.xlu1 %5280 }
 0x981   :  { %v5279_v49 = vpop.permute.xlu0 %5278 }
 0x982   :  { %7454 = vmatmul.mubr.msk.bf16.gmra.mrb[248].mxu1 %vm4531_vm12, %v7983_v43 }
 0x983   :  { %7467 = vmatprep.mubr.msk.bf16.mxu1 %vm4531_vm12, %v7984_v4 }
 0x98a   :  { %7468 = vmatmul.mubr.msk.bf16.vlgmr.msra.gmra.mrb[236].mxu1 %vm4531_vm12, %v7985_v27 }
 0x98b   :  { %7484 = vmatpush3.bf16.msra.mxu1 %v4865_v9  ;;  %7471 = vmatprep.mubr.msk.bf16.mxu1 %vm4531_vm12, %v7986_v3 }
 0x98c   :  { %7485 = vmatprep.subr.bf16.mxu1 %v4867_v16 }
 0x98f   :  { %7486 = vmatpush3.bf16.msra.mxu1 %v4867_v16  ;;  %v5445_v16 = vpop.permute.xlu1 %5444 }
 0x990   :  { %7487 = vmatprep.subr.bf16.mxu1 %v4869_v57 }
 0x992   :  { %7472 = vmatmul.mubr.msk.bf16.gmra.mrb[240].mxu1 %vm4531_vm12, %v7987_v5  ;;  %v5440_v3 = vpop.permute.xlu0 %5439 }
 0x993   :  { %7488 = vmatpush3.bf16.msra.mxu1 %v4869_v57  ;;  %7475 = vmatprep.mubr.msk.bf16.mxu1 %vm4531_vm12, %v7988_v54 }
 0x994   :  { %7489 = vmatprep.subr.bf16.mxu1 %v4871_v6 }
 0x996   :  { %v5450_v5 = vpop.permute.xlu0 %5449 }
 0x997   :  { %7490 = vmatpush3.bf16.msra.mxu1 %v4871_v6 }
 0x998   :  { %7491 = vmatprep.subr.bf16.mxu1 %v4873_v37 }
 0x99a   :  { %7476 = vmatmul.mubr.msk.bf16.gmra.mrb[244].mxu1 %vm4531_vm12, %v7989_v12  ;;  %v5455_v12 = vpop.permute.xlu1 %5454 }
 0x99b   :  { %7492 = vmatpush3.bf16.msra.mxu1 %v4873_v37  ;;  %7479 = vmatprep.mubr.msk.bf16.mxu1 %vm4531_vm12, %v7990_v45 }
 0x99c   :  { %7509 = vmatprep.subr.bf16.mxu1 %v5069_v38 }
 0x9a2   :  { %7480 = vmatmul.mubr.msk.bf16.gmra.mrb[252].mxu1 %vm4531_vm12, %v7991_v20 }
 0x9a3   :  { %7493 = vmatprep.mubr.msk.bf16.mxu1 %vm4531_vm12, %v7992_v17  ;;  %v5460_v17 = vpop.permute.xlu0 %5459 }
 0x9aa   :  { %7494 = vmatmul.mubr.msk.bf16.vlgmr.msra.gmra.mrb[236].mxu1 %vm4531_vm12, %v7993_v41  ;;  %v5465_v41 = vpop.permute.xlu1 %5464 }
 0x9ab   :  { %7510 = vmatpush3.bf16.msra.mxu1 %v5069_v38  ;;  %7497 = vmatprep.mubr.msk.bf16.mxu1 %vm4531_vm12, %v7994_v63 }
 0x9ac   :  { %7511 = vmatprep.subr.bf16.mxu1 %v5071_v35 }
 0x9af   :  { %7512 = vmatpush3.bf16.msra.mxu1 %v5071_v35 }
 0x9b0   :  { %7513 = vmatprep.subr.bf16.mxu1 %v5073_v50 }
 0x9b2   :  { %7498 = vmatmul.mubr.msk.bf16.gmra.mrb[240].mxu1 %vm4531_vm12, %v7995_v53 }
 0x9b3   :  { %7514 = vmatpush3.bf16.msra.mxu1 %v5073_v50  ;;  %7501 = vmatprep.mubr.msk.bf16.mxu1 %vm4531_vm12, %v7996_v26 }
 0x9b4   :  { %7515 = vmatprep.subr.bf16.mxu1 %v5075_v21 }
 0x9b7   :  { %7516 = vmatpush3.bf16.msra.mxu1 %v5075_v21  ;;  %v5470_v21 = vpop.permute.xlu0 %5469 }
 0x9b8   :  { %7517 = vmatprep.subr.bf16.mxu1 %v5077_v46 }
 0x9ba   :  { %7502 = vmatmul.mubr.msk.bf16.gmra.mrb[244].mxu1 %vm4531_vm12, %v7997_v30 }
 0x9bb   :  { %7518 = vmatpush3.bf16.msra.mxu1 %v5077_v46  ;;  %7505 = vmatprep.mubr.msk.bf16.mxu1 %vm4531_vm12, %v7998_v60 }
 0x9bc   :  { %7535 = vmatprep.subr.bf16.mxu1 %v5273_v62 }
 0x9c2   :  { %7506 = vmatmul.mubr.msk.bf16.gmra.mrb[0].mxu1 %vm4531_vm12, %v7999_v10 }
 0x9c3   :  { %7519 = vmatprep.mubr.msk.bf16.mxu1 %vm4531_vm12, %v8000_v36  ;;  %v5475_v36 = vpop.permute.xlu1 %5474 }
 0x9ca   :  { %7520 = vmatmul.mubr.msk.bf16.vlgmr.msra.gmra.mrb[236].mxu1 %vm4531_vm12, %v8001_v39 }
 0x9cb   :  { %7536 = vmatpush3.bf16.msra.mxu1 %v5273_v62  ;;  %7523 = vmatprep.mubr.msk.bf16.mxu1 %vm4531_vm12, %v8002_v29 }
 0x9cc   :  { %7537 = vmatprep.subr.bf16.mxu1 %v5275_v28 }
 0x9cf   :  { %7538 = vmatpush3.bf16.msra.mxu1 %v5275_v28 }
 0x9d0   :  { %7539 = vmatprep.subr.bf16.mxu1 %v5277_v22 }
 0x9d2   :  { %7524 = vmatmul.mubr.msk.bf16.gmra.mrb[240].mxu1 %vm4531_vm12, %v8003_v33 }
 0x9d3   :  { %7540 = vmatpush3.bf16.msra.mxu1 %v5277_v22  ;;  %7527 = vmatprep.mubr.msk.bf16.mxu1 %vm4531_vm12, %v8004_v32  ;;  %v5480_v32 = vpop.permute.xlu0 %5479 }
 0x9d4   :  { %7541 = vmatprep.subr.bf16.mxu1 %v5279_v49 }
 0x9d7   :  { %7542 = vmatpush3.bf16.msra.mxu1 %v5279_v49 }
 0x9d8   :  { %7543 = vmatprep.subr.bf16.mxu1 %v5281_v42 }
 0x9da   :  { %7528 = vmatmul.mubr.msk.bf16.gmra.mrb[244].mxu1 %vm4531_vm12, %v8005_v14 }
 0x9db   :  { %7544 = vmatpush3.bf16.msra.mxu1 %v5281_v42  ;;  %7531 = vmatprep.mubr.msk.bf16.mxu1 %vm4531_vm12, %v8006_v19 }
 0x9e2   :  { %7532 = vmatmul.mubr.msk.bf16.gmra.mrb[4].mxu1 %vm4531_vm12, %v8007_v40 }
 0x9e3   :  { %7545 = vmatprep.mubr.msk.bf16.mxu1 %vm4531_vm12, %v8008_v11 }
 0x9ea   :  { %7546 = vmatmul.mubr.msk.bf16.vlgmr.msra.gmra.mrb[236].mxu1 %vm4531_vm12, %v8009_v52  ;;  %v5485_v52 = vpop.permute.xlu1 %5484 }
 0x9eb   :  { %7549 = vmatprep.mubr.msk.bf16.mxu1 %vm4531_vm12, %v8010_v23 }
 0x9f2   :  { %7550 = vmatmul.mubr.msk.bf16.gmra.mrb[240].mxu1 %vm4531_vm12, %v8011_v48 }
 0x9f3   :  { %7553 = vmatprep.mubr.msk.bf16.mxu1 %vm4531_vm12, %v8012_v8 }
 0x9fa   :  { %7554 = vmatmul.mubr.msk.bf16.gmra.mrb[244].mxu1 %vm4531_vm12, %v8013_v13 }
 0x9fb   :  { %7557 = vmatprep.mubr.msk.bf16.mxu1 %vm4531_vm12, %v8014_v7 }
 0xa02   :  { %7558 = vmatmul.mubr.msk.bf16.gmra.mrb[8].mxu1 %vm4531_vm12, %v8015_v51  ;;  %v5490_v51 = vpop.permute.xlu0 %5489 }
 0xa55   :  { %v7455_v15 = vpop.f32.mrb[248].mxu1 }
 0xa56   :  { %v4638_v47 = vpop.f32.mrb[249].mxu1 }
 0xa57   :  { %v7456_v24 = vpop.f32.mrb[250].mxu1 }
 0xa58   :  { %v4641_v61 = vpop.f32.mrb[251].mxu1 }
 0xa75   :  { %v7481_v59 = vpop.f32.mrb[252].mxu1 }
 0xa76   :  { %v4805_v56 = vadd.f32 %v7481_v59, %v7455_v15  ;;  %v4796_v0 = vpop.f32.mrb[253].mxu1  ;;  %v5495_v59 = vpop.permute.xlu1 %5494 }
 0xa77   :  { %v4797_v25 = vadd.f32 %v4796_v0, %v4638_v47  ;;  %v7482_v55 = vpop.f32.mrb[254].mxu1 }
 0xa78   :  { %v4799_v18 = vpop.f32.mrb[255].mxu1 }
 0xa79   :  { %v4800_v31 = vadd.f32 %v4799_v18, %v4641_v61 }
 0xa95   :  { %v7507_v34 = vpop.f32.mrb[0].mxu1 }
 0xa96   :  { %v5013_v58 = vadd.f32 %v7507_v34, %v4805_v56  ;;  %v4985_v2 = vpop.f32.mrb[1].mxu1 }
 0xa97   :  { %v5011_v9 = vadd.f32 %v4985_v2, %v4797_v25  ;;  %v7508_v43 = vpop.f32.mrb[2].mxu1 }
 0xa98   :  { %v4988_v4 = vpop.f32.mrb[3].mxu1 }
 0xa99   :  { %v5012_v27 = vadd.f32 %v4988_v4, %v4800_v31  ;;  %v5500_v31 = vpop.permute.xlu0 %5499 }
 0xab5   :  { %v7533_v57 = vpop.f32.mrb[4].mxu1 }
 0xab6   :  { %v10081_v54 = vadd.f32 %v7533_v57, %v5013_v58  ;;  %v5189_v6 = vpop.f32.mrb[5].mxu1 }
 0xab7   :  { %v10083_v37 = vadd.f32 %v5189_v6, %v5011_v9  ;;  %v7534_v45 = vpop.f32.mrb[6].mxu1  ;;  %v5510_v6 = vpop.permute.xlu0 %5509 }
 0xab8   :  { %v5192_v38 = vpop.f32.mrb[7].mxu1 }
 0xab9   :  { %v10085_v20 = vadd.f32 %v5192_v38, %v5012_v27 }
 0xabd   :  { %v7547_v63 = vpop.f32.mrb[236].mxu1 }
 0xabe   :  { %v5514_v35 = vadd.f32 %v7547_v63, %v5450_v5  ;;  %v5345_v53 = vpop.f32.mrb[237].mxu1 }
 0xabf   :  { %v5512_v50 = vadd.f32 %v5440_v3, %v5345_v53  ;;  %v7548_v26 = vpop.f32.mrb[238].mxu1 }
 0xac0   :  { %v5515_v30 = vadd.f32 %v7548_v26, %v5455_v12  ;;  %v5348_v46 = vpop.f32.mrb[239].mxu1  ;;  %v5529_v62 = vmax.f32 %v5514_v35, 0.0 }
 0xac1   :  { %v5513_v60 = vadd.f32 %v5445_v16, %v5348_v46  ;;  %v5527_v39 = vmax.f32 %v5512_v50, 0.0  ;;  %v8020_v46 = vld [vmem:[%s10148_s15 + $0x20] sm:$0xff]  }
 0xac2   :  { %v5530_v10 = vmax.f32 %v5515_v30, 0.0  ;;  %v8019_v30 = vld [vmem:[%s10148_s15 + $0x18] sm:$0xff]  }
 0xac3   :  { %v5528_v29 = vmax.f32 %v5513_v60, 0.0  ;;  %v8021_v60 = vld [vmem:[%s10148_s15 + $0x28] ss:$0 sps:$4 sm:$0x33]  }
 0xac4   :  { %v5543_v28 = vpack.c.bf16 %v5530_v10, %v5529_v62 }
 0xac5   :  { %v5542_v33 = vpack.c.bf16 %v5528_v29, %v5527_v39  ;;  %v7551_v22 = vpop.f32.mrb[240].mxu1 }
 0xac6   :  { %v5518_v49 = vadd.f32 %v7551_v22, %v5470_v21  ;;  %v5361_v14 = vpop.f32.mrb[241].mxu1  ;;  %v8017_v21 = vld [vmem:[%s10148_s15 + $0x8] sm:$0xff]  }
 0xac7   :  { %v5516_v42 = vadd.f32 %v5460_v17, %v5361_v14  ;;  %v7552_v19 = vpop.f32.mrb[242].mxu1  ;;  %7561 = vmatprep.subr.bf16.mxu0 %v5542_v33 }
 0xac8   :  { %v5519_v40 = vadd.f32 %v7552_v19, %v5475_v36  ;;  %v5364_v11 = vpop.f32.mrb[243].mxu1  ;;  %7562 = vmatpush3.bf16.msra.mxu0 %v5542_v33  ;;  %v5533_v48 = vmax.f32 %v5518_v49, 0.0  ;;  %v5580_v36 = vpop.permute.xlu0 %5579 }
 0xac9   :  { %v5517_v23 = vadd.f32 %v5465_v41, %v5364_v11  ;;  %7563 = vmatprep.subr.bf16.mxu0 %v5543_v28  ;;  %v5531_v13 = vmax.f32 %v5516_v42, 0.0  ;;  %v5505_v41 = vpop.permute.xlu1 %5504 }
 0xaca   :  { %v5534_v8 = vmax.f32 %v5519_v40, 0.0 }
 0xacb   :  { %v5532_v7 = vmax.f32 %v5517_v23, 0.0 }
 0xacc   :  { %v5545_v15 = vpack.c.bf16 %v5534_v8, %v5533_v48  ;;  %7564 = vmatpush3.bf16.msra.mxu0 %v5543_v28  ;;  %v5590_v29 = vpop.permute.xlu0 %5589 }
 0xacd   :  { %v5544_v47 = vpack.c.bf16 %v5532_v7, %v5531_v13  ;;  %v7555_v24 = vpop.f32.mrb[244].mxu1  ;;  %v5575_v62 = vpop.permute.xlu1 %5574 }
 0xace   :  { %v5522_v61 = vadd.f32 %v7555_v24, %v5490_v51  ;;  %v5377_v44 = vpop.f32.mrb[245].mxu1 }
 0xacf   :  { %v5520_v56 = vadd.f32 %v5480_v32, %v5377_v44  ;;  %v7556_v0 = vpop.f32.mrb[246].mxu1  ;;  %7565 = vmatprep.subr.bf16.mxu0 %v5544_v47 }
 0xad0   :  { %v5523_v25 = vadd.f32 %v7556_v0, %v5495_v59  ;;  %v5380_v55 = vpop.f32.mrb[247].mxu1  ;;  %7566 = vmatpush3.bf16.msra.mxu0 %v5544_v47  ;;  %v5537_v34 = vmax.f32 %v5522_v61, 0.0  ;;  %v5600_v40 = vpop.permute.xlu0 %5599 }
 0xad1   :  { %v5521_v18 = vadd.f32 %v5485_v52, %v5380_v55  ;;  %7567 = vmatprep.subr.bf16.mxu0 %v5545_v15  ;;  %v5535_v2 = vmax.f32 %v5520_v56, 0.0  ;;  %v5585_v10 = vpop.permute.xlu1 %5584 }
 0xad2   :  { %v5538_v58 = vmax.f32 %v5523_v25, 0.0 }
 0xad3   :  { %v5536_v9 = vmax.f32 %v5521_v18, 0.0 }
 0xad4   :  { %v5547_v43 = vpack.c.bf16 %v5538_v58, %v5537_v34  ;;  %7568 = vmatpush3.bf16.msra.mxu0 %v5545_v15  ;;  %v5610_v61 = vpop.permute.xlu0 %5609 }
 0xad5   :  { %v5546_v4 = vpack.c.bf16 %v5536_v9, %v5535_v2  ;;  %v7559_v27 = vpop.f32.mrb[8].mxu1  ;;  %v5595_v39 = vpop.permute.xlu1 %5594 }
 0xad6   :  { %v5421_v3 = vadd.f32 %v7559_v27, %v10081_v54  ;;  %v5393_v16 = vpop.f32.mrb[9].mxu1 }
 0xad7   :  { %v5419_v5 = vadd.f32 %v5393_v16, %v10083_v37  ;;  %v7560_v57 = vpop.f32.mrb[10].mxu1  ;;  %7569 = vmatprep.subr.bf16.mxu0 %v5546_v4 }
 0xad8   :  { %v5396_v12 = vpop.f32.mrb[11].mxu1  ;;  %7570 = vmatpush3.bf16.msra.mxu0 %v5546_v4  ;;  %v5526_v45 = vadd.f32 %v5510_v6, %v5421_v3 }
 0xad9   :  { %v5524_v38 = vadd.f32 %v5500_v31, %v5419_v5  ;;  %v5420_v17 = vadd.f32 %v5396_v12, %v10085_v20  ;;  %7571 = vmatprep.subr.bf16.mxu0 %v5547_v43  ;;  %v8018_v20 = vld [vmem:[%s10148_s15 + $0x10] sm:$0xff]   ;;  %v5605_v14 = vpop.permute.xlu1 %5604  ;;  %v5620_v5 = vpop.permute.xlu0 %5619 }
 0xada   :  { %v5541_v35 = vmax.f32 %v5526_v45, 0.0 }
 0xadb   :  { %v5525_v63 = vadd.f32 %v5505_v41, %v5420_v17  ;;  %v5539_v53 = vmax.f32 %v5524_v38, 0.0 }
 0xadc   :  { %7572 = vmatpush3.bf16.msra.mxu0 %v5547_v43  ;;  %v5549_v26 = vpack.c.bf16 %v5541_v35, %v5541_v35  ;;  %v8022_v35 = vld [vmem:[%s10149_s17] sm:$0x1f]  }
 0xadd   :  { %v5540_v50 = vmax.f32 %v5525_v63, 0.0  ;;  %v5615_v15 = vpop.permute.xlu1 %5614 }
 0xade   :  { %v5675_v37 = vsel %vm2151_vm7, %v5549_v26, 0 }
 0xadf   :  { %v5548_v54 = vpack.c.bf16 %v5540_v50, %v5539_v53  ;;  %v5781_v53 = vpop.permute.xlu0 %5780 }
 0xae1   :  { %7573 = vmatprep.subr.bf16.mxu0 %v5548_v54  ;;  %v5625_v2 = vpop.permute.xlu1 %5624 }
 0xae2   :  { %7574 = vmatpush3.bf16.msra.mxu0 %v5548_v54 }
 0xae3   :  { %7752 = vmatprep.subr.msk.bf16.mxu0 %vm2151_vm7, %v5549_v26 }
 0xae6   :  { %7576 = vmatpush3.bf16.msra.mxu0 %v5675_v37  ;;  %v5786_v37 = vpop.permute.xlu1 %5785 }
 0xae7   :  { %7589 = vmatprep.subr.bf16.mxu0 %v8023_v1 }
 0xae9   :  { %7578 = vmatmul.mubr.msk.bf16.vlgmr.msra.gmra.mrb[220].mxu0 %vm5655_vm13, %v8017_v21 }
 0xaea   :  { %7581 = vmatprep.mubr.msk.bf16.mxu0 %vm5655_vm13, %v8018_v20 }
 0xaf1   :  { %7582 = vmatmul.mubr.msk.bf16.gmra.mrb[224].mxu0 %vm5655_vm13, %v8019_v30 }
 0xaf2   :  { %7585 = vmatprep.mubr.msk.bf16.mxu0 %vm5655_vm13, %v8020_v46 }
 0xaf9   :  { %7586 = vmatmul.mubr.msk.bf16.gmra.mrb[228].mxu0 %vm5655_vm13, %v8021_v60 }
 0xafa   :  { %7601 = vmatprep.mubr.msk.bf16.mxu0 %vm8025_vm0, %v8023_v1 }
 0xbbc   :  { %v7579_v28 = vpop.f32.mrb[220].mxu0 }
 0xbbd   :  { %v5720_v33 = vadd.f32 %v7579_v28, %v5585_v10  ;;  %v5711_v22 = vpop.f32.mrb[221].mxu0 }
 0xbbe   :  { %v5712_v32 = vadd.f32 %v5711_v22, %v5575_v62  ;;  %v7580_v49 = vpop.f32.mrb[222].mxu0 }
 0xbbf   :  { %v5723_v42 = vadd.f32 %v7580_v49, %v5590_v29  ;;  %v5714_v19 = vpop.f32.mrb[223].mxu0  ;;  %v5759_v52 = vmax.f32 %v5720_v33, 0.0 }
 0xbc0   :  { %v5715_v11 = vadd.f32 %v5714_v19, %v5580_v36  ;;  %v5757_v48 = vmax.f32 %v5712_v32, 0.0 }
 0xbc1   :  { %v5760_v23 = vmax.f32 %v5723_v42, 0.0 }
 0xbc2   :  { %v5758_v8 = vmax.f32 %v5715_v11, 0.0 }
 0xbc3   :  { %v5769_v13 = vpack.c.bf16 %v5760_v23, %v5759_v52 }
 0xbc4   :  { %v5768_v7 = vpack.c.bf16 %v5758_v8, %v5757_v48  ;;  %v7583_v51 = vpop.f32.mrb[224].mxu0 }
 0xbc5   :  { %v5736_v47 = vadd.f32 %v7583_v51, %v5605_v14  ;;  %v5727_v24 = vpop.f32.mrb[225].mxu0 }
 0xbc6   :  { %v5728_v44 = vadd.f32 %v5727_v24, %v5595_v39  ;;  %v7584_v59 = vpop.f32.mrb[226].mxu0  ;;  %7590 = vmatpush3.bf16.msra.mxu0 %v5768_v7 }
 0xbc7   :  { %v5739_v56 = vadd.f32 %v7584_v59, %v5610_v61  ;;  %v5730_v0 = vpop.f32.mrb[227].mxu0  ;;  %7591 = vmatprep.subr.bf16.mxu0 %v8023_v1  ;;  %v5763_v55 = vmax.f32 %v5736_v47, 0.0 }
 0xbc8   :  { %v5731_v25 = vadd.f32 %v5730_v0, %v5600_v40  ;;  %v5761_v31 = vmax.f32 %v5728_v44, 0.0 }
 0xbc9   :  { %v5764_v18 = vmax.f32 %v5739_v56, 0.0 }
 0xbca   :  { %v5762_v34 = vmax.f32 %v5731_v25, 0.0  ;;  %7592 = vmatpush3.bf16.msra.mxu0 %v5769_v13 }
 0xbcb   :  { %v5771_v58 = vpack.c.bf16 %v5764_v18, %v5763_v55  ;;  %7593 = vmatprep.subr.bf16.mxu0 %v8023_v1 }
 0xbcc   :  { %v5770_v9 = vpack.c.bf16 %v5762_v34, %v5761_v31  ;;  %v7587_v43 = vpop.f32.mrb[228].mxu0 }
 0xbcd   :  { %v5752_v4 = vadd.f32 %v7587_v43, %v5625_v2  ;;  %v5743_v27 = vpop.f32.mrb[229].mxu0 }
 0xbce   :  { %v5744_v3 = vadd.f32 %v5743_v27, %v5615_v15  ;;  %v7588_v16 = vpop.f32.mrb[230].mxu0  ;;  %7594 = vmatpush3.bf16.msra.mxu0 %v5770_v9 }
 0xbcf   :  { %v5746_v57 = vpop.f32.mrb[231].mxu0  ;;  %7595 = vmatprep.subr.bf16.mxu0 %v8023_v1  ;;  %v5767_v12 = vmax.f32 %v5752_v4, 0.0 }
 0xbd0   :  { %v5747_v6 = vadd.f32 %v5746_v57, %v5620_v5  ;;  %v5765_v45 = vmax.f32 %v5744_v3, 0.0 }
 0xbd1   :  { %v5773_v41 = vpack.c.bf16 %v5767_v12, %v5767_v12 }
 0xbd2   :  { %v5766_v38 = vmax.f32 %v5747_v6, 0.0  ;;  %7596 = vmatpush3.bf16.msra.mxu0 %v5771_v58 }
 0xbd3   :  { %7597 = vmatprep.subr.bf16.mxu0 %v8023_v1  ;;  %v5797_v63 = vsel %vm2566_vm9, %v5773_v41, 0 }
 0xbd4   :  { %v5772_v17 = vpack.c.bf16 %v5766_v38, %v5765_v45 }
 0xbd6   :  { %7598 = vmatpush3.bf16.msra.mxu0 %v5772_v17 }
 0xbd7   :  { %7599 = vmatprep.subr.bf16.mxu0 %v8023_v1 }
 0xbda   :  { %7600 = vmatpush3.bf16.msra.mxu0 %v5797_v63 }
 0xbdd   :  { %7602 = vmatmul.mubr.msk.bf16.vlgmr.msra.gmra.mrb[232].mxu0 %vm2535_vm8, %v8022_v35 }
 0xcb0   :  { %v5833_v50 = vpop.f32.mrb[232].mxu0 }
 0xcb1   :  { %v5834_v54 = vadd.f32 %v5833_v50, %v5781_v53  ;;  %v7603_v26 = vpop.f32.mrb[233].mxu0 }
 0xcb2   :  { %v5836_v21 = vpop.f32.mrb[234].mxu0 }
 0xcb3   :  { %5841 = vst.msk [vmem:[%s10150_s19] sm:$0xff] %vm5840_vm14, %v5834_v54  ;;  %v5837_v1 = vadd.f32 %v5836_v21, %v5786_v37  ;;  %v7604_v20 = vpop.f32.mrb[235].mxu0 }
 0xcb5   :  { %5843 = vst.msk [vmem:[%s10150_s19 + $0x8] sm:$0x3] %vm5842_vm15, %v5837_v1 }

</bundles_post_ra>
